<compile_context>
chip_gen: v7x
topology: tpu7x:2x2x1
jax: 0.10.0
libtpu: 0.0.40
codegen_flags: <defaults>
</compile_context>

<pallas_src>
import functools
import math

import jax
import jax.numpy as jnp
from jax import lax
from jax.experimental import pallas as pl
from jax.experimental.pallas import tpu as pltpu

# ----------------------------- small roberta-like config ---------------------
VOCAB = 1000
HIDDEN = 128
N_LAYERS = 2
N_HEADS = 4
HEAD_DIM = HIDDEN // N_HEADS
INTERMEDIATE = 512
MAX_POS = 64
LN_EPS = 1e-5
INIT_STD = 0.02

# packed 1-row parameter table: rows 0/1 = emb LN gain/bias, then 7 rows per
# layer (o_b, ln1_g, ln1_b, ff1_b, ff2_b, ln2_g, ln2_b), last row = pooler bias.
_ROWS_PER_LAYER = 7
_N_VEC_ROWS = 2 + _ROWS_PER_LAYER * N_LAYERS + 1


# ----------------------------- fused encoder kernel --------------------------
def _layernorm(x, g, b):
    """f32 layernorm over the last dim (statistics kept in f32)."""
    mu = jnp.mean(x, axis=-1, keepdims=True)
    xc = x - mu
    var = jnp.mean(xc * xc, axis=-1, keepdims=True)
    inv = lax.rsqrt(var + LN_EPS)
    return xc * inv * g + b


def _encoder_kernel(h0_ref, bias_ref, qkv_w_ref, qkv_b_ref, o_w_ref,
                    ff1_w_ref, ff2_w_ref, pool_w_ref, vec_ref,
                    out_ref, qkv_st_ref, *, bs):
    """Whole encoder + pooler in one VMEM-resident kernel (no grid).

    bs = batch * seq (rows of the activation). The attention works on a
    (head, batch, seq)-stacked layout of T = N_HEADS * bs rows.
    """
    scale = 1.0 / math.sqrt(HEAD_DIM)

    def vrow(r, width=HIDDEN):
        # static ref slice of the packed 1-row parameter table -> (1, width)
        return vec_ref[r:r + 1, 0:width]

    # embedding LayerNorm
    h = _layernorm(h0_ref[...], vrow(0), vrow(1))          # (bs, H) f32

    # combined block-diagonal + key-padding additive bias, loaded once
    attn_bias = bias_ref[...]                              # (T, T) f32

    for l in range(N_LAYERS):                              # static unroll
        base = 2 + _ROWS_PER_LAYER * l
        h_bf = h.astype(jnp.bfloat16)                      # one cast per layer

        # ---- per-head Q/K/V from statically sliced weight refs; results are
        #      stored at static offsets into the stacked VMEM scratch ----
        for idx in range(3):                               # 0=q, 1=k, 2=v
            for hh in range(N_HEADS):
                w_flat = (l * 3 + idx) * N_HEADS + hh
                r = jnp.dot(h_bf, qkv_w_ref[w_flat],
                            preferred_element_type=jnp.float32) + qkv_b_ref[w_flat]
                if idx == 0:
                    r = r * scale                          # fold 1/sqrt(dH) into q
                qkv_st_ref[idx, hh * bs:(hh + 1) * bs, :] = r.astype(jnp.bfloat16)

        q_st = qkv_st_ref[0]                               # (T, dH) bf16
        k_st = qkv_st_ref[1]
        v_st = qkv_st_ref[2]

        # ---- ONE batched attention for all (head, batch) blocks ----
        s = lax.dot_general(q_st, k_st, (((1,), (1,)), ((), ())),
                            preferred_element_type=jnp.float32)       # (T, T)
        s = s + attn_bias                                  # block-diag + key mask
        s = s - jnp.max(s, axis=-1, keepdims=True)
        p = jnp.exp(s)
        p = p * pl.reciprocal(jnp.sum(p, axis=-1, keepdims=True), approx=True)
        ctx = jnp.dot(p.astype(jnp.bfloat16), v_st,
                      preferred_element_type=jnp.float32)              # (T, dH)
        ctx_bf = ctx.astype(jnp.bfloat16)

        # ---- O-projection: head merge folded into a sum of per-head matmuls ----
        attn_out = vrow(base + 0)                          # o_b (1, H)
        for hh in range(N_HEADS):
            attn_out = attn_out + jnp.dot(
                ctx_bf[hh * bs:(hh + 1) * bs, :], o_w_ref[l * N_HEADS + hh],
                preferred_element_type=jnp.float32)
        h = _layernorm(h + attn_out, vrow(base + 1), vrow(base + 2))

        # ---- feed-forward + residual + LN ----
        ff = jnp.dot(h.astype(jnp.bfloat16), ff1_w_ref[l],
                     preferred_element_type=jnp.float32) + vrow(base + 3, INTERMEDIATE)
        # TODO(synk): PyTorch/HF uses exact erf GELU; tanh approximation chosen
        # for the EUP (tiny numerical deviation, acceptable for inference).
        ff = jax.nn.gelu(ff, approximate=True)
        ff = jnp.dot(ff.astype(jnp.bfloat16), ff2_w_ref[l],
                     preferred_element_type=jnp.float32) + vrow(base + 4)
        h = _layernorm(h + ff, vrow(base + 5), vrow(base + 6))

    # ---- pooler over ALL rows (lane-dense output); wrapper picks CLS rows ----
    pooled = jnp.tanh(jnp.dot(h.astype(jnp.bfloat16), pool_w_ref[...],
                              preferred_element_type=jnp.float32)
                      + vrow(2 + _ROWS_PER_LAYER * N_LAYERS))
    out_ref[...] = pooled


def encoder_pallas(h0, attn_bias, params, bs):
    """bs = batch*seq (static)."""
    return pl.pallas_call(
        functools.partial(_encoder_kernel, bs=bs),
        out_shape=jax.ShapeDtypeStruct((bs, HIDDEN), jnp.float32),
        scratch_shapes=[pltpu.VMEM((3, N_HEADS * bs, HEAD_DIM), jnp.bfloat16)],
    )(h0, attn_bias,
      params["qkv_w"], params["qkv_b"], params["o_w"],
      params["ff1_w"], params["ff2_w"], params["pool_w"], params["vec"])


# ----------------------------- parameter init (deterministic) ----------------
def init_params(seed=0):
    key = jax.random.PRNGKey(seed)
    ks = jax.random.split(key, 8)

    def nrm(k, shape, dtype=jnp.bfloat16):
        return (INIT_STD * jax.random.normal(k, shape, jnp.float32)).astype(dtype)

    # head-major QKV weights: flat index ((l*3 + idx)*N_HEADS + h) -> (H, dH)
    qkv_w = nrm(ks[3], (N_LAYERS * 3 * N_HEADS, HIDDEN, HEAD_DIM))
    qkv_b = jnp.zeros((N_LAYERS * 3 * N_HEADS, 1, HEAD_DIM), jnp.float32)
    # head-major O weights: flat index (l*N_HEADS + h) -> (dH, H)
    o_w = nrm(ks[4], (N_LAYERS * N_HEADS, HEAD_DIM, HIDDEN))
    ff1_w = nrm(ks[5], (N_LAYERS, HIDDEN, INTERMEDIATE))
    ff2_w = nrm(ks[6], (N_LAYERS, INTERMEDIATE, HIDDEN))
    pool_w = nrm(ks[7], (HIDDEN, HIDDEN))

    # packed 1-row f32 parameters (gains/biases); LN gains set to 1
    vec = jnp.zeros((_N_VEC_ROWS, INTERMEDIATE), jnp.float32)
    vec = vec.at[0, :HIDDEN].set(1.0)                      # emb_ln_g
    for l in range(N_LAYERS):
        base = 2 + _ROWS_PER_LAYER * l
        vec = vec.at[base + 1, :HIDDEN].set(1.0)           # ln1_g
        vec = vec.at[base + 5, :HIDDEN].set(1.0)           # ln2_g
    # o_b, ln*_b, ff*_b, pool_b stay zero

    return {
        # embeddings (gather stays in f32 / XLA glue)
        "word_emb": nrm(ks[0], (VOCAB, HIDDEN), jnp.float32),
        "pos_emb":  nrm(ks[1], (MAX_POS, HIDDEN), jnp.float32),
        "type_emb": nrm(ks[2], (1, HIDDEN), jnp.float32),
        "qkv_w": qkv_w, "qkv_b": qkv_b, "o_w": o_w,
        "ff1_w": ff1_w, "ff2_w": ff2_w, "pool_w": pool_w,
        "vec": vec,
    }


# ----------------------------- forward (BertClassifier.forward) --------------
@jax.jit
def bert_classifier_forward(params, input_id, mask):
    """input_id: (B, S) int32 ; mask: (B, S) {0,1}.  Returns (B, HIDDEN) f32."""
    B, S = input_id.shape

    # embeddings (gather is XLA glue; everything downstream is one Pallas kernel)
    tok = jnp.take(params["word_emb"], input_id, axis=0)          # (B, S, H)
    pos = params["pos_emb"][:S][None, :, :]                       # (1, S, H)
    typ = params["type_emb"][0][None, None, :]                    # (1, 1, H)
    h0 = (tok + pos + typ).reshape(B * S, HIDDEN)

    # combined additive attention bias for the (head, batch, seq)-stacked scores:
    # row/col t = h*(B*S) + b*S + i ; only same-(head,batch) blocks may interact,
    # and padded keys get -1e9.  Built once here (hoists all in-kernel broadcasts).
    T = N_HEADS * B * S
    blk = jnp.arange(T) // S
    block_bias = jnp.where(blk[:, None] == blk[None, :], 0.0, -1e9)
    key_mask = jnp.tile(mask.astype(jnp.float32).reshape(1, B * S), (1, N_HEADS))
    attn_bias = (block_bias + (1.0 - key_mask) * (-1e9)).astype(jnp.float32)

    pooled_all = encoder_pallas(h0, attn_bias, params, B * S)     # (B*S, H)
    pooled = pooled_all.reshape(B, S, HIDDEN)[:, 0, :]            # CLS rows

    # nn.Dropout(0.1) is identity in eval mode (deterministic forward).
    # TODO(synk): training-mode stochastic dropout (pltpu.prng_*) intentionally omitted.
    return pooled


# ----------------------------- main -------------------------------------------
if __name__ == "__main__":
    B, S = 2, 8
    key = jax.random.PRNGKey(0)
    k_ids, _ = jax.random.split(key)
    input_id = jax.random.randint(k_ids, (B, S), 0, VOCAB, dtype=jnp.int32)
    mask = jnp.array([[1] * S, [1] * (S - 3) + [0] * 3], dtype=jnp.float32)

    params = init_params(seed=0)
    out = bert_classifier_forward(params, input_id, mask)
    out = jax.block_until_ready(out)
    assert out.shape == (B, HIDDEN) and out.dtype == jnp.float32
    assert bool(jnp.all(jnp.isfinite(out)))
    print("KERNEL_OK")
</pallas_src>

<mosaic_0001>
module attributes {stable_mosaic.version = 11 : i64} {
  func.func @_encoder_kernel(%arg0: memref<16x128xf32, #tpu.memory_space<vmem>>, %arg1: memref<64x64xf32, #tpu.memory_space<vmem>>, %arg2: memref<24x128x32xbf16, #tpu.memory_space<vmem>>, %arg3: memref<24x1x32xf32, #tpu.memory_space<vmem>>, %arg4: memref<8x32x128xbf16, #tpu.memory_space<vmem>>, %arg5: memref<2x128x512xbf16, #tpu.memory_space<vmem>>, %arg6: memref<2x512x128xbf16, #tpu.memory_space<vmem>>, %arg7: memref<128x128xbf16, #tpu.memory_space<vmem>>, %arg8: memref<17x512xf32, #tpu.memory_space<vmem>>, %arg9: memref<16x128xf32, #tpu.memory_space<vmem>>, %arg10: memref<3x64x32xbf16, #tpu.memory_space<vmem>>) attributes {dimension_semantics = [], scalar_prefetch = 0 : i64, scratch_operands = 1 : i64, tpu.core_type = #tpu.core_type<tc>} {
    %c0 = arith.constant 0 : index
    %c0_0 = arith.constant 0 : index
    %0 = vector.load %arg0[%c0, %c0_0] : memref<16x128xf32, #tpu.memory_space<vmem>>, vector<16x128xf32>
    %c0_1 = arith.constant 0 : index
    %c0_2 = arith.constant 0 : index
    %1 = vector.load %arg8[%c0_1, %c0_2] : memref<17x512xf32, #tpu.memory_space<vmem>>, vector<1x128xf32>
    %c1 = arith.constant 1 : index
    %c0_3 = arith.constant 0 : index
    %2 = vector.load %arg8[%c1, %c0_3] : memref<17x512xf32, #tpu.memory_space<vmem>>, vector<1x128xf32>
    %cst = arith.constant dense<0.000000e+00> : vector<16xf32>
    %3 = vector.multi_reduction <add>, %0, %cst [1] : vector<16x128xf32> to vector<16xf32>
    %4 = vector.shape_cast %3 : vector<16xf32> to vector<16x1xf32>
    %cst_4 = arith.constant 1.280000e+02 : f32
    %5 = vector.broadcast %cst_4 : f32 to vector<16x1xf32>
    %6 = arith.divf %4, %5 : vector<16x1xf32>
    %7 = vector.broadcast %6 : vector<16x1xf32> to vector<16x128xf32>
    %8 = arith.subf %0, %7 : vector<16x128xf32>
    %9 = arith.mulf %8, %8 : vector<16x128xf32>
    %cst_5 = arith.constant dense<0.000000e+00> : vector<16xf32>
    %10 = vector.multi_reduction <add>, %9, %cst_5 [1] : vector<16x128xf32> to vector<16xf32>
    %11 = vector.shape_cast %10 : vector<16xf32> to vector<16x1xf32>
    %cst_6 = arith.constant 1.280000e+02 : f32
    %12 = vector.broadcast %cst_6 : f32 to vector<16x1xf32>
    %13 = arith.divf %11, %12 : vector<16x1xf32>
    %cst_7 = arith.constant 9.99999974E-6 : f32
    %14 = vector.broadcast %cst_7 : f32 to vector<16x1xf32>
    %15 = arith.addf %13, %14 : vector<16x1xf32>
    %16 = math.rsqrt %15 : vector<16x1xf32>
    %17 = vector.broadcast %16 : vector<16x1xf32> to vector<16x128xf32>
    %18 = arith.mulf %8, %17 : vector<16x128xf32>
    %19 = vector.broadcast %1 : vector<1x128xf32> to vector<16x128xf32>
    %20 = arith.mulf %18, %19 : vector<16x128xf32>
    %21 = vector.broadcast %2 : vector<1x128xf32> to vector<16x128xf32>
    %22 = arith.addf %20, %21 : vector<16x128xf32>
    %c0_8 = arith.constant 0 : index
    %c0_9 = arith.constant 0 : index
    %23 = vector.load %arg1[%c0_8, %c0_9] : memref<64x64xf32, #tpu.memory_space<vmem>>, vector<64x64xf32>
    %24 = arith.truncf %22 : vector<16x128xf32> to vector<16x128xbf16>
    %c0_10 = arith.constant 0 : index
    %c0_11 = arith.constant 0 : index
    %c0_12 = arith.constant 0 : index
    %25 = vector.load %arg2[%c0_10, %c0_11, %c0_12] : memref<24x128x32xbf16, #tpu.memory_space<vmem>>, vector<1x128x32xbf16>
    %26 = vector.shape_cast %25 : vector<1x128x32xbf16> to vector<128x32xbf16>
    %cst_13 = arith.constant dense<0.000000e+00> : vector<16x32xf32>
    %27 = tpu.matmul %24, %26, %cst_13 {dimension_numbers = #tpu.dot_dimension_numbers<[1], [0], [0], [1], [0, 0, 1, 1], [], []>} : vector<16x128xbf16>, vector<128x32xbf16>, vector<16x32xf32> -> vector<16x32xf32>
    %c0_14 = arith.constant 0 : index
    %c0_15 = arith.constant 0 : index
    %c0_16 = arith.constant 0 : index
    %28 = vector.load %arg3[%c0_14, %c0_15, %c0_16] : memref<24x1x32xf32, #tpu.memory_space<vmem>>, vector<1x1x32xf32>
    %29 = vector.shape_cast %28 : vector<1x1x32xf32> to vector<1x32xf32>
    %30 = vector.broadcast %29 : vector<1x32xf32> to vector<16x32xf32>
    %31 = arith.addf %27, %30 : vector<16x32xf32>
    %cst_17 = arith.constant 0.176776692 : f32
    %32 = vector.broadcast %cst_17 : f32 to vector<16x32xf32>
    %33 = arith.mulf %31, %32 : vector<16x32xf32>
    %34 = arith.truncf %33 : vector<16x32xf32> to vector<16x32xbf16>
    %c0_18 = arith.constant 0 : index
    %c0_19 = arith.constant 0 : index
    %c0_20 = arith.constant 0 : index
    %35 = vector.load %arg10[%c0_18, %c0_19, %c0_20] : memref<3x64x32xbf16, #tpu.memory_space<vmem>>, vector<1x16x32xbf16>
    %36 = vector.shape_cast %35 : vector<1x16x32xbf16> to vector<16x32xbf16>
    %37 = vector.shape_cast %34 : vector<16x32xbf16> to vector<1x16x32xbf16>
    tpu.vector_store %arg10[%c0_18, %c0_19, %c0_20], %37 {strides = array<i32>} : memref<3x64x32xbf16, #tpu.memory_space<vmem>>, vector<1x16x32xbf16>,
    %c1_21 = arith.constant 1 : index
    %c0_22 = arith.constant 0 : index
    %c0_23 = arith.constant 0 : index
    %38 = vector.load %arg2[%c1_21, %c0_22, %c0_23] : memref<24x128x32xbf16, #tpu.memory_space<vmem>>, vector<1x128x32xbf16>
    %39 = vector.shape_cast %38 : vector<1x128x32xbf16> to vector<128x32xbf16>
    %cst_24 = arith.constant dense<0.000000e+00> : vector<16x32xf32>
    %40 = tpu.matmul %24, %39, %cst_24 {dimension_numbers = #tpu.dot_dimension_numbers<[1], [0], [0], [1], [0, 0, 1, 1], [], []>} : vector<16x128xbf16>, vector<128x32xbf16>, vector<16x32xf32> -> vector<16x32xf32>
    %c1_25 = arith.constant 1 : index
    %c0_26 = arith.constant 0 : index
    %c0_27 = arith.constant 0 : index
    %41 = vector.load %arg3[%c1_25, %c0_26, %c0_27] : memref<24x1x32xf32, #tpu.memory_space<vmem>>, vector<1x1x32xf32>
    %42 = vector.shape_cast %41 : vector<1x1x32xf32> to vector<1x32xf32>
    %43 = vector.broadcast %42 : vector<1x32xf32> to vector<16x32xf32>
    %44 = arith.addf %40, %43 : vector<16x32xf32>
    %cst_28 = arith.constant 0.176776692 : f32
    %45 = vector.broadcast %cst_28 : f32 to vector<16x32xf32>
    %46 = arith.mulf %44, %45 : vector<16x32xf32>
    %47 = arith.truncf %46 : vector<16x32xf32> to vector<16x32xbf16>
    %c0_29 = arith.constant 0 : index
    %c16 = arith.constant 16 : index
    %c0_30 = arith.constant 0 : index
    %48 = vector.load %arg10[%c0_29, %c16, %c0_30] : memref<3x64x32xbf16, #tpu.memory_space<vmem>>, vector<1x16x32xbf16>
    %49 = vector.shape_cast %48 : vector<1x16x32xbf16> to vector<16x32xbf16>
    %50 = vector.shape_cast %47 : vector<16x32xbf16> to vector<1x16x32xbf16>
    tpu.vector_store %arg10[%c0_29, %c16, %c0_30], %50 {strides = array<i32>} : memref<3x64x32xbf16, #tpu.memory_space<vmem>>, vector<1x16x32xbf16>,
    %c2 = arith.constant 2 : index
    %c0_31 = arith.constant 0 : index
    %c0_32 = arith.constant 0 : index
    %51 = vector.load %arg2[%c2, %c0_31, %c0_32] : memref<24x128x32xbf16, #tpu.memory_space<vmem>>, vector<1x128x32xbf16>
    %52 = vector.shape_cast %51 : vector<1x128x32xbf16> to vector<128x32xbf16>
    %cst_33 = arith.constant dense<0.000000e+00> : vector<16x32xf32>
    %53 = tpu.matmul %24, %52, %cst_33 {dimension_numbers = #tpu.dot_dimension_numbers<[1], [0], [0], [1], [0, 0, 1, 1], [], []>} : vector<16x128xbf16>, vector<128x32xbf16>, vector<16x32xf32> -> vector<16x32xf32>
    %c2_34 = arith.constant 2 : index
    %c0_35 = arith.constant 0 : index
    %c0_36 = arith.constant 0 : index
    %54 = vector.load %arg3[%c2_34, %c0_35, %c0_36] : memref<24x1x32xf32, #tpu.memory_space<vmem>>, vector<1x1x32xf32>
    %55 = vector.shape_cast %54 : vector<1x1x32xf32> to vector<1x32xf32>
    %56 = vector.broadcast %55 : vector<1x32xf32> to vector<16x32xf32>
    %57 = arith.addf %53, %56 : vector<16x32xf32>
    %cst_37 = arith.constant 0.176776692 : f32
    %58 = vector.broadcast %cst_37 : f32 to vector<16x32xf32>
    %59 = arith.mulf %57, %58 : vector<16x32xf32>
    %60 = arith.truncf %59 : vector<16x32xf32> to vector<16x32xbf16>
    %c0_38 = arith.constant 0 : index
    %c32 = arith.constant 32 : index
    %c0_39 = arith.constant 0 : index
    %61 = vector.load %arg10[%c0_38, %c32, %c0_39] : memref<3x64x32xbf16, #tpu.memory_space<vmem>>, vector<1x16x32xbf16>
    %62 = vector.shape_cast %61 : vector<1x16x32xbf16> to vector<16x32xbf16>
    %63 = vector.shape_cast %60 : vector<16x32xbf16> to vector<1x16x32xbf16>
    tpu.vector_store %arg10[%c0_38, %c32, %c0_39], %63 {strides = array<i32>} : memref<3x64x32xbf16, #tpu.memory_space<vmem>>, vector<1x16x32xbf16>,
    %c3 = arith.constant 3 : index
    %c0_40 = arith.constant 0 : index
    %c0_41 = arith.constant 0 : index
    %64 = vector.load %arg2[%c3, %c0_40, %c0_41] : memref<24x128x32xbf16, #tpu.memory_space<vmem>>, vector<1x128x32xbf16>
    %65 = vector.shape_cast %64 : vector<1x128x32xbf16> to vector<128x32xbf16>
    %cst_42 = arith.constant dense<0.000000e+00> : vector<16x32xf32>
    %66 = tpu.matmul %24, %65, %cst_42 {dimension_numbers = #tpu.dot_dimension_numbers<[1], [0], [0], [1], [0, 0, 1, 1], [], []>} : vector<16x128xbf16>, vector<128x32xbf16>, vector<16x32xf32> -> vector<16x32xf32>
    %c3_43 = arith.constant 3 : index
    %c0_44 = arith.constant 0 : index
    %c0_45 = arith.constant 0 : index
    %67 = vector.load %arg3[%c3_43, %c0_44, %c0_45] : memref<24x1x32xf32, #tpu.memory_space<vmem>>, vector<1x1x32xf32>
    %68 = vector.shape_cast %67 : vector<1x1x32xf32> to vector<1x32xf32>
    %69 = vector.broadcast %68 : vector<1x32xf32> to vector<16x32xf32>
    %70 = arith.addf %66, %69 : vector<16x32xf32>
    %cst_46 = arith.constant 0.176776692 : f32
    %71 = vector.broadcast %cst_46 : f32 to vector<16x32xf32>
    %72 = arith.mulf %70, %71 : vector<16x32xf32>
    %73 = arith.truncf %72 : vector<16x32xf32> to vector<16x32xbf16>
    %c0_47 = arith.constant 0 : index
    %c48 = arith.constant 48 : index
    %c0_48 = arith.constant 0 : index
    %74 = vector.load %arg10[%c0_47, %c48, %c0_48] : memref<3x64x32xbf16, #tpu.memory_space<vmem>>, vector<1x16x32xbf16>
    %75 = vector.shape_cast %74 : vector<1x16x32xbf16> to vector<16x32xbf16>
    %76 = vector.shape_cast %73 : vector<16x32xbf16> to vector<1x16x32xbf16>
    tpu.vector_store %arg10[%c0_47, %c48, %c0_48], %76 {strides = array<i32>} : memref<3x64x32xbf16, #tpu.memory_space<vmem>>, vector<1x16x32xbf16>,
    %c4 = arith.constant 4 : index
    %c0_49 = arith.constant 0 : index
    %c0_50 = arith.constant 0 : index
    %77 = vector.load %arg2[%c4, %c0_49, %c0_50] : memref<24x128x32xbf16, #tpu.memory_space<vmem>>, vector<1x128x32xbf16>
    %78 = vector.shape_cast %77 : vector<1x128x32xbf16> to vector<128x32xbf16>
    %cst_51 = arith.constant dense<0.000000e+00> : vector<16x32xf32>
    %79 = tpu.matmul %24, %78, %cst_51 {dimension_numbers = #tpu.dot_dimension_numbers<[1], [0], [0], [1], [0, 0, 1, 1], [], []>} : vector<16x128xbf16>, vector<128x32xbf16>, vector<16x32xf32> -> vector<16x32xf32>
    %c4_52 = arith.constant 4 : index
    %c0_53 = arith.constant 0 : index
    %c0_54 = arith.constant 0 : index
    %80 = vector.load %arg3[%c4_52, %c0_53, %c0_54] : memref<24x1x32xf32, #tpu.memory_space<vmem>>, vector<1x1x32xf32>
    %81 = vector.shape_cast %80 : vector<1x1x32xf32> to vector<1x32xf32>
    %82 = vector.broadcast %81 : vector<1x32xf32> to vector<16x32xf32>
    %83 = arith.addf %79, %82 : vector<16x32xf32>
    %84 = arith.truncf %83 : vector<16x32xf32> to vector<16x32xbf16>
    %c1_55 = arith.constant 1 : index
    %c0_56 = arith.constant 0 : index
    %c0_57 = arith.constant 0 : index
    %85 = vector.load %arg10[%c1_55, %c0_56, %c0_57] : memref<3x64x32xbf16, #tpu.memory_space<vmem>>, vector<1x16x32xbf16>
    %86 = vector.shape_cast %85 : vector<1x16x32xbf16> to vector<16x32xbf16>
    %87 = vector.shape_cast %84 : vector<16x32xbf16> to vector<1x16x32xbf16>
    tpu.vector_store %arg10[%c1_55, %c0_56, %c0_57], %87 {strides = array<i32>} : memref<3x64x32xbf16, #tpu.memory_space<vmem>>, vector<1x16x32xbf16>,
    %c5 = arith.constant 5 : index
    %c0_58 = arith.constant 0 : index
    %c0_59 = arith.constant 0 : index
    %88 = vector.load %arg2[%c5, %c0_58, %c0_59] : memref<24x128x32xbf16, #tpu.memory_space<vmem>>, vector<1x128x32xbf16>
    %89 = vector.shape_cast %88 : vector<1x128x32xbf16> to vector<128x32xbf16>
    %cst_60 = arith.constant dense<0.000000e+00> : vector<16x32xf32>
    %90 = tpu.matmul %24, %89, %cst_60 {dimension_numbers = #tpu.dot_dimension_numbers<[1], [0], [0], [1], [0, 0, 1, 1], [], []>} : vector<16x128xbf16>, vector<128x32xbf16>, vector<16x32xf32> -> vector<16x32xf32>
    %c5_61 = arith.constant 5 : index
    %c0_62 = arith.constant 0 : index
    %c0_63 = arith.constant 0 : index
    %91 = vector.load %arg3[%c5_61, %c0_62, %c0_63] : memref<24x1x32xf32, #tpu.memory_space<vmem>>, vector<1x1x32xf32>
    %92 = vector.shape_cast %91 : vector<1x1x32xf32> to vector<1x32xf32>
    %93 = vector.broadcast %92 : vector<1x32xf32> to vector<16x32xf32>
    %94 = arith.addf %90, %93 : vector<16x32xf32>
    %95 = arith.truncf %94 : vector<16x32xf32> to vector<16x32xbf16>
    %c1_64 = arith.constant 1 : index
    %c16_65 = arith.constant 16 : index
    %c0_66 = arith.constant 0 : index
    %96 = vector.load %arg10[%c1_64, %c16_65, %c0_66] : memref<3x64x32xbf16, #tpu.memory_space<vmem>>, vector<1x16x32xbf16>
    %97 = vector.shape_cast %96 : vector<1x16x32xbf16> to vector<16x32xbf16>
    %98 = vector.shape_cast %95 : vector<16x32xbf16> to vector<1x16x32xbf16>
    tpu.vector_store %arg10[%c1_64, %c16_65, %c0_66], %98 {strides = array<i32>} : memref<3x64x32xbf16, #tpu.memory_space<vmem>>, vector<1x16x32xbf16>,
    %c6 = arith.constant 6 : index
    %c0_67 = arith.constant 0 : index
    %c0_68 = arith.constant 0 : index
    %99 = vector.load %arg2[%c6, %c0_67, %c0_68] : memref<24x128x32xbf16, #tpu.memory_space<vmem>>, vector<1x128x32xbf16>
    %100 = vector.shape_cast %99 : vector<1x128x32xbf16> to vector<128x32xbf16>
    %cst_69 = arith.constant dense<0.000000e+00> : vector<16x32xf32>
    %101 = tpu.matmul %24, %100, %cst_69 {dimension_numbers = #tpu.dot_dimension_numbers<[1], [0], [0], [1], [0, 0, 1, 1], [], []>} : vector<16x128xbf16>, vector<128x32xbf16>, vector<16x32xf32> -> vector<16x32xf32>
    %c6_70 = arith.constant 6 : index
    %c0_71 = arith.constant 0 : index
    %c0_72 = arith.constant 0 : index
    %102 = vector.load %arg3[%c6_70, %c0_71, %c0_72] : memref<24x1x32xf32, #tpu.memory_space<vmem>>, vector<1x1x32xf32>
    %103 = vector.shape_cast %102 : vector<1x1x32xf32> to vector<1x32xf32>
    %104 = vector.broadcast %103 : vector<1x32xf32> to vector<16x32xf32>
    %105 = arith.addf %101, %104 : vector<16x32xf32>
    %106 = arith.truncf %105 : vector<16x32xf32> to vector<16x32xbf16>
    %c1_73 = arith.constant 1 : index
    %c32_74 = arith.constant 32 : index
    %c0_75 = arith.constant 0 : index
    %107 = vector.load %arg10[%c1_73, %c32_74, %c0_75] : memref<3x64x32xbf16, #tpu.memory_space<vmem>>, vector<1x16x32xbf16>
    %108 = vector.shape_cast %107 : vector<1x16x32xbf16> to vector<16x32xbf16>
    %109 = vector.shape_cast %106 : vector<16x32xbf16> to vector<1x16x32xbf16>
    tpu.vector_store %arg10[%c1_73, %c32_74, %c0_75], %109 {strides = array<i32>} : memref<3x64x32xbf16, #tpu.memory_space<vmem>>, vector<1x16x32xbf16>,
    %c7 = arith.constant 7 : index
    %c0_76 = arith.constant 0 : index
    %c0_77 = arith.constant 0 : index
    %110 = vector.load %arg2[%c7, %c0_76, %c0_77] : memref<24x128x32xbf16, #tpu.memory_space<vmem>>, vector<1x128x32xbf16>
    %111 = vector.shape_cast %110 : vector<1x128x32xbf16> to vector<128x32xbf16>
    %cst_78 = arith.constant dense<0.000000e+00> : vector<16x32xf32>
    %112 = tpu.matmul %24, %111, %cst_78 {dimension_numbers = #tpu.dot_dimension_numbers<[1], [0], [0], [1], [0, 0, 1, 1], [], []>} : vector<16x128xbf16>, vector<128x32xbf16>, vector<16x32xf32> -> vector<16x32xf32>
    %c7_79 = arith.constant 7 : index
    %c0_80 = arith.constant 0 : index
    %c0_81 = arith.constant 0 : index
    %113 = vector.load %arg3[%c7_79, %c0_80, %c0_81] : memref<24x1x32xf32, #tpu.memory_space<vmem>>, vector<1x1x32xf32>
    %114 = vector.shape_cast %113 : vector<1x1x32xf32> to vector<1x32xf32>
    %115 = vector.broadcast %114 : vector<1x32xf32> to vector<16x32xf32>
    %116 = arith.addf %112, %115 : vector<16x32xf32>
    %117 = arith.truncf %116 : vector<16x32xf32> to vector<16x32xbf16>
    %c1_82 = arith.constant 1 : index
    %c48_83 = arith.constant 48 : index
    %c0_84 = arith.constant 0 : index
    %118 = vector.load %arg10[%c1_82, %c48_83, %c0_84] : memref<3x64x32xbf16, #tpu.memory_space<vmem>>, vector<1x16x32xbf16>
    %119 = vector.shape_cast %118 : vector<1x16x32xbf16> to vector<16x32xbf16>
    %120 = vector.shape_cast %117 : vector<16x32xbf16> to vector<1x16x32xbf16>
    tpu.vector_store %arg10[%c1_82, %c48_83, %c0_84], %120 {strides = array<i32>} : memref<3x64x32xbf16, #tpu.memory_space<vmem>>, vector<1x16x32xbf16>,
    %c8 = arith.constant 8 : index
    %c0_85 = arith.constant 0 : index
    %c0_86 = arith.constant 0 : index
    %121 = vector.load %arg2[%c8, %c0_85, %c0_86] : memref<24x128x32xbf16, #tpu.memory_space<vmem>>, vector<1x128x32xbf16>
    %122 = vector.shape_cast %121 : vector<1x128x32xbf16> to vector<128x32xbf16>
    %cst_87 = arith.constant dense<0.000000e+00> : vector<16x32xf32>
    %123 = tpu.matmul %24, %122, %cst_87 {dimension_numbers = #tpu.dot_dimension_numbers<[1], [0], [0], [1], [0, 0, 1, 1], [], []>} : vector<16x128xbf16>, vector<128x32xbf16>, vector<16x32xf32> -> vector<16x32xf32>
    %c8_88 = arith.constant 8 : index
    %c0_89 = arith.constant 0 : index
    %c0_90 = arith.constant 0 : index
    %124 = vector.load %arg3[%c8_88, %c0_89, %c0_90] : memref<24x1x32xf32, #tpu.memory_space<vmem>>, vector<1x1x32xf32>
    %125 = vector.shape_cast %124 : vector<1x1x32xf32> to vector<1x32xf32>
    %126 = vector.broadcast %125 : vector<1x32xf32> to vector<16x32xf32>
    %127 = arith.addf %123, %126 : vector<16x32xf32>
    %128 = arith.truncf %127 : vector<16x32xf32> to vector<16x32xbf16>
    %c2_91 = arith.constant 2 : index
    %c0_92 = arith.constant 0 : index
    %c0_93 = arith.constant 0 : index
    %129 = vector.load %arg10[%c2_91, %c0_92, %c0_93] : memref<3x64x32xbf16, #tpu.memory_space<vmem>>, vector<1x16x32xbf16>
    %130 = vector.shape_cast %129 : vector<1x16x32xbf16> to vector<16x32xbf16>
    %131 = vector.shape_cast %128 : vector<16x32xbf16> to vector<1x16x32xbf16>
    tpu.vector_store %arg10[%c2_91, %c0_92, %c0_93], %131 {strides = array<i32>} : memref<3x64x32xbf16, #tpu.memory_space<vmem>>, vector<1x16x32xbf16>,
    %c9 = arith.constant 9 : index
    %c0_94 = arith.constant 0 : index
    %c0_95 = arith.constant 0 : index
    %132 = vector.load %arg2[%c9, %c0_94, %c0_95] : memref<24x128x32xbf16, #tpu.memory_space<vmem>>, vector<1x128x32xbf16>
    %133 = vector.shape_cast %132 : vector<1x128x32xbf16> to vector<128x32xbf16>
    %cst_96 = arith.constant dense<0.000000e+00> : vector<16x32xf32>
    %134 = tpu.matmul %24, %133, %cst_96 {dimension_numbers = #tpu.dot_dimension_numbers<[1], [0], [0], [1], [0, 0, 1, 1], [], []>} : vector<16x128xbf16>, vector<128x32xbf16>, vector<16x32xf32> -> vector<16x32xf32>
    %c9_97 = arith.constant 9 : index
    %c0_98 = arith.constant 0 : index
    %c0_99 = arith.constant 0 : index
    %135 = vector.load %arg3[%c9_97, %c0_98, %c0_99] : memref<24x1x32xf32, #tpu.memory_space<vmem>>, vector<1x1x32xf32>
    %136 = vector.shape_cast %135 : vector<1x1x32xf32> to vector<1x32xf32>
    %137 = vector.broadcast %136 : vector<1x32xf32> to vector<16x32xf32>
    %138 = arith.addf %134, %137 : vector<16x32xf32>
    %139 = arith.truncf %138 : vector<16x32xf32> to vector<16x32xbf16>
    %c2_100 = arith.constant 2 : index
    %c16_101 = arith.constant 16 : index
    %c0_102 = arith.constant 0 : index
    %140 = vector.load %arg10[%c2_100, %c16_101, %c0_102] : memref<3x64x32xbf16, #tpu.memory_space<vmem>>, vector<1x16x32xbf16>
    %141 = vector.shape_cast %140 : vector<1x16x32xbf16> to vector<16x32xbf16>
    %142 = vector.shape_cast %139 : vector<16x32xbf16> to vector<1x16x32xbf16>
    tpu.vector_store %arg10[%c2_100, %c16_101, %c0_102], %142 {strides = array<i32>} : memref<3x64x32xbf16, #tpu.memory_space<vmem>>, vector<1x16x32xbf16>,
    %c10 = arith.constant 10 : index
    %c0_103 = arith.constant 0 : index
    %c0_104 = arith.constant 0 : index
    %143 = vector.load %arg2[%c10, %c0_103, %c0_104] : memref<24x128x32xbf16, #tpu.memory_space<vmem>>, vector<1x128x32xbf16>
    %144 = vector.shape_cast %143 : vector<1x128x32xbf16> to vector<128x32xbf16>
    %cst_105 = arith.constant dense<0.000000e+00> : vector<16x32xf32>
    %145 = tpu.matmul %24, %144, %cst_105 {dimension_numbers = #tpu.dot_dimension_numbers<[1], [0], [0], [1], [0, 0, 1, 1], [], []>} : vector<16x128xbf16>, vector<128x32xbf16>, vector<16x32xf32> -> vector<16x32xf32>
    %c10_106 = arith.constant 10 : index
    %c0_107 = arith.constant 0 : index
    %c0_108 = arith.constant 0 : index
    %146 = vector.load %arg3[%c10_106, %c0_107, %c0_108] : memref<24x1x32xf32, #tpu.memory_space<vmem>>, vector<1x1x32xf32>
    %147 = vector.shape_cast %146 : vector<1x1x32xf32> to vector<1x32xf32>
    %148 = vector.broadcast %147 : vector<1x32xf32> to vector<16x32xf32>
    %149 = arith.addf %145, %148 : vector<16x32xf32>
    %150 = arith.truncf %149 : vector<16x32xf32> to vector<16x32xbf16>
    %c2_109 = arith.constant 2 : index
    %c32_110 = arith.constant 32 : index
    %c0_111 = arith.constant 0 : index
    %151 = vector.load %arg10[%c2_109, %c32_110, %c0_111] : memref<3x64x32xbf16, #tpu.memory_space<vmem>>, vector<1x16x32xbf16>
    %152 = vector.shape_cast %151 : vector<1x16x32xbf16> to vector<16x32xbf16>
    %153 = vector.shape_cast %150 : vector<16x32xbf16> to vector<1x16x32xbf16>
    tpu.vector_store %arg10[%c2_109, %c32_110, %c0_111], %153 {strides = array<i32>} : memref<3x64x32xbf16, #tpu.memory_space<vmem>>, vector<1x16x32xbf16>,
    %c11 = arith.constant 11 : index
    %c0_112 = arith.constant 0 : index
    %c0_113 = arith.constant 0 : index
    %154 = vector.load %arg2[%c11, %c0_112, %c0_113] : memref<24x128x32xbf16, #tpu.memory_space<vmem>>, vector<1x128x32xbf16>
    %155 = vector.shape_cast %154 : vector<1x128x32xbf16> to vector<128x32xbf16>
    %cst_114 = arith.constant dense<0.000000e+00> : vector<16x32xf32>
    %156 = tpu.matmul %24, %155, %cst_114 {dimension_numbers = #tpu.dot_dimension_numbers<[1], [0], [0], [1], [0, 0, 1, 1], [], []>} : vector<16x128xbf16>, vector<128x32xbf16>, vector<16x32xf32> -> vector<16x32xf32>
    %c11_115 = arith.constant 11 : index
    %c0_116 = arith.constant 0 : index
    %c0_117 = arith.constant 0 : index
    %157 = vector.load %arg3[%c11_115, %c0_116, %c0_117] : memref<24x1x32xf32, #tpu.memory_space<vmem>>, vector<1x1x32xf32>
    %158 = vector.shape_cast %157 : vector<1x1x32xf32> to vector<1x32xf32>
    %159 = vector.broadcast %158 : vector<1x32xf32> to vector<16x32xf32>
    %160 = arith.addf %156, %159 : vector<16x32xf32>
    %161 = arith.truncf %160 : vector<16x32xf32> to vector<16x32xbf16>
    %c2_118 = arith.constant 2 : index
    %c48_119 = arith.constant 48 : index
    %c0_120 = arith.constant 0 : index
    %162 = vector.load %arg10[%c2_118, %c48_119, %c0_120] : memref<3x64x32xbf16, #tpu.memory_space<vmem>>, vector<1x16x32xbf16>
    %163 = vector.shape_cast %162 : vector<1x16x32xbf16> to vector<16x32xbf16>
    %164 = vector.shape_cast %161 : vector<16x32xbf16> to vector<1x16x32xbf16>
    tpu.vector_store %arg10[%c2_118, %c48_119, %c0_120], %164 {strides = array<i32>} : memref<3x64x32xbf16, #tpu.memory_space<vmem>>, vector<1x16x32xbf16>,
    %c0_121 = arith.constant 0 : index
    %c0_122 = arith.constant 0 : index
    %c0_123 = arith.constant 0 : index
    %165 = vector.load %arg10[%c0_121, %c0_122, %c0_123] : memref<3x64x32xbf16, #tpu.memory_space<vmem>>, vector<1x64x32xbf16>
    %166 = vector.shape_cast %165 : vector<1x64x32xbf16> to vector<64x32xbf16>
    %c1_124 = arith.constant 1 : index
    %c0_125 = arith.constant 0 : index
    %c0_126 = arith.constant 0 : index
    %167 = vector.load %arg10[%c1_124, %c0_125, %c0_126] : memref<3x64x32xbf16, #tpu.memory_space<vmem>>, vector<1x64x32xbf16>
    %168 = vector.shape_cast %167 : vector<1x64x32xbf16> to vector<64x32xbf16>
    %c2_127 = arith.constant 2 : index
    %c0_128 = arith.constant 0 : index
    %c0_129 = arith.constant 0 : index
    %169 = vector.load %arg10[%c2_127, %c0_128, %c0_129] : memref<3x64x32xbf16, #tpu.memory_space<vmem>>, vector<1x64x32xbf16>
    %170 = vector.shape_cast %169 : vector<1x64x32xbf16> to vector<64x32xbf16>
    %cst_130 = arith.constant dense<0.000000e+00> : vector<64x64xf32>
    %171 = tpu.matmul %166, %168, %cst_130 {dimension_numbers = #tpu.dot_dimension_numbers<[1], [1], [0], [0], [0, 0, 1, 0], [], []>} : vector<64x32xbf16>, vector<64x32xbf16>, vector<64x64xf32> -> vector<64x64xf32>
    %172 = arith.addf %171, %23 : vector<64x64xf32>
    %cst_131 = arith.constant dense<0xFF800000> : vector<64xf32>
    %173 = vector.multi_reduction <maximumf>, %172, %cst_131 [1] : vector<64x64xf32> to vector<64xf32>
    %174 = vector.shape_cast %173 : vector<64xf32> to vector<64x1xf32>
    %175 = vector.broadcast %174 : vector<64x1xf32> to vector<64x64xf32>
    %176 = arith.subf %172, %175 : vector<64x64xf32>
    %177 = math.exp %176 : vector<64x64xf32>
    %cst_132 = arith.constant dense<0.000000e+00> : vector<64xf32>
    %178 = vector.multi_reduction <add>, %177, %cst_132 [1] : vector<64x64xf32> to vector<64xf32>
    %179 = vector.shape_cast %178 : vector<64xf32> to vector<64x1xf32>
    %180 = tpu.reciprocal %179 {approx = true} : vector<64x1xf32> -> vector<64x1xf32>
    %181 = vector.broadcast %180 : vector<64x1xf32> to vector<64x64xf32>
    %182 = arith.mulf %177, %181 : vector<64x64xf32>
    %183 = arith.truncf %182 : vector<64x64xf32> to vector<64x64xbf16>
    %cst_133 = arith.constant dense<0.000000e+00> : vector<64x32xf32>
    %184 = tpu.matmul %183, %170, %cst_133 {dimension_numbers = #tpu.dot_dimension_numbers<[1], [0], [0], [1], [0, 0, 1, 1], [], []>} : vector<64x64xbf16>, vector<64x32xbf16>, vector<64x32xf32> -> vector<64x32xf32>
    %185 = arith.truncf %184 : vector<64x32xf32> to vector<64x32xbf16>
    %c2_134 = arith.constant 2 : index
    %c0_135 = arith.constant 0 : index
    %186 = vector.load %arg8[%c2_134, %c0_135] : memref<17x512xf32, #tpu.memory_space<vmem>>, vector<1x128xf32>
    %187 = vector.extract_strided_slice %185 {offsets = [0, 0], sizes = [16, 32], strides = [1, 1]} : vector<64x32xbf16> to vector<16x32xbf16>
    %c0_136 = arith.constant 0 : index
    %c0_137 = arith.constant 0 : index
    %c0_138 = arith.constant 0 : index
    %188 = vector.load %arg4[%c0_136, %c0_137, %c0_138] : memref<8x32x128xbf16, #tpu.memory_space<vmem>>, vector<1x32x128xbf16>
    %189 = vector.shape_cast %188 : vector<1x32x128xbf16> to vector<32x128xbf16>
    %cst_139 = arith.constant dense<0.000000e+00> : vector<16x128xf32>
    %190 = tpu.matmul %187, %189, %cst_139 {dimension_numbers = #tpu.dot_dimension_numbers<[1], [0], [0], [1], [0, 0, 1, 1], [], []>} : vector<16x32xbf16>, vector<32x128xbf16>, vector<16x128xf32> -> vector<16x128xf32>
    %191 = vector.broadcast %186 : vector<1x128xf32> to vector<16x128xf32>
    %192 = arith.addf %191, %190 : vector<16x128xf32>
    %193 = vector.extract_strided_slice %185 {offsets = [16, 0], sizes = [16, 32], strides = [1, 1]} : vector<64x32xbf16> to vector<16x32xbf16>
    %c1_140 = arith.constant 1 : index
    %c0_141 = arith.constant 0 : index
    %c0_142 = arith.constant 0 : index
    %194 = vector.load %arg4[%c1_140, %c0_141, %c0_142] : memref<8x32x128xbf16, #tpu.memory_space<vmem>>, vector<1x32x128xbf16>
    %195 = vector.shape_cast %194 : vector<1x32x128xbf16> to vector<32x128xbf16>
    %cst_143 = arith.constant dense<0.000000e+00> : vector<16x128xf32>
    %196 = tpu.matmul %193, %195, %cst_143 {dimension_numbers = #tpu.dot_dimension_numbers<[1], [0], [0], [1], [0, 0, 1, 1], [], []>} : vector<16x32xbf16>, vector<32x128xbf16>, vector<16x128xf32> -> vector<16x128xf32>
    %197 = arith.addf %192, %196 : vector<16x128xf32>
    %198 = vector.extract_strided_slice %185 {offsets = [32, 0], sizes = [16, 32], strides = [1, 1]} : vector<64x32xbf16> to vector<16x32xbf16>
    %c2_144 = arith.constant 2 : index
    %c0_145 = arith.constant 0 : index
    %c0_146 = arith.constant 0 : index
    %199 = vector.load %arg4[%c2_144, %c0_145, %c0_146] : memref<8x32x128xbf16, #tpu.memory_space<vmem>>, vector<1x32x128xbf16>
    %200 = vector.shape_cast %199 : vector<1x32x128xbf16> to vector<32x128xbf16>
    %cst_147 = arith.constant dense<0.000000e+00> : vector<16x128xf32>
    %201 = tpu.matmul %198, %200, %cst_147 {dimension_numbers = #tpu.dot_dimension_numbers<[1], [0], [0], [1], [0, 0, 1, 1], [], []>} : vector<16x32xbf16>, vector<32x128xbf16>, vector<16x128xf32> -> vector<16x128xf32>
    %202 = arith.addf %197, %201 : vector<16x128xf32>
    %203 = vector.extract_strided_slice %185 {offsets = [48, 0], sizes = [16, 32], strides = [1, 1]} : vector<64x32xbf16> to vector<16x32xbf16>
    %c3_148 = arith.constant 3 : index
    %c0_149 = arith.constant 0 : index
    %c0_150 = arith.constant 0 : index
    %204 = vector.load %arg4[%c3_148, %c0_149, %c0_150] : memref<8x32x128xbf16, #tpu.memory_space<vmem>>, vector<1x32x128xbf16>
    %205 = vector.shape_cast %204 : vector<1x32x128xbf16> to vector<32x128xbf16>
    %cst_151 = arith.constant dense<0.000000e+00> : vector<16x128xf32>
    %206 = tpu.matmul %203, %205, %cst_151 {dimension_numbers = #tpu.dot_dimension_numbers<[1], [0], [0], [1], [0, 0, 1, 1], [], []>} : vector<16x32xbf16>, vector<32x128xbf16>, vector<16x128xf32> -> vector<16x128xf32>
    %207 = arith.addf %202, %206 : vector<16x128xf32>
    %208 = arith.addf %22, %207 : vector<16x128xf32>
    %c3_152 = arith.constant 3 : index
    %c0_153 = arith.constant 0 : index
    %209 = vector.load %arg8[%c3_152, %c0_153] : memref<17x512xf32, #tpu.memory_space<vmem>>, vector<1x128xf32>
    %c4_154 = arith.constant 4 : index
    %c0_155 = arith.constant 0 : index
    %210 = vector.load %arg8[%c4_154, %c0_155] : memref<17x512xf32, #tpu.memory_space<vmem>>, vector<1x128xf32>
    %cst_156 = arith.constant dense<0.000000e+00> : vector<16xf32>
    %211 = vector.multi_reduction <add>, %208, %cst_156 [1] : vector<16x128xf32> to vector<16xf32>
    %212 = vector.shape_cast %211 : vector<16xf32> to vector<16x1xf32>
    %cst_157 = arith.constant 1.280000e+02 : f32
    %213 = vector.broadcast %cst_157 : f32 to vector<16x1xf32>
    %214 = arith.divf %212, %213 : vector<16x1xf32>
    %215 = vector.broadcast %214 : vector<16x1xf32> to vector<16x128xf32>
    %216 = arith.subf %208, %215 : vector<16x128xf32>
    %217 = arith.mulf %216, %216 : vector<16x128xf32>
    %cst_158 = arith.constant dense<0.000000e+00> : vector<16xf32>
    %218 = vector.multi_reduction <add>, %217, %cst_158 [1] : vector<16x128xf32> to vector<16xf32>
    %219 = vector.shape_cast %218 : vector<16xf32> to vector<16x1xf32>
    %cst_159 = arith.constant 1.280000e+02 : f32
    %220 = vector.broadcast %cst_159 : f32 to vector<16x1xf32>
    %221 = arith.divf %219, %220 : vector<16x1xf32>
    %cst_160 = arith.constant 9.99999974E-6 : f32
    %222 = vector.broadcast %cst_160 : f32 to vector<16x1xf32>
    %223 = arith.addf %221, %222 : vector<16x1xf32>
    %224 = math.rsqrt %223 : vector<16x1xf32>
    %225 = vector.broadcast %224 : vector<16x1xf32> to vector<16x128xf32>
    %226 = arith.mulf %216, %225 : vector<16x128xf32>
    %227 = vector.broadcast %209 : vector<1x128xf32> to vector<16x128xf32>
    %228 = arith.mulf %226, %227 : vector<16x128xf32>
    %229 = vector.broadcast %210 : vector<1x128xf32> to vector<16x128xf32>
    %230 = arith.addf %228, %229 : vector<16x128xf32>
    %231 = arith.truncf %230 : vector<16x128xf32> to vector<16x128xbf16>
    %c0_161 = arith.constant 0 : index
    %c0_162 = arith.constant 0 : index
    %c0_163 = arith.constant 0 : index
    %232 = vector.load %arg5[%c0_161, %c0_162, %c0_163] : memref<2x128x512xbf16, #tpu.memory_space<vmem>>, vector<1x128x512xbf16>
    %233 = vector.shape_cast %232 : vector<1x128x512xbf16> to vector<128x512xbf16>
    %cst_164 = arith.constant dense<0.000000e+00> : vector<16x512xf32>
    %234 = tpu.matmul %231, %233, %cst_164 {dimension_numbers = #tpu.dot_dimension_numbers<[1], [0], [0], [1], [0, 0, 1, 1], [], []>} : vector<16x128xbf16>, vector<128x512xbf16>, vector<16x512xf32> -> vector<16x512xf32>
    %c5_165 = arith.constant 5 : index
    %c0_166 = arith.constant 0 : index
    %235 = vector.load %arg8[%c5_165, %c0_166] : memref<17x512xf32, #tpu.memory_space<vmem>>, vector<1x512xf32>
    %236 = vector.broadcast %235 : vector<1x512xf32> to vector<16x512xf32>
    %237 = arith.addf %234, %236 : vector<16x512xf32>
    %238 = arith.mulf %237, %237 : vector<16x512xf32>
    %239 = arith.mulf %237, %238 : vector<16x512xf32>
    %cst_167 = arith.constant 4.471500e-02 : f32
    %240 = vector.broadcast %cst_167 : f32 to vector<16x512xf32>
    %241 = arith.mulf %240, %239 : vector<16x512xf32>
    %242 = arith.addf %237, %241 : vector<16x512xf32>
    %cst_168 = arith.constant 0.797884583 : f32
    %243 = vector.broadcast %cst_168 : f32 to vector<16x512xf32>
    %244 = arith.mulf %243, %242 : vector<16x512xf32>
    %245 = math.tanh %244 : vector<16x512xf32>
    %cst_169 = arith.constant 1.000000e+00 : f32
    %246 = vector.broadcast %cst_169 : f32 to vector<16x512xf32>
    %247 = arith.addf %246, %245 : vector<16x512xf32>
    %cst_170 = arith.constant 5.000000e-01 : f32
    %248 = vector.broadcast %cst_170 : f32 to vector<16x512xf32>
    %249 = arith.mulf %248, %247 : vector<16x512xf32>
    %250 = arith.mulf %237, %249 : vector<16x512xf32>
    %251 = arith.truncf %250 : vector<16x512xf32> to vector<16x512xbf16>
    %c0_171 = arith.constant 0 : index
    %c0_172 = arith.constant 0 : index
    %c0_173 = arith.constant 0 : index
    %252 = vector.load %arg6[%c0_171, %c0_172, %c0_173] : memref<2x512x128xbf16, #tpu.memory_space<vmem>>, vector<1x512x128xbf16>
    %253 = vector.shape_cast %252 : vector<1x512x128xbf16> to vector<512x128xbf16>
    %cst_174 = arith.constant dense<0.000000e+00> : vector<16x128xf32>
    %254 = tpu.matmul %251, %253, %cst_174 {dimension_numbers = #tpu.dot_dimension_numbers<[1], [0], [0], [1], [0, 0, 1, 1], [], []>} : vector<16x512xbf16>, vector<512x128xbf16>, vector<16x128xf32> -> vector<16x128xf32>
    %c6_175 = arith.constant 6 : index
    %c0_176 = arith.constant 0 : index
    %255 = vector.load %arg8[%c6_175, %c0_176] : memref<17x512xf32, #tpu.memory_space<vmem>>, vector<1x128xf32>
    %256 = vector.broadcast %255 : vector<1x128xf32> to vector<16x128xf32>
    %257 = arith.addf %254, %256 : vector<16x128xf32>
    %258 = arith.addf %230, %257 : vector<16x128xf32>
    %c7_177 = arith.constant 7 : index
    %c0_178 = arith.constant 0 : index
    %259 = vector.load %arg8[%c7_177, %c0_178] : memref<17x512xf32, #tpu.memory_space<vmem>>, vector<1x128xf32>
    %c8_179 = arith.constant 8 : index
    %c0_180 = arith.constant 0 : index
    %260 = vector.load %arg8[%c8_179, %c0_180] : memref<17x512xf32, #tpu.memory_space<vmem>>, vector<1x128xf32>
    %cst_181 = arith.constant dense<0.000000e+00> : vector<16xf32>
    %261 = vector.multi_reduction <add>, %258, %cst_181 [1] : vector<16x128xf32> to vector<16xf32>
    %262 = vector.shape_cast %261 : vector<16xf32> to vector<16x1xf32>
    %cst_182 = arith.constant 1.280000e+02 : f32
    %263 = vector.broadcast %cst_182 : f32 to vector<16x1xf32>
    %264 = arith.divf %262, %263 : vector<16x1xf32>
    %265 = vector.broadcast %264 : vector<16x1xf32> to vector<16x128xf32>
    %266 = arith.subf %258, %265 : vector<16x128xf32>
    %267 = arith.mulf %266, %266 : vector<16x128xf32>
    %cst_183 = arith.constant dense<0.000000e+00> : vector<16xf32>
    %268 = vector.multi_reduction <add>, %267, %cst_183 [1] : vector<16x128xf32> to vector<16xf32>
    %269 = vector.shape_cast %268 : vector<16xf32> to vector<16x1xf32>
    %cst_184 = arith.constant 1.280000e+02 : f32
    %270 = vector.broadcast %cst_184 : f32 to vector<16x1xf32>
    %271 = arith.divf %269, %270 : vector<16x1xf32>
    %cst_185 = arith.constant 9.99999974E-6 : f32
    %272 = vector.broadcast %cst_185 : f32 to vector<16x1xf32>
    %273 = arith.addf %271, %272 : vector<16x1xf32>
    %274 = math.rsqrt %273 : vector<16x1xf32>
    %275 = vector.broadcast %274 : vector<16x1xf32> to vector<16x128xf32>
    %276 = arith.mulf %266, %275 : vector<16x128xf32>
    %277 = vector.broadcast %259 : vector<1x128xf32> to vector<16x128xf32>
    %278 = arith.mulf %276, %277 : vector<16x128xf32>
    %279 = vector.broadcast %260 : vector<1x128xf32> to vector<16x128xf32>
    %280 = arith.addf %278, %279 : vector<16x128xf32>
    %281 = arith.truncf %280 : vector<16x128xf32> to vector<16x128xbf16>
    %c12 = arith.constant 12 : index
    %c0_186 = arith.constant 0 : index
    %c0_187 = arith.constant 0 : index
    %282 = vector.load %arg2[%c12, %c0_186, %c0_187] : memref<24x128x32xbf16, #tpu.memory_space<vmem>>, vector<1x128x32xbf16>
    %283 = vector.shape_cast %282 : vector<1x128x32xbf16> to vector<128x32xbf16>
    %cst_188 = arith.constant dense<0.000000e+00> : vector<16x32xf32>
    %284 = tpu.matmul %281, %283, %cst_188 {dimension_numbers = #tpu.dot_dimension_numbers<[1], [0], [0], [1], [0, 0, 1, 1], [], []>} : vector<16x128xbf16>, vector<128x32xbf16>, vector<16x32xf32> -> vector<16x32xf32>
    %c12_189 = arith.constant 12 : index
    %c0_190 = arith.constant 0 : index
    %c0_191 = arith.constant 0 : index
    %285 = vector.load %arg3[%c12_189, %c0_190, %c0_191] : memref<24x1x32xf32, #tpu.memory_space<vmem>>, vector<1x1x32xf32>
    %286 = vector.shape_cast %285 : vector<1x1x32xf32> to vector<1x32xf32>
    %287 = vector.broadcast %286 : vector<1x32xf32> to vector<16x32xf32>
    %288 = arith.addf %284, %287 : vector<16x32xf32>
    %cst_192 = arith.constant 0.176776692 : f32
    %289 = vector.broadcast %cst_192 : f32 to vector<16x32xf32>
    %290 = arith.mulf %288, %289 : vector<16x32xf32>
    %291 = arith.truncf %290 : vector<16x32xf32> to vector<16x32xbf16>
    %c0_193 = arith.constant 0 : index
    %c0_194 = arith.constant 0 : index
    %c0_195 = arith.constant 0 : index
    %292 = vector.load %arg10[%c0_193, %c0_194, %c0_195] : memref<3x64x32xbf16, #tpu.memory_space<vmem>>, vector<1x16x32xbf16>
    %293 = vector.shape_cast %292 : vector<1x16x32xbf16> to vector<16x32xbf16>
    %294 = vector.shape_cast %291 : vector<16x32xbf16> to vector<1x16x32xbf16>
    tpu.vector_store %arg10[%c0_193, %c0_194, %c0_195], %294 {strides = array<i32>} : memref<3x64x32xbf16, #tpu.memory_space<vmem>>, vector<1x16x32xbf16>,
    %c13 = arith.constant 13 : index
    %c0_196 = arith.constant 0 : index
    %c0_197 = arith.constant 0 : index
    %295 = vector.load %arg2[%c13, %c0_196, %c0_197] : memref<24x128x32xbf16, #tpu.memory_space<vmem>>, vector<1x128x32xbf16>
    %296 = vector.shape_cast %295 : vector<1x128x32xbf16> to vector<128x32xbf16>
    %cst_198 = arith.constant dense<0.000000e+00> : vector<16x32xf32>
    %297 = tpu.matmul %281, %296, %cst_198 {dimension_numbers = #tpu.dot_dimension_numbers<[1], [0], [0], [1], [0, 0, 1, 1], [], []>} : vector<16x128xbf16>, vector<128x32xbf16>, vector<16x32xf32> -> vector<16x32xf32>
    %c13_199 = arith.constant 13 : index
    %c0_200 = arith.constant 0 : index
    %c0_201 = arith.constant 0 : index
    %298 = vector.load %arg3[%c13_199, %c0_200, %c0_201] : memref<24x1x32xf32, #tpu.memory_space<vmem>>, vector<1x1x32xf32>
    %299 = vector.shape_cast %298 : vector<1x1x32xf32> to vector<1x32xf32>
    %300 = vector.broadcast %299 : vector<1x32xf32> to vector<16x32xf32>
    %301 = arith.addf %297, %300 : vector<16x32xf32>
    %cst_202 = arith.constant 0.176776692 : f32
    %302 = vector.broadcast %cst_202 : f32 to vector<16x32xf32>
    %303 = arith.mulf %301, %302 : vector<16x32xf32>
    %304 = arith.truncf %303 : vector<16x32xf32> to vector<16x32xbf16>
    %c0_203 = arith.constant 0 : index
    %c16_204 = arith.constant 16 : index
    %c0_205 = arith.constant 0 : index
    %305 = vector.load %arg10[%c0_203, %c16_204, %c0_205] : memref<3x64x32xbf16, #tpu.memory_space<vmem>>, vector<1x16x32xbf16>
    %306 = vector.shape_cast %305 : vector<1x16x32xbf16> to vector<16x32xbf16>
    %307 = vector.shape_cast %304 : vector<16x32xbf16> to vector<1x16x32xbf16>
    tpu.vector_store %arg10[%c0_203, %c16_204, %c0_205], %307 {strides = array<i32>} : memref<3x64x32xbf16, #tpu.memory_space<vmem>>, vector<1x16x32xbf16>,
    %c14 = arith.constant 14 : index
    %c0_206 = arith.constant 0 : index
    %c0_207 = arith.constant 0 : index
    %308 = vector.load %arg2[%c14, %c0_206, %c0_207] : memref<24x128x32xbf16, #tpu.memory_space<vmem>>, vector<1x128x32xbf16>
    %309 = vector.shape_cast %308 : vector<1x128x32xbf16> to vector<128x32xbf16>
    %cst_208 = arith.constant dense<0.000000e+00> : vector<16x32xf32>
    %310 = tpu.matmul %281, %309, %cst_208 {dimension_numbers = #tpu.dot_dimension_numbers<[1], [0], [0], [1], [0, 0, 1, 1], [], []>} : vector<16x128xbf16>, vector<128x32xbf16>, vector<16x32xf32> -> vector<16x32xf32>
    %c14_209 = arith.constant 14 : index
    %c0_210 = arith.constant 0 : index
    %c0_211 = arith.constant 0 : index
    %311 = vector.load %arg3[%c14_209, %c0_210, %c0_211] : memref<24x1x32xf32, #tpu.memory_space<vmem>>, vector<1x1x32xf32>
    %312 = vector.shape_cast %311 : vector<1x1x32xf32> to vector<1x32xf32>
    %313 = vector.broadcast %312 : vector<1x32xf32> to vector<16x32xf32>
    %314 = arith.addf %310, %313 : vector<16x32xf32>
    %cst_212 = arith.constant 0.176776692 : f32
    %315 = vector.broadcast %cst_212 : f32 to vector<16x32xf32>
    %316 = arith.mulf %314, %315 : vector<16x32xf32>
    %317 = arith.truncf %316 : vector<16x32xf32> to vector<16x32xbf16>
    %c0_213 = arith.constant 0 : index
    %c32_214 = arith.constant 32 : index
    %c0_215 = arith.constant 0 : index
    %318 = vector.load %arg10[%c0_213, %c32_214, %c0_215] : memref<3x64x32xbf16, #tpu.memory_space<vmem>>, vector<1x16x32xbf16>
    %319 = vector.shape_cast %318 : vector<1x16x32xbf16> to vector<16x32xbf16>
    %320 = vector.shape_cast %317 : vector<16x32xbf16> to vector<1x16x32xbf16>
    tpu.vector_store %arg10[%c0_213, %c32_214, %c0_215], %320 {strides = array<i32>} : memref<3x64x32xbf16, #tpu.memory_space<vmem>>, vector<1x16x32xbf16>,
    %c15 = arith.constant 15 : index
    %c0_216 = arith.constant 0 : index
    %c0_217 = arith.constant 0 : index
    %321 = vector.load %arg2[%c15, %c0_216, %c0_217] : memref<24x128x32xbf16, #tpu.memory_space<vmem>>, vector<1x128x32xbf16>
    %322 = vector.shape_cast %321 : vector<1x128x32xbf16> to vector<128x32xbf16>
    %cst_218 = arith.constant dense<0.000000e+00> : vector<16x32xf32>
    %323 = tpu.matmul %281, %322, %cst_218 {dimension_numbers = #tpu.dot_dimension_numbers<[1], [0], [0], [1], [0, 0, 1, 1], [], []>} : vector<16x128xbf16>, vector<128x32xbf16>, vector<16x32xf32> -> vector<16x32xf32>
    %c15_219 = arith.constant 15 : index
    %c0_220 = arith.constant 0 : index
    %c0_221 = arith.constant 0 : index
    %324 = vector.load %arg3[%c15_219, %c0_220, %c0_221] : memref<24x1x32xf32, #tpu.memory_space<vmem>>, vector<1x1x32xf32>
    %325 = vector.shape_cast %324 : vector<1x1x32xf32> to vector<1x32xf32>
    %326 = vector.broadcast %325 : vector<1x32xf32> to vector<16x32xf32>
    %327 = arith.addf %323, %326 : vector<16x32xf32>
    %cst_222 = arith.constant 0.176776692 : f32
    %328 = vector.broadcast %cst_222 : f32 to vector<16x32xf32>
    %329 = arith.mulf %327, %328 : vector<16x32xf32>
    %330 = arith.truncf %329 : vector<16x32xf32> to vector<16x32xbf16>
    %c0_223 = arith.constant 0 : index
    %c48_224 = arith.constant 48 : index
    %c0_225 = arith.constant 0 : index
    %331 = vector.load %arg10[%c0_223, %c48_224, %c0_225] : memref<3x64x32xbf16, #tpu.memory_space<vmem>>, vector<1x16x32xbf16>
    %332 = vector.shape_cast %331 : vector<1x16x32xbf16> to vector<16x32xbf16>
    %333 = vector.shape_cast %330 : vector<16x32xbf16> to vector<1x16x32xbf16>
    tpu.vector_store %arg10[%c0_223, %c48_224, %c0_225], %333 {strides = array<i32>} : memref<3x64x32xbf16, #tpu.memory_space<vmem>>, vector<1x16x32xbf16>,
    %c16_226 = arith.constant 16 : index
    %c0_227 = arith.constant 0 : index
    %c0_228 = arith.constant 0 : index
    %334 = vector.load %arg2[%c16_226, %c0_227, %c0_228] : memref<24x128x32xbf16, #tpu.memory_space<vmem>>, vector<1x128x32xbf16>
    %335 = vector.shape_cast %334 : vector<1x128x32xbf16> to vector<128x32xbf16>
    %cst_229 = arith.constant dense<0.000000e+00> : vector<16x32xf32>
    %336 = tpu.matmul %281, %335, %cst_229 {dimension_numbers = #tpu.dot_dimension_numbers<[1], [0], [0], [1], [0, 0, 1, 1], [], []>} : vector<16x128xbf16>, vector<128x32xbf16>, vector<16x32xf32> -> vector<16x32xf32>
    %c16_230 = arith.constant 16 : index
    %c0_231 = arith.constant 0 : index
    %c0_232 = arith.constant 0 : index
    %337 = vector.load %arg3[%c16_230, %c0_231, %c0_232] : memref<24x1x32xf32, #tpu.memory_space<vmem>>, vector<1x1x32xf32>
    %338 = vector.shape_cast %337 : vector<1x1x32xf32> to vector<1x32xf32>
    %339 = vector.broadcast %338 : vector<1x32xf32> to vector<16x32xf32>
    %340 = arith.addf %336, %339 : vector<16x32xf32>
    %341 = arith.truncf %340 : vector<16x32xf32> to vector<16x32xbf16>
    %c1_233 = arith.constant 1 : index
    %c0_234 = arith.constant 0 : index
    %c0_235 = arith.constant 0 : index
    %342 = vector.load %arg10[%c1_233, %c0_234, %c0_235] : memref<3x64x32xbf16, #tpu.memory_space<vmem>>, vector<1x16x32xbf16>
    %343 = vector.shape_cast %342 : vector<1x16x32xbf16> to vector<16x32xbf16>
    %344 = vector.shape_cast %341 : vector<16x32xbf16> to vector<1x16x32xbf16>
    tpu.vector_store %arg10[%c1_233, %c0_234, %c0_235], %344 {strides = array<i32>} : memref<3x64x32xbf16, #tpu.memory_space<vmem>>, vector<1x16x32xbf16>,
    %c17 = arith.constant 17 : index
    %c0_236 = arith.constant 0 : index
    %c0_237 = arith.constant 0 : index
    %345 = vector.load %arg2[%c17, %c0_236, %c0_237] : memref<24x128x32xbf16, #tpu.memory_space<vmem>>, vector<1x128x32xbf16>
    %346 = vector.shape_cast %345 : vector<1x128x32xbf16> to vector<128x32xbf16>
    %cst_238 = arith.constant dense<0.000000e+00> : vector<16x32xf32>
    %347 = tpu.matmul %281, %346, %cst_238 {dimension_numbers = #tpu.dot_dimension_numbers<[1], [0], [0], [1], [0, 0, 1, 1], [], []>} : vector<16x128xbf16>, vector<128x32xbf16>, vector<16x32xf32> -> vector<16x32xf32>
    %c17_239 = arith.constant 17 : index
    %c0_240 = arith.constant 0 : index
    %c0_241 = arith.constant 0 : index
    %348 = vector.load %arg3[%c17_239, %c0_240, %c0_241] : memref<24x1x32xf32, #tpu.memory_space<vmem>>, vector<1x1x32xf32>
    %349 = vector.shape_cast %348 : vector<1x1x32xf32> to vector<1x32xf32>
    %350 = vector.broadcast %349 : vector<1x32xf32> to vector<16x32xf32>
    %351 = arith.addf %347, %350 : vector<16x32xf32>
    %352 = arith.truncf %351 : vector<16x32xf32> to vector<16x32xbf16>
    %c1_242 = arith.constant 1 : index
    %c16_243 = arith.constant 16 : index
    %c0_244 = arith.constant 0 : index
    %353 = vector.load %arg10[%c1_242, %c16_243, %c0_244] : memref<3x64x32xbf16, #tpu.memory_space<vmem>>, vector<1x16x32xbf16>
    %354 = vector.shape_cast %353 : vector<1x16x32xbf16> to vector<16x32xbf16>
    %355 = vector.shape_cast %352 : vector<16x32xbf16> to vector<1x16x32xbf16>
    tpu.vector_store %arg10[%c1_242, %c16_243, %c0_244], %355 {strides = array<i32>} : memref<3x64x32xbf16, #tpu.memory_space<vmem>>, vector<1x16x32xbf16>,
    %c18 = arith.constant 18 : index
    %c0_245 = arith.constant 0 : index
    %c0_246 = arith.constant 0 : index
    %356 = vector.load %arg2[%c18, %c0_245, %c0_246] : memref<24x128x32xbf16, #tpu.memory_space<vmem>>, vector<1x128x32xbf16>
    %357 = vector.shape_cast %356 : vector<1x128x32xbf16> to vector<128x32xbf16>
    %cst_247 = arith.constant dense<0.000000e+00> : vector<16x32xf32>
    %358 = tpu.matmul %281, %357, %cst_247 {dimension_numbers = #tpu.dot_dimension_numbers<[1], [0], [0], [1], [0, 0, 1, 1], [], []>} : vector<16x128xbf16>, vector<128x32xbf16>, vector<16x32xf32> -> vector<16x32xf32>
    %c18_248 = arith.constant 18 : index
    %c0_249 = arith.constant 0 : index
    %c0_250 = arith.constant 0 : index
    %359 = vector.load %arg3[%c18_248, %c0_249, %c0_250] : memref<24x1x32xf32, #tpu.memory_space<vmem>>, vector<1x1x32xf32>
    %360 = vector.shape_cast %359 : vector<1x1x32xf32> to vector<1x32xf32>
    %361 = vector.broadcast %360 : vector<1x32xf32> to vector<16x32xf32>
    %362 = arith.addf %358, %361 : vector<16x32xf32>
    %363 = arith.truncf %362 : vector<16x32xf32> to vector<16x32xbf16>
    %c1_251 = arith.constant 1 : index
    %c32_252 = arith.constant 32 : index
    %c0_253 = arith.constant 0 : index
    %364 = vector.load %arg10[%c1_251, %c32_252, %c0_253] : memref<3x64x32xbf16, #tpu.memory_space<vmem>>, vector<1x16x32xbf16>
    %365 = vector.shape_cast %364 : vector<1x16x32xbf16> to vector<16x32xbf16>
    %366 = vector.shape_cast %363 : vector<16x32xbf16> to vector<1x16x32xbf16>
    tpu.vector_store %arg10[%c1_251, %c32_252, %c0_253], %366 {strides = array<i32>} : memref<3x64x32xbf16, #tpu.memory_space<vmem>>, vector<1x16x32xbf16>,
    %c19 = arith.constant 19 : index
    %c0_254 = arith.constant 0 : index
    %c0_255 = arith.constant 0 : index
    %367 = vector.load %arg2[%c19, %c0_254, %c0_255] : memref<24x128x32xbf16, #tpu.memory_space<vmem>>, vector<1x128x32xbf16>
    %368 = vector.shape_cast %367 : vector<1x128x32xbf16> to vector<128x32xbf16>
    %cst_256 = arith.constant dense<0.000000e+00> : vector<16x32xf32>
    %369 = tpu.matmul %281, %368, %cst_256 {dimension_numbers = #tpu.dot_dimension_numbers<[1], [0], [0], [1], [0, 0, 1, 1], [], []>} : vector<16x128xbf16>, vector<128x32xbf16>, vector<16x32xf32> -> vector<16x32xf32>
    %c19_257 = arith.constant 19 : index
    %c0_258 = arith.constant 0 : index
    %c0_259 = arith.constant 0 : index
    %370 = vector.load %arg3[%c19_257, %c0_258, %c0_259] : memref<24x1x32xf32, #tpu.memory_space<vmem>>, vector<1x1x32xf32>
    %371 = vector.shape_cast %370 : vector<1x1x32xf32> to vector<1x32xf32>
    %372 = vector.broadcast %371 : vector<1x32xf32> to vector<16x32xf32>
    %373 = arith.addf %369, %372 : vector<16x32xf32>
    %374 = arith.truncf %373 : vector<16x32xf32> to vector<16x32xbf16>
    %c1_260 = arith.constant 1 : index
    %c48_261 = arith.constant 48 : index
    %c0_262 = arith.constant 0 : index
    %375 = vector.load %arg10[%c1_260, %c48_261, %c0_262] : memref<3x64x32xbf16, #tpu.memory_space<vmem>>, vector<1x16x32xbf16>
    %376 = vector.shape_cast %375 : vector<1x16x32xbf16> to vector<16x32xbf16>
    %377 = vector.shape_cast %374 : vector<16x32xbf16> to vector<1x16x32xbf16>
    tpu.vector_store %arg10[%c1_260, %c48_261, %c0_262], %377 {strides = array<i32>} : memref<3x64x32xbf16, #tpu.memory_space<vmem>>, vector<1x16x32xbf16>,
    %c20 = arith.constant 20 : index
    %c0_263 = arith.constant 0 : index
    %c0_264 = arith.constant 0 : index
    %378 = vector.load %arg2[%c20, %c0_263, %c0_264] : memref<24x128x32xbf16, #tpu.memory_space<vmem>>, vector<1x128x32xbf16>
    %379 = vector.shape_cast %378 : vector<1x128x32xbf16> to vector<128x32xbf16>
    %cst_265 = arith.constant dense<0.000000e+00> : vector<16x32xf32>
    %380 = tpu.matmul %281, %379, %cst_265 {dimension_numbers = #tpu.dot_dimension_numbers<[1], [0], [0], [1], [0, 0, 1, 1], [], []>} : vector<16x128xbf16>, vector<128x32xbf16>, vector<16x32xf32> -> vector<16x32xf32>
    %c20_266 = arith.constant 20 : index
    %c0_267 = arith.constant 0 : index
    %c0_268 = arith.constant 0 : index
    %381 = vector.load %arg3[%c20_266, %c0_267, %c0_268] : memref<24x1x32xf32, #tpu.memory_space<vmem>>, vector<1x1x32xf32>
    %382 = vector.shape_cast %381 : vector<1x1x32xf32> to vector<1x32xf32>
    %383 = vector.broadcast %382 : vector<1x32xf32> to vector<16x32xf32>
    %384 = arith.addf %380, %383 : vector<16x32xf32>
    %385 = arith.truncf %384 : vector<16x32xf32> to vector<16x32xbf16>
    %c2_269 = arith.constant 2 : index
    %c0_270 = arith.constant 0 : index
    %c0_271 = arith.constant 0 : index
    %386 = vector.load %arg10[%c2_269, %c0_270, %c0_271] : memref<3x64x32xbf16, #tpu.memory_space<vmem>>, vector<1x16x32xbf16>
    %387 = vector.shape_cast %386 : vector<1x16x32xbf16> to vector<16x32xbf16>
    %388 = vector.shape_cast %385 : vector<16x32xbf16> to vector<1x16x32xbf16>
    tpu.vector_store %arg10[%c2_269, %c0_270, %c0_271], %388 {strides = array<i32>} : memref<3x64x32xbf16, #tpu.memory_space<vmem>>, vector<1x16x32xbf16>,
    %c21 = arith.constant 21 : index
    %c0_272 = arith.constant 0 : index
    %c0_273 = arith.constant 0 : index
    %389 = vector.load %arg2[%c21, %c0_272, %c0_273] : memref<24x128x32xbf16, #tpu.memory_space<vmem>>, vector<1x128x32xbf16>
    %390 = vector.shape_cast %389 : vector<1x128x32xbf16> to vector<128x32xbf16>
    %cst_274 = arith.constant dense<0.000000e+00> : vector<16x32xf32>
    %391 = tpu.matmul %281, %390, %cst_274 {dimension_numbers = #tpu.dot_dimension_numbers<[1], [0], [0], [1], [0, 0, 1, 1], [], []>} : vector<16x128xbf16>, vector<128x32xbf16>, vector<16x32xf32> -> vector<16x32xf32>
    %c21_275 = arith.constant 21 : index
    %c0_276 = arith.constant 0 : index
    %c0_277 = arith.constant 0 : index
    %392 = vector.load %arg3[%c21_275, %c0_276, %c0_277] : memref<24x1x32xf32, #tpu.memory_space<vmem>>, vector<1x1x32xf32>
    %393 = vector.shape_cast %392 : vector<1x1x32xf32> to vector<1x32xf32>
    %394 = vector.broadcast %393 : vector<1x32xf32> to vector<16x32xf32>
    %395 = arith.addf %391, %394 : vector<16x32xf32>
    %396 = arith.truncf %395 : vector<16x32xf32> to vector<16x32xbf16>
    %c2_278 = arith.constant 2 : index
    %c16_279 = arith.constant 16 : index
    %c0_280 = arith.constant 0 : index
    %397 = vector.load %arg10[%c2_278, %c16_279, %c0_280] : memref<3x64x32xbf16, #tpu.memory_space<vmem>>, vector<1x16x32xbf16>
    %398 = vector.shape_cast %397 : vector<1x16x32xbf16> to vector<16x32xbf16>
    %399 = vector.shape_cast %396 : vector<16x32xbf16> to vector<1x16x32xbf16>
    tpu.vector_store %arg10[%c2_278, %c16_279, %c0_280], %399 {strides = array<i32>} : memref<3x64x32xbf16, #tpu.memory_space<vmem>>, vector<1x16x32xbf16>,
    %c22 = arith.constant 22 : index
    %c0_281 = arith.constant 0 : index
    %c0_282 = arith.constant 0 : index
    %400 = vector.load %arg2[%c22, %c0_281, %c0_282] : memref<24x128x32xbf16, #tpu.memory_space<vmem>>, vector<1x128x32xbf16>
    %401 = vector.shape_cast %400 : vector<1x128x32xbf16> to vector<128x32xbf16>
    %cst_283 = arith.constant dense<0.000000e+00> : vector<16x32xf32>
    %402 = tpu.matmul %281, %401, %cst_283 {dimension_numbers = #tpu.dot_dimension_numbers<[1], [0], [0], [1], [0, 0, 1, 1], [], []>} : vector<16x128xbf16>, vector<128x32xbf16>, vector<16x32xf32> -> vector<16x32xf32>
    %c22_284 = arith.constant 22 : index
    %c0_285 = arith.constant 0 : index
    %c0_286 = arith.constant 0 : index
    %403 = vector.load %arg3[%c22_284, %c0_285, %c0_286] : memref<24x1x32xf32, #tpu.memory_space<vmem>>, vector<1x1x32xf32>
    %404 = vector.shape_cast %403 : vector<1x1x32xf32> to vector<1x32xf32>
    %405 = vector.broadcast %404 : vector<1x32xf32> to vector<16x32xf32>
    %406 = arith.addf %402, %405 : vector<16x32xf32>
    %407 = arith.truncf %406 : vector<16x32xf32> to vector<16x32xbf16>
    %c2_287 = arith.constant 2 : index
    %c32_288 = arith.constant 32 : index
    %c0_289 = arith.constant 0 : index
    %408 = vector.load %arg10[%c2_287, %c32_288, %c0_289] : memref<3x64x32xbf16, #tpu.memory_space<vmem>>, vector<1x16x32xbf16>
    %409 = vector.shape_cast %408 : vector<1x16x32xbf16> to vector<16x32xbf16>
    %410 = vector.shape_cast %407 : vector<16x32xbf16> to vector<1x16x32xbf16>
    tpu.vector_store %arg10[%c2_287, %c32_288, %c0_289], %410 {strides = array<i32>} : memref<3x64x32xbf16, #tpu.memory_space<vmem>>, vector<1x16x32xbf16>,
    %c23 = arith.constant 23 : index
    %c0_290 = arith.constant 0 : index
    %c0_291 = arith.constant 0 : index
    %411 = vector.load %arg2[%c23, %c0_290, %c0_291] : memref<24x128x32xbf16, #tpu.memory_space<vmem>>, vector<1x128x32xbf16>
    %412 = vector.shape_cast %411 : vector<1x128x32xbf16> to vector<128x32xbf16>
    %cst_292 = arith.constant dense<0.000000e+00> : vector<16x32xf32>
    %413 = tpu.matmul %281, %412, %cst_292 {dimension_numbers = #tpu.dot_dimension_numbers<[1], [0], [0], [1], [0, 0, 1, 1], [], []>} : vector<16x128xbf16>, vector<128x32xbf16>, vector<16x32xf32> -> vector<16x32xf32>
    %c23_293 = arith.constant 23 : index
    %c0_294 = arith.constant 0 : index
    %c0_295 = arith.constant 0 : index
    %414 = vector.load %arg3[%c23_293, %c0_294, %c0_295] : memref<24x1x32xf32, #tpu.memory_space<vmem>>, vector<1x1x32xf32>
    %415 = vector.shape_cast %414 : vector<1x1x32xf32> to vector<1x32xf32>
    %416 = vector.broadcast %415 : vector<1x32xf32> to vector<16x32xf32>
    %417 = arith.addf %413, %416 : vector<16x32xf32>
    %418 = arith.truncf %417 : vector<16x32xf32> to vector<16x32xbf16>
    %c2_296 = arith.constant 2 : index
    %c48_297 = arith.constant 48 : index
    %c0_298 = arith.constant 0 : index
    %419 = vector.load %arg10[%c2_296, %c48_297, %c0_298] : memref<3x64x32xbf16, #tpu.memory_space<vmem>>, vector<1x16x32xbf16>
    %420 = vector.shape_cast %419 : vector<1x16x32xbf16> to vector<16x32xbf16>
    %421 = vector.shape_cast %418 : vector<16x32xbf16> to vector<1x16x32xbf16>
    tpu.vector_store %arg10[%c2_296, %c48_297, %c0_298], %421 {strides = array<i32>} : memref<3x64x32xbf16, #tpu.memory_space<vmem>>, vector<1x16x32xbf16>,
    %c0_299 = arith.constant 0 : index
    %c0_300 = arith.constant 0 : index
    %c0_301 = arith.constant 0 : index
    %422 = vector.load %arg10[%c0_299, %c0_300, %c0_301] : memref<3x64x32xbf16, #tpu.memory_space<vmem>>, vector<1x64x32xbf16>
    %423 = vector.shape_cast %422 : vector<1x64x32xbf16> to vector<64x32xbf16>
    %c1_302 = arith.constant 1 : index
    %c0_303 = arith.constant 0 : index
    %c0_304 = arith.constant 0 : index
    %424 = vector.load %arg10[%c1_302, %c0_303, %c0_304] : memref<3x64x32xbf16, #tpu.memory_space<vmem>>, vector<1x64x32xbf16>
    %425 = vector.shape_cast %424 : vector<1x64x32xbf16> to vector<64x32xbf16>
    %c2_305 = arith.constant 2 : index
    %c0_306 = arith.constant 0 : index
    %c0_307 = arith.constant 0 : index
    %426 = vector.load %arg10[%c2_305, %c0_306, %c0_307] : memref<3x64x32xbf16, #tpu.memory_space<vmem>>, vector<1x64x32xbf16>
    %427 = vector.shape_cast %426 : vector<1x64x32xbf16> to vector<64x32xbf16>
    %cst_308 = arith.constant dense<0.000000e+00> : vector<64x64xf32>
    %428 = tpu.matmul %423, %425, %cst_308 {dimension_numbers = #tpu.dot_dimension_numbers<[1], [1], [0], [0], [0, 0, 1, 0], [], []>} : vector<64x32xbf16>, vector<64x32xbf16>, vector<64x64xf32> -> vector<64x64xf32>
    %429 = arith.addf %428, %23 : vector<64x64xf32>
    %cst_309 = arith.constant dense<0xFF800000> : vector<64xf32>
    %430 = vector.multi_reduction <maximumf>, %429, %cst_309 [1] : vector<64x64xf32> to vector<64xf32>
    %431 = vector.shape_cast %430 : vector<64xf32> to vector<64x1xf32>
    %432 = vector.broadcast %431 : vector<64x1xf32> to vector<64x64xf32>
    %433 = arith.subf %429, %432 : vector<64x64xf32>
    %434 = math.exp %433 : vector<64x64xf32>
    %cst_310 = arith.constant dense<0.000000e+00> : vector<64xf32>
    %435 = vector.multi_reduction <add>, %434, %cst_310 [1] : vector<64x64xf32> to vector<64xf32>
    %436 = vector.shape_cast %435 : vector<64xf32> to vector<64x1xf32>
    %437 = tpu.reciprocal %436 {approx = true} : vector<64x1xf32> -> vector<64x1xf32>
    %438 = vector.broadcast %437 : vector<64x1xf32> to vector<64x64xf32>
    %439 = arith.mulf %434, %438 : vector<64x64xf32>
    %440 = arith.truncf %439 : vector<64x64xf32> to vector<64x64xbf16>
    %cst_311 = arith.constant dense<0.000000e+00> : vector<64x32xf32>
    %441 = tpu.matmul %440, %427, %cst_311 {dimension_numbers = #tpu.dot_dimension_numbers<[1], [0], [0], [1], [0, 0, 1, 1], [], []>} : vector<64x64xbf16>, vector<64x32xbf16>, vector<64x32xf32> -> vector<64x32xf32>
    %442 = arith.truncf %441 : vector<64x32xf32> to vector<64x32xbf16>
    %c9_312 = arith.constant 9 : index
    %c0_313 = arith.constant 0 : index
    %443 = vector.load %arg8[%c9_312, %c0_313] : memref<17x512xf32, #tpu.memory_space<vmem>>, vector<1x128xf32>
    %444 = vector.extract_strided_slice %442 {offsets = [0, 0], sizes = [16, 32], strides = [1, 1]} : vector<64x32xbf16> to vector<16x32xbf16>
    %c4_314 = arith.constant 4 : index
    %c0_315 = arith.constant 0 : index
    %c0_316 = arith.constant 0 : index
    %445 = vector.load %arg4[%c4_314, %c0_315, %c0_316] : memref<8x32x128xbf16, #tpu.memory_space<vmem>>, vector<1x32x128xbf16>
    %446 = vector.shape_cast %445 : vector<1x32x128xbf16> to vector<32x128xbf16>
    %cst_317 = arith.constant dense<0.000000e+00> : vector<16x128xf32>
    %447 = tpu.matmul %444, %446, %cst_317 {dimension_numbers = #tpu.dot_dimension_numbers<[1], [0], [0], [1], [0, 0, 1, 1], [], []>} : vector<16x32xbf16>, vector<32x128xbf16>, vector<16x128xf32> -> vector<16x128xf32>
    %448 = vector.broadcast %443 : vector<1x128xf32> to vector<16x128xf32>
    %449 = arith.addf %448, %447 : vector<16x128xf32>
    %450 = vector.extract_strided_slice %442 {offsets = [16, 0], sizes = [16, 32], strides = [1, 1]} : vector<64x32xbf16> to vector<16x32xbf16>
    %c5_318 = arith.constant 5 : index
    %c0_319 = arith.constant 0 : index
    %c0_320 = arith.constant 0 : index
    %451 = vector.load %arg4[%c5_318, %c0_319, %c0_320] : memref<8x32x128xbf16, #tpu.memory_space<vmem>>, vector<1x32x128xbf16>
    %452 = vector.shape_cast %451 : vector<1x32x128xbf16> to vector<32x128xbf16>
    %cst_321 = arith.constant dense<0.000000e+00> : vector<16x128xf32>
    %453 = tpu.matmul %450, %452, %cst_321 {dimension_numbers = #tpu.dot_dimension_numbers<[1], [0], [0], [1], [0, 0, 1, 1], [], []>} : vector<16x32xbf16>, vector<32x128xbf16>, vector<16x128xf32> -> vector<16x128xf32>
    %454 = arith.addf %449, %453 : vector<16x128xf32>
    %455 = vector.extract_strided_slice %442 {offsets = [32, 0], sizes = [16, 32], strides = [1, 1]} : vector<64x32xbf16> to vector<16x32xbf16>
    %c6_322 = arith.constant 6 : index
    %c0_323 = arith.constant 0 : index
    %c0_324 = arith.constant 0 : index
    %456 = vector.load %arg4[%c6_322, %c0_323, %c0_324] : memref<8x32x128xbf16, #tpu.memory_space<vmem>>, vector<1x32x128xbf16>
    %457 = vector.shape_cast %456 : vector<1x32x128xbf16> to vector<32x128xbf16>
    %cst_325 = arith.constant dense<0.000000e+00> : vector<16x128xf32>
    %458 = tpu.matmul %455, %457, %cst_325 {dimension_numbers = #tpu.dot_dimension_numbers<[1], [0], [0], [1], [0, 0, 1, 1], [], []>} : vector<16x32xbf16>, vector<32x128xbf16>, vector<16x128xf32> -> vector<16x128xf32>
    %459 = arith.addf %454, %458 : vector<16x128xf32>
    %460 = vector.extract_strided_slice %442 {offsets = [48, 0], sizes = [16, 32], strides = [1, 1]} : vector<64x32xbf16> to vector<16x32xbf16>
    %c7_326 = arith.constant 7 : index
    %c0_327 = arith.constant 0 : index
    %c0_328 = arith.constant 0 : index
    %461 = vector.load %arg4[%c7_326, %c0_327, %c0_328] : memref<8x32x128xbf16, #tpu.memory_space<vmem>>, vector<1x32x128xbf16>
    %462 = vector.shape_cast %461 : vector<1x32x128xbf16> to vector<32x128xbf16>
    %cst_329 = arith.constant dense<0.000000e+00> : vector<16x128xf32>
    %463 = tpu.matmul %460, %462, %cst_329 {dimension_numbers = #tpu.dot_dimension_numbers<[1], [0], [0], [1], [0, 0, 1, 1], [], []>} : vector<16x32xbf16>, vector<32x128xbf16>, vector<16x128xf32> -> vector<16x128xf32>
    %464 = arith.addf %459, %463 : vector<16x128xf32>
    %465 = arith.addf %280, %464 : vector<16x128xf32>
    %c10_330 = arith.constant 10 : index
    %c0_331 = arith.constant 0 : index
    %466 = vector.load %arg8[%c10_330, %c0_331] : memref<17x512xf32, #tpu.memory_space<vmem>>, vector<1x128xf32>
    %c11_332 = arith.constant 11 : index
    %c0_333 = arith.constant 0 : index
    %467 = vector.load %arg8[%c11_332, %c0_333] : memref<17x512xf32, #tpu.memory_space<vmem>>, vector<1x128xf32>
    %cst_334 = arith.constant dense<0.000000e+00> : vector<16xf32>
    %468 = vector.multi_reduction <add>, %465, %cst_334 [1] : vector<16x128xf32> to vector<16xf32>
    %469 = vector.shape_cast %468 : vector<16xf32> to vector<16x1xf32>
    %cst_335 = arith.constant 1.280000e+02 : f32
    %470 = vector.broadcast %cst_335 : f32 to vector<16x1xf32>
    %471 = arith.divf %469, %470 : vector<16x1xf32>
    %472 = vector.broadcast %471 : vector<16x1xf32> to vector<16x128xf32>
    %473 = arith.subf %465, %472 : vector<16x128xf32>
    %474 = arith.mulf %473, %473 : vector<16x128xf32>
    %cst_336 = arith.constant dense<0.000000e+00> : vector<16xf32>
    %475 = vector.multi_reduction <add>, %474, %cst_336 [1] : vector<16x128xf32> to vector<16xf32>
    %476 = vector.shape_cast %475 : vector<16xf32> to vector<16x1xf32>
    %cst_337 = arith.constant 1.280000e+02 : f32
    %477 = vector.broadcast %cst_337 : f32 to vector<16x1xf32>
    %478 = arith.divf %476, %477 : vector<16x1xf32>
    %cst_338 = arith.constant 9.99999974E-6 : f32
    %479 = vector.broadcast %cst_338 : f32 to vector<16x1xf32>
    %480 = arith.addf %478, %479 : vector<16x1xf32>
    %481 = math.rsqrt %480 : vector<16x1xf32>
    %482 = vector.broadcast %481 : vector<16x1xf32> to vector<16x128xf32>
    %483 = arith.mulf %473, %482 : vector<16x128xf32>
    %484 = vector.broadcast %466 : vector<1x128xf32> to vector<16x128xf32>
    %485 = arith.mulf %483, %484 : vector<16x128xf32>
    %486 = vector.broadcast %467 : vector<1x128xf32> to vector<16x128xf32>
    %487 = arith.addf %485, %486 : vector<16x128xf32>
    %488 = arith.truncf %487 : vector<16x128xf32> to vector<16x128xbf16>
    %c1_339 = arith.constant 1 : index
    %c0_340 = arith.constant 0 : index
    %c0_341 = arith.constant 0 : index
    %489 = vector.load %arg5[%c1_339, %c0_340, %c0_341] : memref<2x128x512xbf16, #tpu.memory_space<vmem>>, vector<1x128x512xbf16>
    %490 = vector.shape_cast %489 : vector<1x128x512xbf16> to vector<128x512xbf16>
    %cst_342 = arith.constant dense<0.000000e+00> : vector<16x512xf32>
    %491 = tpu.matmul %488, %490, %cst_342 {dimension_numbers = #tpu.dot_dimension_numbers<[1], [0], [0], [1], [0, 0, 1, 1], [], []>} : vector<16x128xbf16>, vector<128x512xbf16>, vector<16x512xf32> -> vector<16x512xf32>
    %c12_343 = arith.constant 12 : index
    %c0_344 = arith.constant 0 : index
    %492 = vector.load %arg8[%c12_343, %c0_344] : memref<17x512xf32, #tpu.memory_space<vmem>>, vector<1x512xf32>
    %493 = vector.broadcast %492 : vector<1x512xf32> to vector<16x512xf32>
    %494 = arith.addf %491, %493 : vector<16x512xf32>
    %495 = arith.mulf %494, %494 : vector<16x512xf32>
    %496 = arith.mulf %494, %495 : vector<16x512xf32>
    %cst_345 = arith.constant 4.471500e-02 : f32
    %497 = vector.broadcast %cst_345 : f32 to vector<16x512xf32>
    %498 = arith.mulf %497, %496 : vector<16x512xf32>
    %499 = arith.addf %494, %498 : vector<16x512xf32>
    %cst_346 = arith.constant 0.797884583 : f32
    %500 = vector.broadcast %cst_346 : f32 to vector<16x512xf32>
    %501 = arith.mulf %500, %499 : vector<16x512xf32>
    %502 = math.tanh %501 : vector<16x512xf32>
    %cst_347 = arith.constant 1.000000e+00 : f32
    %503 = vector.broadcast %cst_347 : f32 to vector<16x512xf32>
    %504 = arith.addf %503, %502 : vector<16x512xf32>
    %cst_348 = arith.constant 5.000000e-01 : f32
    %505 = vector.broadcast %cst_348 : f32 to vector<16x512xf32>
    %506 = arith.mulf %505, %504 : vector<16x512xf32>
    %507 = arith.mulf %494, %506 : vector<16x512xf32>
    %508 = arith.truncf %507 : vector<16x512xf32> to vector<16x512xbf16>
    %c1_349 = arith.constant 1 : index
    %c0_350 = arith.constant 0 : index
    %c0_351 = arith.constant 0 : index
    %509 = vector.load %arg6[%c1_349, %c0_350, %c0_351] : memref<2x512x128xbf16, #tpu.memory_space<vmem>>, vector<1x512x128xbf16>
    %510 = vector.shape_cast %509 : vector<1x512x128xbf16> to vector<512x128xbf16>
    %cst_352 = arith.constant dense<0.000000e+00> : vector<16x128xf32>
    %511 = tpu.matmul %508, %510, %cst_352 {dimension_numbers = #tpu.dot_dimension_numbers<[1], [0], [0], [1], [0, 0, 1, 1], [], []>} : vector<16x512xbf16>, vector<512x128xbf16>, vector<16x128xf32> -> vector<16x128xf32>
    %c13_353 = arith.constant 13 : index
    %c0_354 = arith.constant 0 : index
    %512 = vector.load %arg8[%c13_353, %c0_354] : memref<17x512xf32, #tpu.memory_space<vmem>>, vector<1x128xf32>
    %513 = vector.broadcast %512 : vector<1x128xf32> to vector<16x128xf32>
    %514 = arith.addf %511, %513 : vector<16x128xf32>
    %515 = arith.addf %487, %514 : vector<16x128xf32>
    %c14_355 = arith.constant 14 : index
    %c0_356 = arith.constant 0 : index
    %516 = vector.load %arg8[%c14_355, %c0_356] : memref<17x512xf32, #tpu.memory_space<vmem>>, vector<1x128xf32>
    %c15_357 = arith.constant 15 : index
    %c0_358 = arith.constant 0 : index
    %517 = vector.load %arg8[%c15_357, %c0_358] : memref<17x512xf32, #tpu.memory_space<vmem>>, vector<1x128xf32>
    %cst_359 = arith.constant dense<0.000000e+00> : vector<16xf32>
    %518 = vector.multi_reduction <add>, %515, %cst_359 [1] : vector<16x128xf32> to vector<16xf32>
    %519 = vector.shape_cast %518 : vector<16xf32> to vector<16x1xf32>
    %cst_360 = arith.constant 1.280000e+02 : f32
    %520 = vector.broadcast %cst_360 : f32 to vector<16x1xf32>
    %521 = arith.divf %519, %520 : vector<16x1xf32>
    %522 = vector.broadcast %521 : vector<16x1xf32> to vector<16x128xf32>
    %523 = arith.subf %515, %522 : vector<16x128xf32>
    %524 = arith.mulf %523, %523 : vector<16x128xf32>
    %cst_361 = arith.constant dense<0.000000e+00> : vector<16xf32>
    %525 = vector.multi_reduction <add>, %524, %cst_361 [1] : vector<16x128xf32> to vector<16xf32>
    %526 = vector.shape_cast %525 : vector<16xf32> to vector<16x1xf32>
    %cst_362 = arith.constant 1.280000e+02 : f32
    %527 = vector.broadcast %cst_362 : f32 to vector<16x1xf32>
    %528 = arith.divf %526, %527 : vector<16x1xf32>
    %cst_363 = arith.constant 9.99999974E-6 : f32
    %529 = vector.broadcast %cst_363 : f32 to vector<16x1xf32>
    %530 = arith.addf %528, %529 : vector<16x1xf32>
    %531 = math.rsqrt %530 : vector<16x1xf32>
    %532 = vector.broadcast %531 : vector<16x1xf32> to vector<16x128xf32>
    %533 = arith.mulf %523, %532 : vector<16x128xf32>
    %534 = vector.broadcast %516 : vector<1x128xf32> to vector<16x128xf32>
    %535 = arith.mulf %533, %534 : vector<16x128xf32>
    %536 = vector.broadcast %517 : vector<1x128xf32> to vector<16x128xf32>
    %537 = arith.addf %535, %536 : vector<16x128xf32>
    %538 = arith.truncf %537 : vector<16x128xf32> to vector<16x128xbf16>
    %c0_364 = arith.constant 0 : index
    %c0_365 = arith.constant 0 : index
    %539 = vector.load %arg7[%c0_364, %c0_365] : memref<128x128xbf16, #tpu.memory_space<vmem>>, vector<128x128xbf16>
    %cst_366 = arith.constant dense<0.000000e+00> : vector<16x128xf32>
    %540 = tpu.matmul %538, %539, %cst_366 {dimension_numbers = #tpu.dot_dimension_numbers<[1], [0], [0], [1], [0, 0, 1, 1], [], []>} : vector<16x128xbf16>, vector<128x128xbf16>, vector<16x128xf32> -> vector<16x128xf32>
    %c16_367 = arith.constant 16 : index
    %c0_368 = arith.constant 0 : index
    %541 = vector.load %arg8[%c16_367, %c0_368] : memref<17x512xf32, #tpu.memory_space<vmem>>, vector<1x128xf32>
    %542 = vector.broadcast %541 : vector<1x128xf32> to vector<16x128xf32>
    %543 = arith.addf %540, %542 : vector<16x128xf32>
    %544 = math.tanh %543 : vector<16x128xf32>
    %c0_369 = arith.constant 0 : index
    %c0_370 = arith.constant 0 : index
    %545 = vector.load %arg9[%c0_369, %c0_370] : memref<16x128xf32, #tpu.memory_space<vmem>>, vector<16x128xf32>
    tpu.vector_store %arg9[%c0_369, %c0_370], %544 {strides = array<i32>} : memref<16x128xf32, #tpu.memory_space<vmem>>, vector<16x128xf32>,
    return
  }
}

</mosaic_0001>

<bundles_post_ra>
// kernel: bert_classifier_forward.1
= control target key start
LH: loop header
LB: loop body
LE: loop exit
PB: predicated region body
PF: predicated region fallthrough
CT: control target
= control target key end

     0   :  { %v8021_v2 = vmov 0.0   ;;  %vm8022_vm0 = vmmov 0   ;;  %vm188_vm1 = vcmask 261120   ;;  %vm1575_vm2 = vcmask 523264   ;;  %s9885_s0 = inlined_call_operand.vmem [shape: f32[16,128], index: 0, kind: input, shape index: {}]   ;;  %s9886_s2 = inlined_call_operand.vmem [shape: bf16[24,128,32], index: 2, kind: input, shape index: {}]   ;;  %s9887_s8 = inlined_call_operand.vmem [shape: f32[17,512], index: 8, kind: input, shape index: {}]   ;;  %s9888_s3 = inlined_call_operand.vmem [shape: f32[24,1,32], index: 3, kind: input, shape index: {}]   ;;  %s9889_s1 = inlined_call_operand.vmem [shape: f32[64,64], index: 1, kind: input, shape index: {}]   ;;  %s9890_s4 = inlined_call_operand.vmem [shape: bf16[8,32,128], index: 4, kind: input, shape index: {}]   ;;  %s9891_s5 = inlined_call_operand.vmem [shape: bf16[2,128,512], index: 5, kind: input, shape index: {}]   ;;  %s9892_s6 = inlined_call_operand.vmem [shape: bf16[2,512,128], index: 6, kind: input, shape index: {}]   ;;  %s9893_s7 = inlined_call_operand.vmem [shape: bf16[128,128], index: 7, kind: input, shape index: {}]   ;;  %s9894_s9 = inlined_call_operand.vmem [shape: f32[16,128], index: 9, kind: output, shape index: {}]  }
   0x1   :  { %v33_v0 = vld [vmem:[%s9885_s0] sm:$0xff]  ;;  %v34_v1 = vld [vmem:[%s9885_s0 + $0x8] sm:$0xff]  ;;  %6878 = vmatprep.subr.bf16.mxu0 %v8021_v2  ;;  %6898 = vmatprep.subr.bf16.mxu1 %v8021_v2  ;;  %v7521_v15 = vld [vmem:[%s9886_s2 + $0x10] sm:$0xff]  }
   0x2   :  { %37 = vadd.xlane.f32.xlu0 %v33_v0  ;;  %v7517_v3 = vld [vmem:[%s9886_s2] sm:$0xff]   ;;  %v7519_v5 = vld [vmem:[%s9886_s2 + $0x8] sm:$0xff]   ;;  %v7522_v16 = vld [vmem:[%s9886_s2 + $0x50] sm:$0xff]   ;;  %6894 = vmatprep.mubr.msk.bf16.mxu0 %vm8022_vm0, %v8021_v2 }
   0x3   :  { %v7518_v4 = vld [vmem:[%s9886_s2 + $0x40] sm:$0xff]   ;;  %6879 = vmatpush3.bf16.msra.mxu0 %v7517_v3  ;;  %v7520_v6 = vld [vmem:[%s9886_s2 + $0x48] sm:$0xff]   ;;  %v7523_v17 = vld [vmem:[%s9886_s2 + $0x18] sm:$0xff]   ;;  %6914 = vmatprep.mubr.msk.bf16.mxu1 %vm8022_vm0, %v8021_v2 }
   0x4   :  { %6899 = vmatpush3.bf16.msra.mxu1 %v7518_v4  ;;  %6880 = vmatprep.subr.bf16.mxu0 %v8021_v2  ;;  %v7524_v18 = vld [vmem:[%s9886_s2 + $0x58] sm:$0xff]   ;;  %v7525_v19 = vld [vmem:[%s9886_s2 + $0x20] sm:$0xff]   ;;  %v7527_v21 = vld [vmem:[%s9886_s2 + $0x28] sm:$0xff]  }
   0x5   :  { %6900 = vmatprep.subr.bf16.mxu1 %v8021_v2  ;;  %v7526_v20 = vld [vmem:[%s9886_s2 + $0x60] sm:$0xff]   ;;  %v7528_v22 = vld [vmem:[%s9886_s2 + $0x68] sm:$0xff]   ;;  %v7529_v23 = vld [vmem:[%s9886_s2 + $0x30] sm:$0xff]  }
   0x6   :  { %39 = vadd.xlane.f32.xlu0 %v34_v1  ;;  %v7530_v24 = vld [vmem:[%s9886_s2 + $0x70] sm:$0xff]   ;;  %v7531_v25 = vld [vmem:[%s9886_s2 + $0x38] sm:$0xff]   ;;  %v35_v35 = vld [vmem:[%s9887_s8] ss:$0 sm:$0xff] }
   0x7   :  { %6881 = vmatpush3.bf16.msra.mxu0 %v7519_v5  ;;  %v7532_v26 = vld [vmem:[%s9886_s2 + $0x78] sm:$0xff]   ;;  %v36_v39 = vld [vmem:[%s9887_s8 + $0x1] ss:$0 sm:$0xff]  ;;  %v7535_v46 = vld [vmem:[%s9886_s2 + $0x88] sm:$0xff]  }
   0x8   :  { %6901 = vmatpush3.bf16.msra.mxu1 %v7520_v6  ;;  %6882 = vmatprep.subr.bf16.mxu0 %v8021_v2  ;;  %v7533_v43 = vld [vmem:[%s9886_s2 + $0x80] sm:$0xff]   ;;  %v7536_v47 = vld [vmem:[%s9886_s2 + $0xc8] sm:$0xff]   ;;  %v7537_v48 = vld [vmem:[%s9886_s2 + $0x90] sm:$0xff]  }
   0x9   :  { %6902 = vmatprep.subr.bf16.mxu1 %v8021_v2  ;;  %v7534_v44 = vld [vmem:[%s9886_s2 + $0xc0] sm:$0xff]   ;;  %v7538_v49 = vld [vmem:[%s9886_s2 + $0xd0] sm:$0xff]   ;;  %v7539_v50 = vld [vmem:[%s9886_s2 + $0x98] sm:$0xff]  }
   0xa   :  { %v7540_v51 = vld [vmem:[%s9886_s2 + $0xd8] sm:$0xff]   ;;  %v7541_v52 = vld [vmem:[%s9886_s2 + $0xa0] sm:$0xff]   ;;  %v7543_v54 = vld [vmem:[%s9886_s2 + $0xa8] sm:$0xff]  }
   0xb   :  { %6883 = vmatpush3.bf16.msra.mxu0 %v7521_v15  ;;  %v7542_v53 = vld [vmem:[%s9886_s2 + $0xe0] sm:$0xff]   ;;  %v7544_v55 = vld [vmem:[%s9886_s2 + $0xe8] sm:$0xff]   ;;  %v7545_v56 = vld [vmem:[%s9886_s2 + $0xb0] sm:$0xff]  }
   0xc   :  { %6903 = vmatpush3.bf16.msra.mxu1 %v7522_v16  ;;  %6884 = vmatprep.subr.bf16.mxu0 %v8021_v2  ;;  %v7546_v57 = vld [vmem:[%s9886_s2 + $0xf0] sm:$0xff]   ;;  %v7547_v58 = vld [vmem:[%s9886_s2 + $0xb8] sm:$0xff]   ;;  %v7549_v60 = vld [vmem:[%s9886_s2 + $0x100] sm:$0xff]  }
   0xd   :  { %6904 = vmatprep.subr.bf16.mxu1 %v8021_v2  ;;  %v7548_v59 = vld [vmem:[%s9886_s2 + $0xf8] sm:$0xff]   ;;  %v7550_v61 = vld [vmem:[%s9886_s2 + $0x140] sm:$0xff]   ;;  %v7551_v62 = vld [vmem:[%s9886_s2 + $0x108] sm:$0xff]  }
   0xe   :  { %v7552_v63 = vld [vmem:[%s9886_s2 + $0x148] sm:$0xff]   ;;  %v7555_v3 = vld [vmem:[%s9886_s2 + $0x118] sm:$0xff]   ;;  %v7557_v5 = vld [vmem:[%s9886_s2 + $0x120] sm:$0xff]  }
   0xf   :  { %6885 = vmatpush3.bf16.msra.mxu0 %v7523_v17  ;;  %v7556_v4 = vld [vmem:[%s9886_s2 + $0x158] sm:$0xff]   ;;  %v7558_v6 = vld [vmem:[%s9886_s2 + $0x160] sm:$0xff]   ;;  %v7567_v15 = vld [vmem:[%s9886_s2 + $0x188] sm:$0xff]  }
  0x10   :  { %6905 = vmatpush3.bf16.msra.mxu1 %v7524_v18  ;;  %6886 = vmatprep.subr.bf16.mxu0 %v8021_v2  ;;  %v7568_v16 = vld [vmem:[%s9886_s2 + $0x1c8] sm:$0xff]   ;;  %v7569_v17 = vld [vmem:[%s9886_s2 + $0x190] sm:$0xff]  }
  0x11   :  { %6906 = vmatprep.subr.bf16.mxu1 %v8021_v2  ;;  %v7570_v18 = vld [vmem:[%s9886_s2 + $0x1d0] sm:$0xff]  }
  0x13   :  { %6887 = vmatpush3.bf16.msra.mxu0 %v7525_v19  ;;  %v7571_v19 = vld [vmem:[%s9886_s2 + $0x198] sm:$0xff]  }
  0x14   :  { %6907 = vmatpush3.bf16.msra.mxu1 %v7526_v20  ;;  %6888 = vmatprep.subr.bf16.mxu0 %v8021_v2  ;;  %v7572_v20 = vld [vmem:[%s9886_s2 + $0x1d8] sm:$0xff]  }
  0x15   :  { %6908 = vmatprep.subr.bf16.mxu1 %v8021_v2 }
  0x17   :  { %6889 = vmatpush3.bf16.msra.mxu0 %v7527_v21  ;;  %v7573_v21 = vld [vmem:[%s9886_s2 + $0x1a0] sm:$0xff]  }
  0x18   :  { %6909 = vmatpush3.bf16.msra.mxu1 %v7528_v22  ;;  %6890 = vmatprep.subr.bf16.mxu0 %v8021_v2  ;;  %v7574_v22 = vld [vmem:[%s9886_s2 + $0x1e0] sm:$0xff]  }
  0x19   :  { %6910 = vmatprep.subr.bf16.mxu1 %v8021_v2 }
  0x1b   :  { %6891 = vmatpush3.bf16.msra.mxu0 %v7529_v23  ;;  %v7575_v23 = vld [vmem:[%s9886_s2 + $0x1a8] sm:$0xff]  }
  0x1c   :  { %6911 = vmatpush3.bf16.msra.mxu1 %v7530_v24  ;;  %6892 = vmatprep.subr.bf16.mxu0 %v8021_v2  ;;  %v7576_v24 = vld [vmem:[%s9886_s2 + $0x1e8] sm:$0xff]  }
  0x1d   :  { %6912 = vmatprep.subr.bf16.mxu1 %v8021_v2 }
  0x1f   :  { %6893 = vmatpush3.bf16.msra.mxu0 %v7531_v25  ;;  %v7577_v25 = vld [vmem:[%s9886_s2 + $0x1b0] sm:$0xff]  }
  0x20   :  { %6913 = vmatpush3.bf16.msra.mxu1 %v7532_v26  ;;  %6918 = vmatprep.subr.bf16.mxu0 %v8021_v2  ;;  %v7578_v26 = vld [vmem:[%s9886_s2 + $0x1f0] sm:$0xff]  }
  0x21   :  { %6938 = vmatprep.subr.bf16.mxu1 %v8021_v2 }
  0x8f   :  { %v38_v7 = vpop.xlane.xlu0 %37 }
  0x90   :  { %v42_v8 = vmul.f32 0.0078125, %v38_v7  ;;  %v7559_v7 = vld [vmem:[%s9886_s2 + $0x128] sm:$0xff]  }
  0x92   :  { %v44_v9 = vsub.f32 %v33_v0, %v42_v8  ;;  %v7553_v0 = vld [vmem:[%s9886_s2 + $0x110] sm:$0xff]   ;;  %v7560_v8 = vld [vmem:[%s9886_s2 + $0x168] sm:$0xff]  }
  0x93   :  { %v40_v10 = vpop.xlane.xlu0 %39 }
  0x94   :  { %v43_v11 = vmul.f32 0.0078125, %v40_v10  ;;  %v46_v12 = vmul.f32 %v44_v9, %v44_v9  ;;  %v7562_v10 = vld [vmem:[%s9886_s2 + $0x170] sm:$0xff]  }
  0x96   :  { %v45_v13 = vsub.f32 %v34_v1, %v43_v11  ;;  %48 = vadd.xlane.f32.xlu1 %v46_v12  ;;  %v7554_v1 = vld [vmem:[%s9886_s2 + $0x150] sm:$0xff]   ;;  %v7563_v11 = vld [vmem:[%s9886_s2 + $0x138] sm:$0xff]  }
  0x97   :  { %v7564_v12 = vld [vmem:[%s9886_s2 + $0x178] sm:$0xff]  }
  0x98   :  { %v47_v14 = vmul.f32 %v45_v13, %v45_v13 }
  0x9a   :  { %50 = vadd.xlane.f32.xlu1 %v47_v14  ;;  %v7566_v14 = vld [vmem:[%s9886_s2 + $0x1c0] sm:$0xff]  }
 0x123   :  { %v49_v27 = vpop.xlane.xlu1 %48 }
 0x124   :  { %v52_v28 = vmul.f32 0.0078125, %v49_v27  ;;  %v7579_v27 = vld [vmem:[%s9886_s2 + $0x1b8] sm:$0xff]  }
 0x126   :  { %v54_v29 = vadd.f32 1e-05, %v52_v28  ;;  %v7580_v28 = vld [vmem:[%s9886_s2 + $0x1f8] sm:$0xff]  }
 0x127   :  { %v51_v30 = vpop.xlane.xlu1 %50 }
 0x128   :  { %7893 = vrsqrt.f32 %v54_v29  ;;  %v53_v31 = vmul.f32 0.0078125, %v51_v30  ;;  %v7581_v29 = vld [vmem:[%s9886_s2 + $0x200] sm:$0xff]  }
 0x129   :  { %v7582_v30 = vld [vmem:[%s9886_s2 + $0x240] sm:$0xff]  }
 0x12a   :  { %v55_v32 = vadd.f32 1e-05, %v53_v31  ;;  %v7583_v31 = vld [vmem:[%s9886_s2 + $0x208] sm:$0xff]  }
 0x12c   :  { %7895 = vrsqrt.f32 %v55_v32  ;;  %v7584_v32 = vld [vmem:[%s9886_s2 + $0x248] sm:$0xff]  }
 0x132   :  { %v7894_v33 = vpop.eup %7893 }
 0x133   :  { %v58_v34 = vmul.f32 %v7894_v33, %v44_v9  ;;  %v7561_v9 = vld [vmem:[%s9886_s2 + $0x130] sm:$0xff]  }
 0x134   :  { %v7585_v33 = vld [vmem:[%s9886_s2 + $0x210] sm:$0xff]  }
 0x135   :  { %v60_v37 = vmul.f32 %v58_v34, %v35_v35  ;;  %v7586_v34 = vld [vmem:[%s9886_s2 + $0x250] sm:$0xff]  }
 0x136   :  { %v7896_v36 = vpop.eup %7895 }
 0x137   :  { %v59_v38 = vmul.f32 %v7896_v36, %v45_v13  ;;  %v8156_v41 = vadd.f32 %v60_v37, %v36_v39  ;;  %v7565_v13 = vld [vmem:[%s9886_s2 + $0x180] sm:$0xff]   ;;  %v7588_v36 = vld [vmem:[%s9886_s2 + $0x258] sm:$0xff]  }
 0x138   :  { %v7589_v37 = vld [vmem:[%s9886_s2 + $0x220] sm:$0xff]  }
 0x139   :  { %v61_v40 = vmul.f32 %v59_v38, %v35_v35  ;;  %v7587_v35 = vld [vmem:[%s9886_s2 + $0x218] sm:$0xff]   ;;  %v7590_v38 = vld [vmem:[%s9886_s2 + $0x260] sm:$0xff]  }
 0x13b   :  { %v8158_v42 = vadd.f32 %v61_v40, %v36_v39  ;;  %v7591_v39 = vld [vmem:[%s9886_s2 + $0x228] sm:$0xff]  }
 0x13c   :  { %v7592_v40 = vld [vmem:[%s9886_s2 + $0x268] sm:$0xff]  }
 0x13d   :  { %v8168_v45 = vpack.c.bf16 %v8158_v42, %v8156_v41 }
 0x13f   :  { %6895 = vmatmul.mubr.bf16.vlgmr.msra.gmra.mrb[0].mxu0 %v8168_v45  ;;  %6915 = vmatmul.mubr.bf16.vlgmr.msra.gmra.mrb[0].mxu1 %v8168_v45 }
 0x140   :  { %6919 = vmatpush3.bf16.msra.mxu0 %v7533_v43  ;;  %6939 = vmatpush3.bf16.msra.mxu1 %v7534_v44  ;;  %v7593_v43 = vld [vmem:[%s9886_s2 + $0x230] sm:$0xff]  }
 0x141   :  { %6920 = vmatprep.subr.bf16.mxu0 %v8021_v2  ;;  %6940 = vmatprep.subr.bf16.mxu1 %v8021_v2  ;;  %v7594_v44 = vld [vmem:[%s9886_s2 + $0x270] sm:$0xff]  }
 0x142   :  { %6934 = vmatprep.mubr.msk.bf16.mxu0 %vm8022_vm0, %v8021_v2  ;;  %6954 = vmatprep.mubr.msk.bf16.mxu1 %vm8022_vm0, %v8021_v2 }
 0x144   :  { %6921 = vmatpush3.bf16.msra.mxu0 %v7535_v46  ;;  %6941 = vmatpush3.bf16.msra.mxu1 %v7536_v47  ;;  %v7595_v46 = vld [vmem:[%s9886_s2 + $0x238] sm:$0xff]  }
 0x145   :  { %6922 = vmatprep.subr.bf16.mxu0 %v8021_v2  ;;  %6942 = vmatprep.subr.bf16.mxu1 %v8021_v2  ;;  %v7596_v47 = vld [vmem:[%s9886_s2 + $0x278] sm:$0xff]  }
 0x148   :  { %6923 = vmatpush3.bf16.msra.mxu0 %v7537_v48  ;;  %6943 = vmatpush3.bf16.msra.mxu1 %v7538_v49  ;;  %v7597_v48 = vld [vmem:[%s9886_s2 + $0x280] sm:$0xff]  }
 0x149   :  { %6924 = vmatprep.subr.bf16.mxu0 %v8021_v2  ;;  %6944 = vmatprep.subr.bf16.mxu1 %v8021_v2  ;;  %v7598_v49 = vld [vmem:[%s9886_s2 + $0x2c0] sm:$0xff]  }
 0x14c   :  { %6925 = vmatpush3.bf16.msra.mxu0 %v7539_v50  ;;  %6945 = vmatpush3.bf16.msra.mxu1 %v7540_v51  ;;  %v7599_v50 = vld [vmem:[%s9886_s2 + $0x288] sm:$0xff]  }
 0x14d   :  { %6926 = vmatprep.subr.bf16.mxu0 %v8021_v2  ;;  %6946 = vmatprep.subr.bf16.mxu1 %v8021_v2  ;;  %v7600_v51 = vld [vmem:[%s9886_s2 + $0x2c8] sm:$0xff]  }
 0x150   :  { %6927 = vmatpush3.bf16.msra.mxu0 %v7541_v52  ;;  %6947 = vmatpush3.bf16.msra.mxu1 %v7542_v53  ;;  %v7601_v52 = vld [vmem:[%s9886_s2 + $0x290] sm:$0xff]  }
 0x151   :  { %6928 = vmatprep.subr.bf16.mxu0 %v8021_v2  ;;  %6948 = vmatprep.subr.bf16.mxu1 %v8021_v2  ;;  %v7602_v53 = vld [vmem:[%s9886_s2 + $0x2d0] sm:$0xff]  }
 0x154   :  { %6929 = vmatpush3.bf16.msra.mxu0 %v7543_v54  ;;  %6949 = vmatpush3.bf16.msra.mxu1 %v7544_v55  ;;  %v7603_v54 = vld [vmem:[%s9886_s2 + $0x298] sm:$0xff]  }
 0x155   :  { %6930 = vmatprep.subr.bf16.mxu0 %v8021_v2  ;;  %6950 = vmatprep.subr.bf16.mxu1 %v8021_v2  ;;  %v7604_v55 = vld [vmem:[%s9886_s2 + $0x2d8] sm:$0xff]  }
 0x158   :  { %6931 = vmatpush3.bf16.msra.mxu0 %v7545_v56  ;;  %6951 = vmatpush3.bf16.msra.mxu1 %v7546_v57  ;;  %v7605_v56 = vld [vmem:[%s9886_s2 + $0x2a0] sm:$0xff]  }
 0x159   :  { %6932 = vmatprep.subr.bf16.mxu0 %v8021_v2  ;;  %6952 = vmatprep.subr.bf16.mxu1 %v8021_v2  ;;  %v7606_v57 = vld [vmem:[%s9886_s2 + $0x2e0] sm:$0xff]  }
 0x15c   :  { %6933 = vmatpush3.bf16.msra.mxu0 %v7547_v58  ;;  %6953 = vmatpush3.bf16.msra.mxu1 %v7548_v59  ;;  %v7607_v58 = vld [vmem:[%s9886_s2 + $0x2a8] sm:$0xff]  }
 0x15d   :  { %6958 = vmatprep.subr.bf16.mxu0 %v8021_v2  ;;  %6978 = vmatprep.subr.bf16.mxu1 %v8021_v2  ;;  %v7608_v59 = vld [vmem:[%s9886_s2 + $0x2e8] sm:$0xff]  }
 0x15f   :  { %6935 = vmatmul.mubr.bf16.vlgmr.msra.gmra.mrb[4].mxu0 %v8168_v45  ;;  %6955 = vmatmul.mubr.bf16.vlgmr.msra.gmra.mrb[4].mxu1 %v8168_v45 }
 0x160   :  { %6959 = vmatpush3.bf16.msra.mxu0 %v7549_v60  ;;  %6979 = vmatpush3.bf16.msra.mxu1 %v7550_v61  ;;  %v7609_v60 = vld [vmem:[%s9886_s2 + $0x2b0] sm:$0xff]  }
 0x161   :  { %6960 = vmatprep.subr.bf16.mxu0 %v8021_v2  ;;  %6980 = vmatprep.subr.bf16.mxu1 %v8021_v2  ;;  %v7610_v61 = vld [vmem:[%s9886_s2 + $0x2f0] sm:$0xff]  }
 0x162   :  { %6974 = vmatprep.mubr.msk.bf16.mxu0 %vm8022_vm0, %v8021_v2  ;;  %6994 = vmatprep.mubr.msk.bf16.mxu1 %vm8022_vm0, %v8021_v2 }
 0x164   :  { %6961 = vmatpush3.bf16.msra.mxu0 %v7551_v62  ;;  %6981 = vmatpush3.bf16.msra.mxu1 %v7552_v63  ;;  %v7611_v62 = vld [vmem:[%s9886_s2 + $0x2b8] sm:$0xff]  }
 0x165   :  { %6962 = vmatprep.subr.bf16.mxu0 %v8021_v2  ;;  %6982 = vmatprep.subr.bf16.mxu1 %v8021_v2  ;;  %v7612_v63 = vld [vmem:[%s9886_s2 + $0x2f8] sm:$0xff]  }
 0x168   :  { %6963 = vmatpush3.bf16.msra.mxu0 %v7553_v0  ;;  %6983 = vmatpush3.bf16.msra.mxu1 %v7554_v1  ;;  %v5600_v0 = vld [vmem:[%s9888_s3] ss:$0 sm:$0xff]  ;;  %v5626_v1 = vld [vmem:[%s9888_s3 + $0x1] ss:$0 sm:$0xff] }
 0x169   :  { %6964 = vmatprep.subr.bf16.mxu0 %v8021_v2  ;;  %6984 = vmatprep.subr.bf16.mxu1 %v8021_v2 }
 0x16c   :  { %6965 = vmatpush3.bf16.msra.mxu0 %v7555_v3  ;;  %6985 = vmatpush3.bf16.msra.mxu1 %v7556_v4 }
 0x16d   :  { %6966 = vmatprep.subr.bf16.mxu0 %v8021_v2  ;;  %6986 = vmatprep.subr.bf16.mxu1 %v8021_v2 }
 0x170   :  { %6967 = vmatpush3.bf16.msra.mxu0 %v7557_v5  ;;  %6987 = vmatpush3.bf16.msra.mxu1 %v7558_v6 }
 0x171   :  { %6968 = vmatprep.subr.bf16.mxu0 %v8021_v2  ;;  %6988 = vmatprep.subr.bf16.mxu1 %v8021_v2 }
 0x174   :  { %6969 = vmatpush3.bf16.msra.mxu0 %v7559_v7  ;;  %6989 = vmatpush3.bf16.msra.mxu1 %v7560_v8 }
 0x175   :  { %6970 = vmatprep.subr.bf16.mxu0 %v8021_v2  ;;  %6990 = vmatprep.subr.bf16.mxu1 %v8021_v2 }
 0x178   :  { %6971 = vmatpush3.bf16.msra.mxu0 %v7561_v9  ;;  %6991 = vmatpush3.bf16.msra.mxu1 %v7562_v10 }
 0x179   :  { %6972 = vmatprep.subr.bf16.mxu0 %v8021_v2  ;;  %6992 = vmatprep.subr.bf16.mxu1 %v8021_v2 }
 0x17c   :  { %6973 = vmatpush3.bf16.msra.mxu0 %v7563_v11  ;;  %6993 = vmatpush3.bf16.msra.mxu1 %v7564_v12 }
 0x17d   :  { %6998 = vmatprep.subr.bf16.mxu0 %v8021_v2  ;;  %7018 = vmatprep.subr.bf16.mxu1 %v8021_v2 }
 0x17f   :  { %6975 = vmatmul.mubr.bf16.vlgmr.msra.gmra.mrb[8].mxu0 %v8168_v45  ;;  %6995 = vmatmul.mubr.bf16.vlgmr.msra.gmra.mrb[8].mxu1 %v8168_v45 }
 0x180   :  { %6999 = vmatpush3.bf16.msra.mxu0 %v7565_v13  ;;  %7019 = vmatpush3.bf16.msra.mxu1 %v7566_v14 }
 0x181   :  { %7000 = vmatprep.subr.bf16.mxu0 %v8021_v2  ;;  %7020 = vmatprep.subr.bf16.mxu1 %v8021_v2 }
 0x182   :  { %7014 = vmatprep.mubr.msk.bf16.mxu0 %vm8022_vm0, %v8021_v2  ;;  %7034 = vmatprep.mubr.msk.bf16.mxu1 %vm8022_vm0, %v8021_v2 }
 0x184   :  { %7001 = vmatpush3.bf16.msra.mxu0 %v7567_v15  ;;  %7021 = vmatpush3.bf16.msra.mxu1 %v7568_v16 }
 0x185   :  { %7002 = vmatprep.subr.bf16.mxu0 %v8021_v2  ;;  %7022 = vmatprep.subr.bf16.mxu1 %v8021_v2 }
 0x188   :  { %7003 = vmatpush3.bf16.msra.mxu0 %v7569_v17  ;;  %7023 = vmatpush3.bf16.msra.mxu1 %v7570_v18 }
 0x189   :  { %7004 = vmatprep.subr.bf16.mxu0 %v8021_v2  ;;  %7024 = vmatprep.subr.bf16.mxu1 %v8021_v2 }
 0x18c   :  { %7005 = vmatpush3.bf16.msra.mxu0 %v7571_v19  ;;  %7025 = vmatpush3.bf16.msra.mxu1 %v7572_v20 }
 0x18d   :  { %7006 = vmatprep.subr.bf16.mxu0 %v8021_v2  ;;  %7026 = vmatprep.subr.bf16.mxu1 %v8021_v2 }
 0x190   :  { %7007 = vmatpush3.bf16.msra.mxu0 %v7573_v21  ;;  %7027 = vmatpush3.bf16.msra.mxu1 %v7574_v22  ;;  %v5652_v21 = vld [vmem:[%s9888_s3 + $0x2] ss:$0 sm:$0xff]  ;;  %v5678_v22 = vld [vmem:[%s9888_s3 + $0x3] ss:$0 sm:$0xff] }
 0x191   :  { %7008 = vmatprep.subr.bf16.mxu0 %v8021_v2  ;;  %7028 = vmatprep.subr.bf16.mxu1 %v8021_v2 }
 0x194   :  { %7009 = vmatpush3.bf16.msra.mxu0 %v7575_v23  ;;  %7029 = vmatpush3.bf16.msra.mxu1 %v7576_v24 }
 0x195   :  { %7010 = vmatprep.subr.bf16.mxu0 %v8021_v2  ;;  %7030 = vmatprep.subr.bf16.mxu1 %v8021_v2 }
 0x198   :  { %7011 = vmatpush3.bf16.msra.mxu0 %v7577_v25  ;;  %7031 = vmatpush3.bf16.msra.mxu1 %v7578_v26 }
 0x199   :  { %7012 = vmatprep.subr.bf16.mxu0 %v8021_v2  ;;  %7032 = vmatprep.subr.bf16.mxu1 %v8021_v2 }
 0x19c   :  { %7013 = vmatpush3.bf16.msra.mxu0 %v7579_v27  ;;  %7033 = vmatpush3.bf16.msra.mxu1 %v7580_v28 }
 0x19d   :  { %7038 = vmatprep.subr.bf16.mxu0 %v8021_v2  ;;  %7058 = vmatprep.subr.bf16.mxu1 %v8021_v2 }
 0x19f   :  { %7015 = vmatmul.mubr.bf16.vlgmr.msra.gmra.mrb[12].mxu0 %v8168_v45  ;;  %7035 = vmatmul.mubr.bf16.vlgmr.msra.gmra.mrb[12].mxu1 %v8168_v45 }
 0x1a0   :  { %7039 = vmatpush3.bf16.msra.mxu0 %v7581_v29  ;;  %7059 = vmatpush3.bf16.msra.mxu1 %v7582_v30 }
 0x1a1   :  { %7040 = vmatprep.subr.bf16.mxu0 %v8021_v2  ;;  %7060 = vmatprep.subr.bf16.mxu1 %v8021_v2 }
 0x1a2   :  { %7054 = vmatprep.mubr.msk.bf16.mxu0 %vm8022_vm0, %v8021_v2  ;;  %7074 = vmatprep.mubr.msk.bf16.mxu1 %vm8022_vm0, %v8021_v2 }
 0x1a4   :  { %7041 = vmatpush3.bf16.msra.mxu0 %v7583_v31  ;;  %7061 = vmatpush3.bf16.msra.mxu1 %v7584_v32 }
 0x1a5   :  { %7042 = vmatprep.subr.bf16.mxu0 %v8021_v2  ;;  %7062 = vmatprep.subr.bf16.mxu1 %v8021_v2 }
 0x1a8   :  { %7043 = vmatpush3.bf16.msra.mxu0 %v7585_v33  ;;  %7063 = vmatpush3.bf16.msra.mxu1 %v7586_v34 }
 0x1a9   :  { %7044 = vmatprep.subr.bf16.mxu0 %v8021_v2  ;;  %7064 = vmatprep.subr.bf16.mxu1 %v8021_v2 }
 0x1ac   :  { %7045 = vmatpush3.bf16.msra.mxu0 %v7587_v35  ;;  %7065 = vmatpush3.bf16.msra.mxu1 %v7588_v36 }
 0x1ad   :  { %7046 = vmatprep.subr.bf16.mxu0 %v8021_v2  ;;  %7066 = vmatprep.subr.bf16.mxu1 %v8021_v2 }
 0x1b0   :  { %7047 = vmatpush3.bf16.msra.mxu0 %v7589_v37  ;;  %7067 = vmatpush3.bf16.msra.mxu1 %v7590_v38 }
 0x1b1   :  { %7048 = vmatprep.subr.bf16.mxu0 %v8021_v2  ;;  %7068 = vmatprep.subr.bf16.mxu1 %v8021_v2 }
 0x1b4   :  { %7049 = vmatpush3.bf16.msra.mxu0 %v7591_v39  ;;  %7069 = vmatpush3.bf16.msra.mxu1 %v7592_v40 }
 0x1b5   :  { %7050 = vmatprep.subr.bf16.mxu0 %v8021_v2  ;;  %7070 = vmatprep.subr.bf16.mxu1 %v8021_v2 }
 0x1b8   :  { %7051 = vmatpush3.bf16.msra.mxu0 %v7593_v43  ;;  %7071 = vmatpush3.bf16.msra.mxu1 %v7594_v44  ;;  %v5704_v43 = vld [vmem:[%s9888_s3 + $0x4] ss:$0 sm:$0xff] }
 0x1b9   :  { %7052 = vmatprep.subr.bf16.mxu0 %v8021_v2  ;;  %7072 = vmatprep.subr.bf16.mxu1 %v8021_v2 }
 0x1bc   :  { %7053 = vmatpush3.bf16.msra.mxu0 %v7595_v46  ;;  %7073 = vmatpush3.bf16.msra.mxu1 %v7596_v47  ;;  %v5730_v46 = vld [vmem:[%s9888_s3 + $0x5] ss:$0 sm:$0xff] }
 0x1bd   :  { %7078 = vmatprep.subr.bf16.mxu0 %v8021_v2  ;;  %7098 = vmatprep.subr.bf16.mxu1 %v8021_v2 }
 0x1bf   :  { %7055 = vmatmul.mubr.bf16.vlgmr.msra.gmra.mrb[16].mxu0 %v8168_v45  ;;  %7075 = vmatmul.mubr.bf16.vlgmr.msra.gmra.mrb[16].mxu1 %v8168_v45 }
 0x1c0   :  { %7079 = vmatpush3.bf16.msra.mxu0 %v7597_v48  ;;  %7099 = vmatpush3.bf16.msra.mxu1 %v7598_v49 }
 0x1c1   :  { %7080 = vmatprep.subr.bf16.mxu0 %v8021_v2  ;;  %7100 = vmatprep.subr.bf16.mxu1 %v8021_v2 }
 0x1c2   :  { %7094 = vmatprep.mubr.msk.bf16.mxu0 %vm8022_vm0, %v8021_v2  ;;  %7114 = vmatprep.mubr.msk.bf16.mxu1 %vm8022_vm0, %v8021_v2 }
 0x1c4   :  { %7081 = vmatpush3.bf16.msra.mxu0 %v7599_v50  ;;  %7101 = vmatpush3.bf16.msra.mxu1 %v7600_v51 }
 0x1c5   :  { %7082 = vmatprep.subr.bf16.mxu0 %v8021_v2  ;;  %7102 = vmatprep.subr.bf16.mxu1 %v8021_v2 }
 0x1c8   :  { %7083 = vmatpush3.bf16.msra.mxu0 %v7601_v52  ;;  %7103 = vmatpush3.bf16.msra.mxu1 %v7602_v53 }
 0x1c9   :  { %7084 = vmatprep.subr.bf16.mxu0 %v8021_v2  ;;  %7104 = vmatprep.subr.bf16.mxu1 %v8021_v2 }
 0x1cc   :  { %7085 = vmatpush3.bf16.msra.mxu0 %v7603_v54  ;;  %7105 = vmatpush3.bf16.msra.mxu1 %v7604_v55 }
 0x1cd   :  { %7086 = vmatprep.subr.bf16.mxu0 %v8021_v2  ;;  %7106 = vmatprep.subr.bf16.mxu1 %v8021_v2 }
 0x1d0   :  { %7087 = vmatpush3.bf16.msra.mxu0 %v7605_v56  ;;  %7107 = vmatpush3.bf16.msra.mxu1 %v7606_v57 }
 0x1d1   :  { %7088 = vmatprep.subr.bf16.mxu0 %v8021_v2  ;;  %7108 = vmatprep.subr.bf16.mxu1 %v8021_v2 }
 0x1d4   :  { %7089 = vmatpush3.bf16.msra.mxu0 %v7607_v58  ;;  %7109 = vmatpush3.bf16.msra.mxu1 %v7608_v59 }
 0x1d5   :  { %7090 = vmatprep.subr.bf16.mxu0 %v8021_v2  ;;  %7110 = vmatprep.subr.bf16.mxu1 %v8021_v2 }
 0x1d8   :  { %7091 = vmatpush3.bf16.msra.mxu0 %v7609_v60  ;;  %7111 = vmatpush3.bf16.msra.mxu1 %v7610_v61 }
 0x1d9   :  { %7092 = vmatprep.subr.bf16.mxu0 %v8021_v2  ;;  %7112 = vmatprep.subr.bf16.mxu1 %v8021_v2 }
 0x1dc   :  { %7093 = vmatpush3.bf16.msra.mxu0 %v7611_v62  ;;  %7113 = vmatpush3.bf16.msra.mxu1 %v7612_v63 }
 0x1df   :  { %7095 = vmatmul.mubr.bf16.vlgmr.msra.gmra.mrb[20].mxu0 %v8168_v45  ;;  %7115 = vmatmul.mubr.bf16.vlgmr.msra.gmra.mrb[20].mxu1 %v8168_v45 }
 0x212   :  { %v178_v3 = vpop.f32.mrb[0].mxu0  ;;  %v297_v4 = vpop.f32.mrb[0].mxu1 }
 0x213   :  { %v179_v5 = vadd.f32 %v5600_v0, %v178_v3  ;;  %v298_v6 = vadd.f32 %v5626_v1, %v297_v4  ;;  %v6896_v7 = vpop.f32.mrb[1].mxu0  ;;  %v6916_v8 = vpop.f32.mrb[1].mxu1  ;;  %v5782_v3 = vld [vmem:[%s9888_s3 + $0x7] ss:$0 sm:$0xff] }
 0x214   :  { %v181_v9 = vpop.f32.mrb[2].mxu0  ;;  %v300_v10 = vpop.f32.mrb[2].mxu1 }
 0x215   :  { %v182_v11 = vadd.f32 %v5600_v0, %v181_v9  ;;  %v301_v12 = vadd.f32 %v5626_v1, %v300_v10  ;;  %v6897_v13 = vpop.f32.mrb[3].mxu0  ;;  %v6917_v45 = vpop.f32.mrb[3].mxu1  ;;  %v185_v14 = vmul.f32 0.17677669, %v179_v5  ;;  %v304_v15 = vmul.f32 0.17677669, %v298_v6 }
 0x216   :  { %v5756_v0 = vld [vmem:[%s9888_s3 + $0x6] ss:$0 sm:$0xff] }
 0x217   :  { %v186_v16 = vmul.f32 0.17677669, %v182_v11  ;;  %v305_v17 = vmul.f32 0.17677669, %v301_v12 }
 0x219   :  { %v187_v18 = vpack.c.bf16 %v186_v16, %v185_v14  ;;  %v306_v19 = vpack.c.bf16 %v305_v17, %v304_v15 }
 0x21b   :  { %189 = vst.msk [vmem:[#allocation2] sm:$0xff] %vm188_vm1, %v187_v18  ;;  %307 = vst.msk [vmem:[#allocation2 + $0x8] sm:$0xff] %vm188_vm1, %v306_v19 }
 0x222   :  { %v1474_v20 = vld [vmem:[#allocation2] sm:$0xff] }
 0x223   :  { %7126 = vmatprep.mubr.msk.bf16.mxu0 %vm188_vm1, %v1474_v20  ;;  %v1475_v20 = vld [vmem:[#allocation2 + $0x8] sm:$0xff] }
 0x232   :  { %v415_v23 = vpop.f32.mrb[4].mxu0  ;;  %v533_v24 = vpop.f32.mrb[4].mxu1 }
 0x233   :  { %v416_v25 = vadd.f32 %v5652_v21, %v415_v23  ;;  %v534_v26 = vadd.f32 %v5678_v22, %v533_v24  ;;  %v6936_v27 = vpop.f32.mrb[5].mxu0  ;;  %v6956_v28 = vpop.f32.mrb[5].mxu1  ;;  %v5834_v24 = vld [vmem:[%s9888_s3 + $0x9] ss:$0 sm:$0xff] }
 0x234   :  { %v418_v29 = vpop.f32.mrb[6].mxu0  ;;  %v536_v30 = vpop.f32.mrb[6].mxu1 }
 0x235   :  { %v419_v31 = vadd.f32 %v5652_v21, %v418_v29  ;;  %v537_v32 = vadd.f32 %v5678_v22, %v536_v30  ;;  %v6937_v33 = vpop.f32.mrb[7].mxu0  ;;  %v6957_v34 = vpop.f32.mrb[7].mxu1  ;;  %v422_v35 = vmul.f32 0.17677669, %v416_v25  ;;  %v540_v36 = vmul.f32 0.17677669, %v534_v26 }
 0x236   :  { %v5808_v22 = vld [vmem:[%s9888_s3 + $0x8] ss:$0 sm:$0xff] }
 0x237   :  { %v423_v37 = vmul.f32 0.17677669, %v419_v31  ;;  %v541_v38 = vmul.f32 0.17677669, %v537_v32 }
 0x239   :  { %v424_v39 = vpack.c.bf16 %v423_v37, %v422_v35  ;;  %v542_v40 = vpack.c.bf16 %v541_v38, %v540_v36 }
 0x23b   :  { %425 = vst.msk [vmem:[#allocation2 + $0x10] sm:$0xff] %vm188_vm1, %v424_v39  ;;  %543 = vst.msk [vmem:[#allocation2 + $0x18] sm:$0xff] %vm188_vm1, %v542_v40 }
 0x242   :  { %v1476_v21 = vld [vmem:[#allocation2 + $0x10] sm:$0xff]  ;;  %v1477_v38 = vld [vmem:[#allocation2 + $0x18] sm:$0xff] }
 0x252   :  { %v651_v44 = vpop.f32.mrb[8].mxu0  ;;  %v768_v47 = vpop.f32.mrb[8].mxu1 }
 0x253   :  { %v6976_v48 = vpop.f32.mrb[9].mxu0  ;;  %v6996_v49 = vpop.f32.mrb[9].mxu1  ;;  %v652_v52 = vadd.f32 %v5704_v43, %v651_v44  ;;  %v769_v53 = vadd.f32 %v5730_v46, %v768_v47 }
 0x254   :  { %v654_v50 = vpop.f32.mrb[10].mxu0  ;;  %v771_v51 = vpop.f32.mrb[10].mxu1 }
 0x255   :  { %v655_v54 = vadd.f32 %v5704_v43, %v654_v50  ;;  %v772_v55 = vadd.f32 %v5730_v46, %v771_v51  ;;  %v6977_v56 = vpop.f32.mrb[11].mxu0  ;;  %v6997_v57 = vpop.f32.mrb[11].mxu1  ;;  %v5860_v43 = vld [vmem:[%s9888_s3 + $0xa] ss:$0 sm:$0xff]  ;;  %v5886_v46 = vld [vmem:[%s9888_s3 + $0xb] ss:$0 sm:$0xff] }
 0x257   :  { %v658_v58 = vpack.c.bf16 %v655_v54, %v652_v52  ;;  %v775_v59 = vpack.c.bf16 %v772_v55, %v769_v53 }
 0x259   :  { %660 = vst.msk [vmem:[#allocation2 + $0x20] sm:$0xff] %vm188_vm1, %v658_v58  ;;  %776 = vst.msk [vmem:[#allocation2 + $0x28] sm:$0xff] %vm188_vm1, %v775_v59 }
 0x260   :  { %v1478_v60 = vld [vmem:[#allocation2 + $0x20] sm:$0xff]  ;;  %v1479_v62 = vld [vmem:[#allocation2 + $0x28] sm:$0xff] }
 0x261   :  { %7506 = vmatprep.subr.msk.bf16.mxu0 %vm188_vm1, %v1478_v60  ;;  %v1499_v61 = vsel %vm188_vm1, %v1478_v60, 0  ;;  %v1502_v63 = vsel %vm188_vm1, %v1479_v62, 0 }
 0x262   :  { %7119 = vmatpush3.bf16.xpose.msra.mxu0 %v1499_v61 }
 0x263   :  { %7507 = vmatprep.subr.msk.bf16.mxu0 %vm188_vm1, %v1479_v62  ;;  %v64_v62 = vld [vmem:[%s9889_s1] sm:$0xff] }
 0x26a   :  { %7121 = vmatpush3.bf16.xpose.msra.mxu0 %v1502_v63 }
 0x272   :  { %v884_v1 = vpop.f32.mrb[12].mxu0  ;;  %v1000_v4 = vpop.f32.mrb[12].mxu1 }
 0x273   :  { %v7016_v5 = vpop.f32.mrb[13].mxu0  ;;  %v7036_v6 = vpop.f32.mrb[13].mxu1  ;;  %v885_v9 = vadd.f32 %v5756_v0, %v884_v1  ;;  %v1001_v10 = vadd.f32 %v5782_v3, %v1000_v4 }
 0x274   :  { %v887_v7 = vpop.f32.mrb[14].mxu0  ;;  %v1003_v8 = vpop.f32.mrb[14].mxu1  ;;  %v67_v6 = vld [vmem:[%s9889_s1 + $0x18] sm:$0xff] }
 0x275   :  { %v888_v11 = vadd.f32 %v5756_v0, %v887_v7  ;;  %v1004_v12 = vadd.f32 %v5782_v3, %v1003_v8  ;;  %v7017_v13 = vpop.f32.mrb[15].mxu0  ;;  %v7037_v45 = vpop.f32.mrb[15].mxu1  ;;  %v66_v0 = vld [vmem:[%s9889_s1 + $0x10] sm:$0xff]  ;;  %v65_v3 = vld [vmem:[%s9889_s1 + $0x8] sm:$0xff] }
 0x276   :  { %v68_v13 = vld [vmem:[%s9889_s1 + $0x20] sm:$0xff] }
 0x277   :  { %v891_v14 = vpack.c.bf16 %v888_v11, %v885_v9  ;;  %v1007_v15 = vpack.c.bf16 %v1004_v12, %v1001_v10 }
 0x279   :  { %892 = vst.msk [vmem:[#allocation2 + $0x30] sm:$0xff] %vm188_vm1, %v891_v14  ;;  %1008 = vst.msk [vmem:[#allocation2 + $0x38] sm:$0xff] %vm188_vm1, %v1007_v15  ;;  %v70_v15 = vld [vmem:[%s9889_s1 + $0x30] sm:$0xff] }
 0x280   :  { %v1480_v16 = vld [vmem:[#allocation2 + $0x30] sm:$0xff]  ;;  %v1481_v18 = vld [vmem:[#allocation2 + $0x38] sm:$0xff] }
 0x281   :  { %7508 = vmatprep.subr.msk.bf16.mxu0 %vm188_vm1, %v1480_v16  ;;  %v1505_v17 = vsel %vm188_vm1, %v1480_v16, 0  ;;  %v1508_v19 = vsel %vm188_vm1, %v1481_v18, 0 }
 0x282   :  { %7123 = vmatpush3.bf16.xpose.msra.mxu0 %v1505_v17  ;;  %v69_v17 = vld [vmem:[%s9889_s1 + $0x28] sm:$0xff] }
 0x283   :  { %7509 = vmatprep.subr.msk.bf16.mxu0 %vm188_vm1, %v1481_v18 }
 0x28a   :  { %7125 = vmatpush3.bf16.xpose.msra.mxu0 %v1508_v19 }
 0x291   :  { %7127 = vmatmul.mubr.msk.bf16.vlgmr.msra.gmra.mrb[24].mxu0 %vm188_vm1, %v1475_v20 }
 0x292   :  { %v1116_v23 = vpop.f32.mrb[16].mxu0  ;;  %v1233_v25 = vpop.f32.mrb[16].mxu1  ;;  %7130 = vmatprep.mubr.msk.bf16.mxu0 %vm188_vm1, %v1476_v21  ;;  %v71_v21 = vld [vmem:[%s9889_s1 + $0x38] sm:$0xff] }
 0x293   :  { %v7056_v26 = vpop.f32.mrb[17].mxu0  ;;  %v7076_v27 = vpop.f32.mrb[17].mxu1  ;;  %v1117_v30 = vadd.f32 %v5808_v22, %v1116_v23  ;;  %v1234_v31 = vadd.f32 %v5834_v24, %v1233_v25 }
 0x294   :  { %v1119_v28 = vpop.f32.mrb[18].mxu0  ;;  %v1236_v29 = vpop.f32.mrb[18].mxu1 }
 0x295   :  { %v1120_v32 = vadd.f32 %v5808_v22, %v1119_v28  ;;  %v1237_v33 = vadd.f32 %v5834_v24, %v1236_v29  ;;  %v7057_v34 = vpop.f32.mrb[19].mxu0  ;;  %v7077_v35 = vpop.f32.mrb[19].mxu1 }
 0x297   :  { %v1123_v36 = vpack.c.bf16 %v1120_v32, %v1117_v30  ;;  %v1240_v37 = vpack.c.bf16 %v1237_v33, %v1234_v31 }
 0x299   :  { %1125 = vst.msk [vmem:[#allocation2 + $0x40] sm:$0xff] %vm188_vm1, %v1123_v36  ;;  %1241 = vst.msk [vmem:[#allocation2 + $0x48] sm:$0xff] %vm188_vm1, %v1240_v37  ;;  %7131 = vmatmul.mubr.msk.bf16.gmra.mrb[28].mxu0 %vm188_vm1, %v1477_v38 }
 0x2a0   :  { %v1482_v39 = vld [vmem:[#allocation2 + $0x40] sm:$0xff]  ;;  %v1483_v40 = vld [vmem:[#allocation2 + $0x48] sm:$0xff] }
 0x2a1   :  { %7134 = vmatprep.subr.bf16.mxu1 %v1482_v39 }
 0x2a2   :  { %7135 = vmatpush3.bf16.msra.mxu1 %v1482_v39 }
 0x2a3   :  { %7136 = vmatprep.subr.bf16.mxu1 %v1483_v40 }
 0x2a6   :  { %7137 = vmatpush3.bf16.msra.mxu1 %v1483_v40 }
 0x2b2   :  { %v1349_v44 = vpop.f32.mrb[20].mxu0  ;;  %v1465_v47 = vpop.f32.mrb[20].mxu1 }
 0x2b3   :  { %v7096_v48 = vpop.f32.mrb[21].mxu0  ;;  %v7116_v49 = vpop.f32.mrb[21].mxu1  ;;  %v1350_v52 = vadd.f32 %v5860_v43, %v1349_v44  ;;  %v1466_v53 = vadd.f32 %v5886_v46, %v1465_v47 }
 0x2b4   :  { %v1352_v50 = vpop.f32.mrb[22].mxu0  ;;  %v1468_v51 = vpop.f32.mrb[22].mxu1 }
 0x2b5   :  { %v1353_v54 = vadd.f32 %v5860_v43, %v1352_v50  ;;  %v1469_v55 = vadd.f32 %v5886_v46, %v1468_v51  ;;  %v7097_v56 = vpop.f32.mrb[23].mxu0  ;;  %v7117_v57 = vpop.f32.mrb[23].mxu1 }
 0x2b7   :  { %v1356_v58 = vpack.c.bf16 %v1353_v54, %v1350_v52  ;;  %v1472_v59 = vpack.c.bf16 %v1469_v55, %v1466_v53 }
 0x2b9   :  { %1357 = vst.msk [vmem:[#allocation2 + $0x50] sm:$0xff] %vm188_vm1, %v1356_v58  ;;  %1473 = vst.msk [vmem:[#allocation2 + $0x58] sm:$0xff] %vm188_vm1, %v1472_v59 }
 0x2c0   :  { %v1484_v60 = vld [vmem:[#allocation2 + $0x50] sm:$0xff]  ;;  %v1485_v61 = vld [vmem:[#allocation2 + $0x58] sm:$0xff] }
 0x2c1   :  { %7138 = vmatprep.subr.bf16.mxu1 %v1484_v60 }
 0x2c2   :  { %7139 = vmatpush3.bf16.msra.mxu1 %v1484_v60 }
 0x2c3   :  { %7140 = vmatprep.subr.bf16.mxu1 %v1485_v61 }
 0x2c6   :  { %7141 = vmatpush3.bf16.msra.mxu1 %v1485_v61 }
 0x2c7   :  { %7150 = vmatprep.subr.bf16.mxu1 %v8021_v2 }
 0x364   :  { %v7128_v63 = vpop.f32.mrb[24].mxu0 }
 0x365   :  { %v1544_v1 = vpop.f32.mrb[25].mxu0  ;;  %v1553_v8 = vadd.f32 %v7128_v63, %v66_v0 }
 0x366   :  { %v1545_v4 = vadd.f32 %v1544_v1, %v64_v62  ;;  %v7129_v5 = vpop.f32.mrb[26].mxu0 }
 0x367   :  { %v1547_v7 = vpop.f32.mrb[27].mxu0  ;;  %v1556_v11 = vadd.f32 %v7129_v5, %v67_v6  ;;  %v1582_v14 = vsel %vm1575_vm2, %v1553_v8, -inf }
 0x368   :  { %v1548_v9 = vadd.f32 %v1547_v7, %v65_v3  ;;  %v1576_v10 = vsel %vm1575_vm2, %v1545_v4, -inf }
 0x369   :  { %1577 = vmax.xlane.f32.xlu0 %v1576_v10  ;;  %v1585_v20 = vsel %vm1575_vm2, %v1556_v11, -inf }
 0x36a   :  { %v1579_v12 = vsel %vm1575_vm2, %v1548_v9, -inf }
 0x36b   :  { %1580 = vmax.xlane.f32.xlu1 %v1579_v12 }
 0x36c   :  { %v7132_v45 = vpop.f32.mrb[28].mxu0 }
 0x36d   :  { %v1560_v16 = vpop.f32.mrb[29].mxu0  ;;  %1583 = vmax.xlane.f32.xlu0 %v1582_v14  ;;  %v1569_v23 = vadd.f32 %v7132_v45, %v70_v15 }
 0x36e   :  { %v1561_v18 = vadd.f32 %v1560_v16, %v68_v13  ;;  %v7133_v19 = vpop.f32.mrb[30].mxu0 }
 0x36f   :  { %v1563_v22 = vpop.f32.mrb[31].mxu0  ;;  %1586 = vmax.xlane.f32.xlu1 %v1585_v20  ;;  %v1572_v26 = vadd.f32 %v7133_v19, %v71_v21  ;;  %v1594_v28 = vsel %vm1575_vm2, %v1569_v23, -inf }
 0x370   :  { %v1564_v24 = vadd.f32 %v1563_v22, %v69_v17  ;;  %v1588_v25 = vsel %vm1575_vm2, %v1561_v18, -inf }
 0x371   :  { %1589 = vmax.xlane.f32.xlu0 %v1588_v25  ;;  %v1597_v29 = vsel %vm1575_vm2, %v1572_v26, -inf }
 0x372   :  { %v1591_v27 = vsel %vm1575_vm2, %v1564_v24, -inf }
 0x373   :  { %1592 = vmax.xlane.f32.xlu1 %v1591_v27  ;;  %v7613_v27 = vld [vmem:[%s9890_s4] sm:$0xff]  }
 0x375   :  { %1595 = vmax.xlane.f32.xlu0 %v1594_v28 }
 0x377   :  { %1598 = vmax.xlane.f32.xlu1 %v1597_v29 }
 0x3f6   :  { %v1578_v30 = vpop.xlane.xlu0 %1577 }
 0x3f7   :  { %v1600_v31 = vsub.f32 %v1545_v4, %v1578_v30 }
 0x3f8   :  { %v1581_v32 = vpop.xlane.xlu1 %1580 }
 0x3f9   :  { %v1608_v33 = vmul.f32 1.442695, %v1600_v31  ;;  %v1601_v34 = vsub.f32 %v1548_v9, %v1581_v32 }
 0x3fa   :  { %v1584_v35 = vpop.xlane.xlu0 %1583 }
 0x3fb   :  { %7897 = vpow2.f32 %v1608_v33  ;;  %v1610_v36 = vmul.f32 1.442695, %v1601_v34  ;;  %v1602_v37 = vsub.f32 %v1553_v8, %v1584_v35  ;;  %v7614_v33 = vld [vmem:[%s9890_s4 + $0x8] sm:$0xff]  }
 0x3fc   :  { %v1587_v38 = vpop.xlane.xlu1 %1586 }
 0x3fd   :  { %7899 = vpow2.f32 %v1610_v36  ;;  %v1612_v39 = vmul.f32 1.442695, %v1602_v37  ;;  %v1603_v40 = vsub.f32 %v1556_v11, %v1587_v38 }
 0x3fe   :  { %v1590_v43 = vpop.xlane.xlu0 %1589 }
 0x3ff   :  { %7901 = vpow2.f32 %v1612_v39  ;;  %v1614_v44 = vmul.f32 1.442695, %v1603_v40  ;;  %v1604_v46 = vsub.f32 %v1561_v18, %v1590_v43 }
 0x400   :  { %v1593_v47 = vpop.xlane.xlu1 %1592 }
 0x401   :  { %7903 = vpow2.f32 %v1614_v44  ;;  %v1616_v48 = vmul.f32 1.442695, %v1604_v46  ;;  %v1605_v49 = vsub.f32 %v1564_v24, %v1593_v47  ;;  %v7615_v47 = vld [vmem:[%s9890_s4 + $0x10] sm:$0xff]  }
 0x402   :  { %v1596_v50 = vpop.xlane.xlu0 %1595 }
 0x403   :  { %7905 = vpow2.f32 %v1616_v48  ;;  %v1618_v51 = vmul.f32 1.442695, %v1605_v49  ;;  %v1606_v52 = vsub.f32 %v1569_v23, %v1596_v50  ;;  %v7616_v49 = vld [vmem:[%s9890_s4 + $0x18] sm:$0xff]  }
 0x404   :  { %v1599_v53 = vpop.xlane.xlu1 %1598 }
 0x405   :  { %v7898_v54 = vpop.eup %7897  ;;  %7907 = vpow2.f32 %v1618_v51  ;;  %v1620_v55 = vmul.f32 1.442695, %v1606_v52  ;;  %v1607_v56 = vsub.f32 %v1572_v26, %v1599_v53 }
 0x406   :  { %v1624_v57 = vsel %vm1575_vm2, %v7898_v54, 0.0 }
 0x407   :  { %v7900_v58 = vpop.eup %7899  ;;  %7909 = vpow2.f32 %v1620_v55  ;;  %v1622_v59 = vmul.f32 1.442695, %v1607_v56  ;;  %1625 = vadd.xlane.f32.xlu0 %v1624_v57  ;;  %v7617_v55 = vld [vmem:[%s9890_s4 + $0x20] sm:$0xff]   ;;  %v7618_v57 = vld [vmem:[%s9890_s4 + $0x28] sm:$0xff]  }
 0x408   :  { %v1627_v60 = vsel %vm1575_vm2, %v7900_v58, 0.0 }
 0x409   :  { %v7902_v61 = vpop.eup %7901  ;;  %7911 = vpow2.f32 %v1622_v59  ;;  %1628 = vadd.xlane.f32.xlu1 %v1627_v60  ;;  %v7620_v59 = vld [vmem:[%s9890_s4 + $0x38] sm:$0xff]  }
 0x40a   :  { %v1630_v62 = vsel %vm1575_vm2, %v7902_v61, 0.0 }
 0x40b   :  { %v7904_v63 = vpop.eup %7903  ;;  %1631 = vadd.xlane.f32.xlu0 %v1630_v62 }
 0x40c   :  { %v1633_v0 = vsel %vm1575_vm2, %v7904_v63, 0.0 }
 0x40d   :  { %v7906_v1 = vpop.eup %7905  ;;  %1634 = vadd.xlane.f32.xlu1 %v1633_v0  ;;  %v1749_v0 = vld [vmem:[%s9887_s8 + $0x2] ss:$0 sm:$0xff] }
 0x40e   :  { %v1636_v3 = vsel %vm1575_vm2, %v7906_v1, 0.0 }
 0x40f   :  { %v7908_v4 = vpop.eup %7907  ;;  %1637 = vadd.xlane.f32.xlu0 %v1636_v3 }
 0x410   :  { %v1639_v5 = vsel %vm1575_vm2, %v7908_v4, 0.0 }
 0x411   :  { %v7910_v6 = vpop.eup %7909  ;;  %1640 = vadd.xlane.f32.xlu1 %v1639_v5 }
 0x412   :  { %v1642_v7 = vsel %vm1575_vm2, %v7910_v6, 0.0 }
 0x413   :  { %v7912_v8 = vpop.eup %7911  ;;  %1643 = vadd.xlane.f32.xlu0 %v1642_v7 }
 0x414   :  { %v1645_v9 = vsel %vm1575_vm2, %v7912_v8, 0.0 }
 0x415   :  { %1646 = vadd.xlane.f32.xlu1 %v1645_v9 }
 0x494   :  { %v1626_v10 = vpop.xlane.xlu0 %1625 }
 0x495   :  { %7913 = vrcp.f32 %v1626_v10 }
 0x496   :  { %v1629_v11 = vpop.xlane.xlu1 %1628 }
 0x497   :  { %7915 = vrcp.f32 %v1629_v11 }
 0x498   :  { %v1632_v12 = vpop.xlane.xlu0 %1631 }
 0x499   :  { %7917 = vrcp.f32 %v1632_v12 }
 0x49a   :  { %v1635_v13 = vpop.xlane.xlu1 %1634 }
 0x49b   :  { %7919 = vrcp.f32 %v1635_v13 }
 0x49c   :  { %v1638_v45 = vpop.xlane.xlu0 %1637 }
 0x49d   :  { %7921 = vrcp.f32 %v1638_v45 }
 0x49e   :  { %v1641_v14 = vpop.xlane.xlu1 %1640 }
 0x49f   :  { %v7914_v15 = vpop.eup %7913  ;;  %7923 = vrcp.f32 %v1641_v14 }
 0x4a0   :  { %v1644_v16 = vpop.xlane.xlu0 %1643  ;;  %v1656_v19 = vmul.f32 %v7914_v15, %v7898_v54 }
 0x4a1   :  { %v7916_v17 = vpop.eup %7915  ;;  %7925 = vrcp.f32 %v1644_v16 }
 0x4a2   :  { %v1647_v18 = vpop.xlane.xlu1 %1646  ;;  %v1657_v20 = vmul.f32 %v7916_v17, %v7900_v58  ;;  %v7619_v58 = vld [vmem:[%s9890_s4 + $0x30] sm:$0xff]  }
 0x4a3   :  { %v7918_v21 = vpop.eup %7917  ;;  %7927 = vrcp.f32 %v1647_v18 }
 0x4a4   :  { %v1664_v22 = vpack.c.bf16 %v1657_v20, %v1656_v19  ;;  %v1658_v24 = vmul.f32 %v7918_v21, %v7902_v61 }
 0x4a5   :  { %v7920_v23 = vpop.eup %7919 }
 0x4a6   :  { %v1659_v25 = vmul.f32 %v7920_v23, %v7904_v63  ;;  %7142 = vmatprep.mubr.msk.bf16.mxu1 %vm1575_vm2, %v1664_v22  ;;  %v7621_v23 = vld [vmem:[%s9891_s5] ss:$16 sps:$4 sm:$0xff]  }
 0x4a7   :  { %v7922_v26 = vpop.eup %7921 }
 0x4a8   :  { %v1665_v28 = vpack.c.bf16 %v1659_v25, %v1658_v24  ;;  %v1660_v30 = vmul.f32 %v7922_v26, %v7906_v1  ;;  %v7623_v24 = vld [vmem:[%s9891_s5 + $0x4] ss:$16 sps:$4 sm:$0xff]   ;;  %v7624_v25 = vld [vmem:[%s9891_s5 + $0x8] ss:$16 sps:$4 sm:$0xff]  }
 0x4a9   :  { %v7924_v29 = vpop.eup %7923  ;;  %2247 = vmatprep.subr.bf16.mxu0 %v7623_v24  ;;  %v7629_v26 = vld [vmem:[%s9891_s5 + $0x24] ss:$16 sps:$4 sm:$0xff]   ;;  %v7675_v24 = vld [vmem:[%s9892_s6 + $0x8] sm:$0xff]  }
 0x4aa   :  { %7143 = vmatmul.mubr.msk.bf16.vlgmr.msra.gmra.mrb[24].mxu1 %vm1575_vm2, %v1665_v28  ;;  %v1661_v31 = vmul.f32 %v7924_v29, %v7908_v4  ;;  %2248 = vmatpush1.bf16.msra.mxu0 %v7621_v23  ;;  %v7632_v28 = vld [vmem:[%s9891_s5 + $0x2c] ss:$16 sps:$4 sm:$0xff]  }
 0x4ab   :  { %v7926_v32 = vpop.eup %7925  ;;  %7151 = vmatpush3.bf16.msra.mxu1 %v7613_v27  ;;  %v7630_v27 = vld [vmem:[%s9891_s5 + $0x28] ss:$16 sps:$4 sm:$0xff]   ;;  %2249 = vmatprep.subr.bf16.mxu0 %v7629_v26  ;;  %v7679_v26 = vld [vmem:[%s9892_s6 + $0x10] sm:$0xff]  }
 0x4ac   :  { %v1666_v34 = vpack.c.bf16 %v1661_v31, %v1660_v30  ;;  %7152 = vmatprep.subr.bf16.mxu1 %v8021_v2  ;;  %v1662_v36 = vmul.f32 %v7926_v32, %v7910_v6  ;;  %v7674_v23 = vld [vmem:[%s9892_s6 + $0xc8] sm:$0xff]  }
 0x4ad   :  { %v7928_v35 = vpop.eup %7927 }
 0x4ae   :  { %7146 = vmatprep.mubr.msk.bf16.mxu1 %vm1575_vm2, %v1666_v34  ;;  %v1663_v37 = vmul.f32 %v7928_v35, %v7912_v8 }
 0x4af   :  { %7153 = vmatpush3.bf16.msra.mxu1 %v7614_v33 }
 0x4b0   :  { %v1667_v38 = vpack.c.bf16 %v1663_v37, %v1662_v36  ;;  %7158 = vmatprep.subr.bf16.mxu1 %v8021_v2  ;;  %v7635_v37 = vld [vmem:[%s9891_s5 + $0x44] ss:$16 sps:$4 sm:$0xff]  }
 0x4b2   :  { %7147 = vmatmul.mubr.msk.bf16.gmra.mrb[28].mxu1 %vm1575_vm2, %v1667_v38  ;;  %v7638_v38 = vld [vmem:[%s9891_s5 + $0x4c] ss:$16 sps:$4 sm:$0xff]  }
 0x4b3   :  { %7154 = vmatprep.mubr.msk.bf16.mxu1 %vm8022_vm0, %v8021_v2 }
 0x57d   :  { %v7144_v39 = vpop.f32.mrb[24].mxu1 }
 0x57e   :  { %v1714_v40 = vpop.f32.mrb[25].mxu1 }
 0x57f   :  { %v7145_v43 = vpop.f32.mrb[26].mxu1 }
 0x580   :  { %v1746_v44 = vpack.c.bf16 %v7145_v43, %v7144_v39  ;;  %v1717_v46 = vpop.f32.mrb[27].mxu1  ;;  %v7633_v39 = vld [vmem:[%s9891_s5 + $0x40] ss:$16 sps:$4 sm:$0xff]   ;;  %v7641_v43 = vld [vmem:[%s9891_s5 + $0x64] ss:$16 sps:$4 sm:$0xff]  }
 0x581   :  { %v1745_v48 = vpack.c.bf16 %v1717_v46, %v1714_v40  ;;  %v7636_v40 = vld [vmem:[%s9891_s5 + $0x48] ss:$16 sps:$4 sm:$0xff]   ;;  %v7639_v46 = vld [vmem:[%s9891_s5 + $0x60] ss:$16 sps:$4 sm:$0xff]  }
 0x583   :  { %7155 = vmatmul.mubr.msk.bf16.vlgmr.msra.gmra.mrb[32].mxu1 %vm188_vm1, %v1745_v48  ;;  %v7647_v48 = vld [vmem:[%s9891_s5 + $0x84] ss:$16 sps:$4 sm:$0xff]  }
 0x584   :  { %7159 = vmatpush3.bf16.msra.mxu1 %v7615_v47  ;;  %7162 = vmatprep.mubr.msk.bf16.mxu1 %vm8022_vm0, %v8021_v2  ;;  %v7642_v47 = vld [vmem:[%s9891_s5 + $0x68] ss:$16 sps:$4 sm:$0xff]  }
 0x585   :  { %v7148_v50 = vpop.f32.mrb[28].mxu1  ;;  %7160 = vmatprep.subr.bf16.mxu1 %v8021_v2 }
 0x586   :  { %v1730_v51 = vpop.f32.mrb[29].mxu1 }
 0x587   :  { %v7149_v52 = vpop.f32.mrb[30].mxu1 }
 0x588   :  { %v1748_v53 = vpack.c.bf16 %v7149_v52, %v7148_v50  ;;  %7161 = vmatpush3.bf16.msra.mxu1 %v7616_v49  ;;  %v1733_v54 = vpop.f32.mrb[31].mxu1  ;;  %v7650_v49 = vld [vmem:[%s9891_s5 + $0x8c] ss:$16 sps:$4 sm:$0xff]   ;;  %v7645_v50 = vld [vmem:[%s9891_s5 + $0x80] ss:$16 sps:$4 sm:$0xff]  }
 0x589   :  { %v1747_v56 = vpack.c.bf16 %v1733_v54, %v1730_v51  ;;  %7166 = vmatprep.subr.bf16.mxu1 %v8021_v2  ;;  %v7648_v51 = vld [vmem:[%s9891_s5 + $0x88] ss:$16 sps:$4 sm:$0xff]   ;;  %v7653_v52 = vld [vmem:[%s9891_s5 + $0xa4] ss:$16 sps:$4 sm:$0xff]   ;;  %v7651_v54 = vld [vmem:[%s9891_s5 + $0xa0] ss:$16 sps:$4 sm:$0xff]  }
 0x58b   :  { %7163 = vmatmul.mubr.msk.bf16.vlgmr.msra.gmra.mrb[36].mxu1 %vm188_vm1, %v1746_v44  ;;  %v7644_v44 = vld [vmem:[%s9891_s5 + $0x6c] ss:$16 sps:$4 sm:$0xff]  }
 0x58c   :  { %7167 = vmatpush3.bf16.msra.mxu1 %v7617_v55  ;;  %7170 = vmatprep.mubr.msk.bf16.mxu1 %vm8022_vm0, %v8021_v2  ;;  %v7654_v55 = vld [vmem:[%s9891_s5 + $0xa8] ss:$16 sps:$4 sm:$0xff]  }
 0x58d   :  { %7168 = vmatprep.subr.bf16.mxu1 %v8021_v2 }
 0x590   :  { %7169 = vmatpush3.bf16.msra.mxu1 %v7618_v57  ;;  %v7662_v57 = vld [vmem:[%s9891_s5 + $0xcc] ss:$16 sps:$4 sm:$0xff]  }
 0x591   :  { %7174 = vmatprep.subr.bf16.mxu1 %v8021_v2 }
 0x593   :  { %7171 = vmatmul.mubr.msk.bf16.vlgmr.msra.gmra.mrb[40].mxu1 %vm188_vm1, %v1747_v56  ;;  %v7659_v56 = vld [vmem:[%s9891_s5 + $0xc4] ss:$16 sps:$4 sm:$0xff]  }
 0x594   :  { %7175 = vmatpush3.bf16.msra.mxu1 %v7619_v58  ;;  %7178 = vmatprep.mubr.msk.bf16.mxu1 %vm8022_vm0, %v8021_v2  ;;  %v7657_v58 = vld [vmem:[%s9891_s5 + $0xc0] ss:$16 sps:$4 sm:$0xff]  }
 0x595   :  { %7176 = vmatprep.subr.bf16.mxu1 %v8021_v2 }
 0x598   :  { %7177 = vmatpush3.bf16.msra.mxu1 %v7620_v59  ;;  %v7660_v59 = vld [vmem:[%s9891_s5 + $0xc8] ss:$16 sps:$4 sm:$0xff]  }
 0x59b   :  { %7179 = vmatmul.mubr.msk.bf16.vlgmr.msra.gmra.mrb[44].mxu1 %vm188_vm1, %v1748_v53  ;;  %v7656_v53 = vld [vmem:[%s9891_s5 + $0xac] ss:$16 sps:$4 sm:$0xff]  }
 0x656   :  { %v1803_v60 = vpop.f32.mrb[32].mxu1 }
 0x657   :  { %v7156_v61 = vpop.f32.mrb[33].mxu1  ;;  %v1810_v1 = vadd.f32 %v1803_v60, %v1749_v0  ;;  %v7663_v60 = vld [vmem:[%s9891_s5 + $0xe0] ss:$16 sps:$4 sm:$0xff]  }
 0x658   :  { %v1806_v62 = vpop.f32.mrb[34].mxu1  ;;  %v7665_v61 = vld [vmem:[%s9891_s5 + $0xe4] ss:$16 sps:$4 sm:$0xff]  }
 0x659   :  { %v7157_v63 = vpop.f32.mrb[35].mxu1  ;;  %v1811_v4 = vadd.f32 %v1806_v62, %v1749_v0  ;;  %v7666_v62 = vld [vmem:[%s9891_s5 + $0xe8] ss:$16 sps:$4 sm:$0xff]   ;;  %v8023_v0 = vmov 0  }
 0x65a   :  { %v7668_v63 = vld [vmem:[%s9891_s5 + $0xec] ss:$16 sps:$4 sm:$0xff]   ;;  %2279 = vmatprep.mubr.bf16.mxu0 %v8023_v0  ;;  %2322 = vmatprep.mubr.bf16.mxu1 %v8023_v0 }
 0x65e   :  { %v1866_v3 = vpop.f32.mrb[36].mxu1 }
 0x65f   :  { %v1873_v5 = vadd.f32 %v1866_v3, %v1810_v1  ;;  %v7164_v6 = vpop.f32.mrb[37].mxu1 }
 0x660   :  { %v1869_v7 = vpop.f32.mrb[38].mxu1 }
 0x661   :  { %v1874_v8 = vadd.f32 %v1869_v7, %v1811_v4  ;;  %v7165_v9 = vpop.f32.mrb[39].mxu1 }
 0x662   :  { %v2003_v9 = vld [vmem:[%s9887_s8 + $0x3] ss:$0 sm:$0xff] }
 0x666   :  { %v1929_v10 = vpop.f32.mrb[40].mxu1 }
 0x667   :  { %v1936_v11 = vadd.f32 %v1929_v10, %v1873_v5  ;;  %v7172_v12 = vpop.f32.mrb[41].mxu1 }
 0x668   :  { %v1932_v13 = vpop.f32.mrb[42].mxu1 }
 0x669   :  { %v1937_v45 = vadd.f32 %v1932_v13, %v1874_v8  ;;  %v7173_v14 = vpop.f32.mrb[43].mxu1 }
 0x66e   :  { %v1992_v15 = vpop.f32.mrb[44].mxu1 }
 0x66f   :  { %v1999_v16 = vadd.f32 %v1992_v15, %v1936_v11  ;;  %v7180_v17 = vpop.f32.mrb[45].mxu1 }
 0x670   :  { %v1995_v18 = vpop.f32.mrb[46].mxu1 }
 0x671   :  { %v2000_v19 = vadd.f32 %v1995_v18, %v1937_v45  ;;  %v7181_v20 = vpop.f32.mrb[47].mxu1  ;;  %v2001_v21 = vadd.f32 %v1999_v16, %v8156_v41  ;;  %v7626_v41 = vld [vmem:[%s9891_s5 + $0xc] ss:$16 sps:$4 sm:$0xff]   ;;  %v2004_v45 = vld [vmem:[%s9887_s8 + $0x4] ss:$0 sm:$0xff] }
 0x672   :  { %2290 = vmatprep.subr.bf16.mxu1 %v7626_v41  ;;  %v7669_v18 = vld [vmem:[%s9892_s6 + $0x40] sm:$0xff]   ;;  %v7677_v41 = vld [vmem:[%s9892_s6 + $0x50] sm:$0xff]  }
 0x673   :  { %2005 = vadd.xlane.f32.xlu0 %v2001_v21  ;;  %v2002_v22 = vadd.f32 %v2000_v19, %v8158_v42  ;;  %v7627_v42 = vld [vmem:[%s9891_s5 + $0x20] ss:$16 sps:$4 sm:$0xff]   ;;  %2291 = vmatpush1.bf16.msra.mxu1 %v7624_v25  ;;  %v7676_v25 = vld [vmem:[%s9892_s6 + $0x88] sm:$0xff]  }
 0x674   :  { %2292 = vmatprep.subr.bf16.mxu1 %v7632_v28  ;;  %2250 = vmatpush1.bf16.msra.mxu0 %v7627_v42  ;;  %v7670_v19 = vld [vmem:[%s9892_s6 + $0xc0] sm:$0xff]   ;;  %v7678_v42 = vld [vmem:[%s9892_s6 + $0xd0] sm:$0xff]   ;;  %v7681_v28 = vld [vmem:[%s9892_s6 + $0x58] sm:$0xff]  }
 0x675   :  { %2007 = vadd.xlane.f32.xlu1 %v2002_v22  ;;  %2251 = vmatprep.subr.bf16.mxu0 %v7635_v37  ;;  %v7671_v20 = vld [vmem:[%s9892_s6] sm:$0xff]   ;;  %v7690_v37 = vld [vmem:[%s9892_s6 + $0xe8] sm:$0xff]  }
 0x677   :  { %2293 = vmatpush1.bf16.msra.mxu1 %v7630_v27  ;;  %v7680_v27 = vld [vmem:[%s9892_s6 + $0x90] sm:$0xff]  }
 0x678   :  { %2294 = vmatprep.subr.bf16.mxu1 %v7638_v38  ;;  %2252 = vmatpush1.bf16.msra.mxu0 %v7633_v39  ;;  %v7691_v38 = vld [vmem:[%s9892_s6 + $0x28] sm:$0xff]  }
 0x679   :  { %2253 = vmatprep.subr.bf16.mxu0 %v7641_v43  ;;  %v7692_v39 = vld [vmem:[%s9892_s6 + $0xa8] sm:$0xff]   ;;  %v7694_v43 = vld [vmem:[%s9892_s6 + $0xf0] sm:$0xff]  }
 0x67b   :  { %2295 = vmatpush1.bf16.msra.mxu1 %v7636_v40  ;;  %v7693_v40 = vld [vmem:[%s9892_s6 + $0x70] sm:$0xff]  }
 0x67c   :  { %2296 = vmatprep.subr.bf16.mxu1 %v7644_v44  ;;  %2254 = vmatpush1.bf16.msra.mxu0 %v7639_v46  ;;  %v7695_v44 = vld [vmem:[%s9892_s6 + $0x30] sm:$0xff]  }
 0x67d   :  { %2255 = vmatprep.subr.bf16.mxu0 %v7647_v48  ;;  %v7696_v46 = vld [vmem:[%s9892_s6 + $0xb0] sm:$0xff]   ;;  %v7698_v48 = vld [vmem:[%s9892_s6 + $0xf8] sm:$0xff]  }
 0x67f   :  { %2297 = vmatpush1.bf16.msra.mxu1 %v7642_v47  ;;  %v7697_v47 = vld [vmem:[%s9892_s6 + $0x78] sm:$0xff]  }
 0x680   :  { %2298 = vmatprep.subr.bf16.mxu1 %v7650_v49  ;;  %2256 = vmatpush1.bf16.msra.mxu0 %v7645_v50  ;;  %v7699_v49 = vld [vmem:[%s9892_s6 + $0x38] sm:$0xff]  }
 0x681   :  { %2257 = vmatprep.subr.bf16.mxu0 %v7653_v52  ;;  %v7700_v50 = vld [vmem:[%s9892_s6 + $0xb8] sm:$0xff]  }
 0x683   :  { %2299 = vmatpush1.bf16.msra.mxu1 %v7648_v51  ;;  %v2067_v51 = vlaneseq }
 0x684   :  { %2300 = vmatprep.subr.bf16.mxu1 %v7656_v53  ;;  %2258 = vmatpush1.bf16.msra.mxu0 %v7651_v54 }
 0x685   :  { %2259 = vmatprep.subr.bf16.mxu0 %v7659_v56  ;;  %v8885_v52 = vshrl.u32 %v2067_v51, 7 }
 0x687   :  { %2301 = vmatpush1.bf16.msra.mxu1 %v7654_v55  ;;  %v2069_v53 = vsub.s32 0, %v8885_v52  ;;  %v2077_v54 = vsub.s32 2, %v8885_v52  ;;  %v5927_v55 = vld [vmem:[%s9887_s8 + $0x5] ss:$8 sm:$0xf]  ;;  %v2073_v56 = vsub.s32 1, %v8885_v52 }
 0x688   :  { %2302 = vmatprep.subr.bf16.mxu1 %v7662_v57  ;;  %2260 = vmatpush1.bf16.msra.mxu0 %v7657_v58  ;;  %v2081_v57 = vsub.s32 3, %v8885_v52 }
 0x689   :  { %2261 = vmatprep.subr.bf16.mxu0 %v7665_v61  ;;  %v2070_v58 = vrot.slane %v5927_v55, %v2069_v53 }
 0x68a   :  { %v2082_v61 = vrot.slane %v5927_v55, %v2081_v57 }
 0x68b   :  { %2303 = vmatpush1.bf16.msra.mxu1 %v7660_v59  ;;  %v2078_v59 = vrot.slane %v5927_v55, %v2077_v54 }
 0x68c   :  { %2304 = vmatprep.subr.bf16.mxu1 %v7668_v63  ;;  %2262 = vmatpush1.bf16.msra.mxu0 %v7663_v60  ;;  %v2074_v60 = vrot.slane %v5927_v55, %v2073_v56 }
 0x68d   :  { %6645 = vmatprep.subr.bf16.mxu0 %v7669_v18 }
 0x68f   :  { %2305 = vmatpush1.bf16.msra.mxu1 %v7666_v62 }
 0x690   :  { %6667 = vmatprep.subr.bf16.mxu1 %v7670_v19 }
 0x700   :  { %v2006_v29 = vpop.xlane.xlu0 %2005 }
 0x701   :  { %v2009_v30 = vmul.f32 0.0078125, %v2006_v29  ;;  %v7682_v29 = vld [vmem:[%s9892_s6 + $0xd8] sm:$0xff]  }
 0x702   :  { %v2008_v31 = vpop.xlane.xlu1 %2007 }
 0x703   :  { %v8691_v32 = vsub.f32 %v2001_v21, %v2009_v30  ;;  %v2010_v33 = vmul.f32 0.0078125, %v2008_v31  ;;  %v7672_v21 = vld [vmem:[%s9892_s6 + $0x80] sm:$0xff]   ;;  %v7683_v30 = vld [vmem:[%s9892_s6 + $0x18] sm:$0xff]  }
 0x704   :  { %v7684_v31 = vld [vmem:[%s9892_s6 + $0x98] sm:$0xff]  }
 0x705   :  { %v8693_v34 = vsub.f32 %v2002_v22, %v2010_v33  ;;  %v2013_v35 = vmul.f32 %v8691_v32, %v8691_v32  ;;  %v7673_v22 = vld [vmem:[%s9892_s6 + $0x48] sm:$0xff]   ;;  %v7686_v33 = vld [vmem:[%s9892_s6 + $0xe0] sm:$0xff]  }
 0x707   :  { %2015 = vadd.xlane.f32.xlu0 %v2013_v35  ;;  %v2014_v36 = vmul.f32 %v8693_v34, %v8693_v34  ;;  %v7688_v35 = vld [vmem:[%s9892_s6 + $0xa0] sm:$0xff]  }
 0x709   :  { %2017 = vadd.xlane.f32.xlu1 %v2014_v36  ;;  %v7689_v36 = vld [vmem:[%s9892_s6 + $0x68] sm:$0xff]  }
 0x794   :  { %v2016_v1 = vpop.xlane.xlu0 %2015 }
 0x795   :  { %v2019_v3 = vmul.f32 0.0078125, %v2016_v1 }
 0x796   :  { %v2018_v4 = vpop.xlane.xlu1 %2017 }
 0x797   :  { %v2021_v5 = vadd.f32 1e-05, %v2019_v3  ;;  %v2020_v6 = vmul.f32 0.0078125, %v2018_v4 }
 0x799   :  { %7929 = vrsqrt.f32 %v2021_v5  ;;  %v2022_v7 = vadd.f32 1e-05, %v2020_v6 }
 0x79b   :  { %7931 = vrsqrt.f32 %v2022_v7 }
 0x7a3   :  { %v7930_v8 = vpop.eup %7929 }
 0x7a4   :  { %v2025_v10 = vmul.f32 %v7930_v8, %v8691_v32  ;;  %v7685_v32 = vld [vmem:[%s9892_s6 + $0x60] sm:$0xff]  }
 0x7a5   :  { %v7932_v11 = vpop.eup %7931 }
 0x7a6   :  { %v2027_v12 = vmul.f32 %v2025_v10, %v2003_v9  ;;  %v2026_v13 = vmul.f32 %v7932_v11, %v8693_v34  ;;  %v7687_v34 = vld [vmem:[%s9892_s6 + $0x20] sm:$0xff]  }
 0x7a8   :  { %v2028_v14 = vmul.f32 %v2026_v13, %v2003_v9  ;;  %v8781_v15 = vadd.f32 %v2027_v12, %v2004_v45 }
 0x7aa   :  { %v8783_v16 = vadd.f32 %v2028_v14, %v2004_v45 }
 0x7ac   :  { %v2031_v17 = vpack.c.bf16 %v8783_v16, %v8781_v15 }
 0x7ae   :  { %2280 = vmatmul.mubr.bf16.vlgmr.msra.gmra.mrb[32].mxu0 %v2031_v17  ;;  %2323 = vmatmul.mubr.bf16.vlgmr.msra.gmra.mrb[48].mxu1 %v2031_v17 }
 0x7af   :  { %6646 = vmatpush3.bf16.msra.mxu0 %v7671_v20  ;;  %6668 = vmatpush3.bf16.msra.mxu1 %v7672_v21 }
 0x7b0   :  { %6647 = vmatprep.subr.bf16.mxu0 %v7673_v22  ;;  %6669 = vmatprep.subr.bf16.mxu1 %v7674_v23 }
 0x7b3   :  { %6648 = vmatpush3.bf16.msra.mxu0 %v7675_v24  ;;  %6670 = vmatpush3.bf16.msra.mxu1 %v7676_v25 }
 0x7b4   :  { %6649 = vmatprep.subr.bf16.mxu0 %v7677_v41  ;;  %6671 = vmatprep.subr.bf16.mxu1 %v7678_v42 }
 0x7b7   :  { %6650 = vmatpush3.bf16.msra.mxu0 %v7679_v26  ;;  %6672 = vmatpush3.bf16.msra.mxu1 %v7680_v27 }
 0x7b8   :  { %6651 = vmatprep.subr.bf16.mxu0 %v7681_v28  ;;  %6673 = vmatprep.subr.bf16.mxu1 %v7682_v29 }
 0x7bb   :  { %6652 = vmatpush3.bf16.msra.mxu0 %v7683_v30  ;;  %6674 = vmatpush3.bf16.msra.mxu1 %v7684_v31 }
 0x7bc   :  { %6653 = vmatprep.subr.bf16.mxu0 %v7685_v32  ;;  %6675 = vmatprep.subr.bf16.mxu1 %v7686_v33 }
 0x7bf   :  { %6654 = vmatpush3.bf16.msra.mxu0 %v7687_v34  ;;  %6676 = vmatpush3.bf16.msra.mxu1 %v7688_v35 }
 0x7c0   :  { %6655 = vmatprep.subr.bf16.mxu0 %v7689_v36  ;;  %6677 = vmatprep.subr.bf16.mxu1 %v7690_v37 }
 0x7c3   :  { %6656 = vmatpush3.bf16.msra.mxu0 %v7691_v38  ;;  %6678 = vmatpush3.bf16.msra.mxu1 %v7692_v39 }
 0x7c4   :  { %6657 = vmatprep.subr.bf16.mxu0 %v7693_v40  ;;  %6679 = vmatprep.subr.bf16.mxu1 %v7694_v43 }
 0x7c7   :  { %6658 = vmatpush3.bf16.msra.mxu0 %v7695_v44  ;;  %6680 = vmatpush3.bf16.msra.mxu1 %v7696_v46 }
 0x7c8   :  { %6659 = vmatprep.subr.bf16.mxu0 %v7697_v47  ;;  %6681 = vmatprep.subr.bf16.mxu1 %v7698_v48 }
 0x7cb   :  { %6660 = vmatpush3.bf16.msra.mxu0 %v7699_v49  ;;  %6682 = vmatpush3.bf16.msra.mxu1 %v7700_v50 }
 0x7cc   :  { %7182 = vmatprep.subr.bf16.mxu0 %v8021_v2  ;;  %7202 = vmatprep.subr.bf16.mxu1 %v8021_v2 }
 0x881   :  { %v2281_v62 = vpop.f32.mrb[32].mxu0  ;;  %v2324_v63 = vpop.f32.mrb[48].mxu1 }
 0x882   :  { %v8902_v1 = vadd.f32 %v2281_v62, %v2070_v58  ;;  %v8904_v3 = vadd.f32 %v2324_v63, %v2078_v59  ;;  %v2283_v4 = vpop.f32.mrb[33].mxu0  ;;  %v2326_v5 = vpop.f32.mrb[49].mxu1 }
 0x883   :  { %v8906_v6 = vadd.f32 %v2283_v4, %v2074_v60  ;;  %v8908_v7 = vadd.f32 %v2326_v5, %v2082_v61  ;;  %v2285_v8 = vpop.f32.mrb[34].mxu0  ;;  %v2328_v9 = vpop.f32.mrb[50].mxu1 }
 0x884   :  { %v2333_v10 = vmul.f32 %v8902_v1, %v8902_v1  ;;  %v2335_v11 = vmul.f32 %v8904_v3, %v8904_v3  ;;  %v8914_v12 = vadd.f32 %v2285_v8, %v2070_v58  ;;  %v8916_v13 = vadd.f32 %v2328_v9, %v2078_v59  ;;  %v2287_v45 = vpop.f32.mrb[35].mxu0  ;;  %v2330_v14 = vpop.f32.mrb[51].mxu1 }
 0x885   :  { %v2334_v17 = vmul.f32 %v8906_v6, %v8906_v6  ;;  %v2336_v18 = vmul.f32 %v8908_v7, %v8908_v7  ;;  %v8922_v19 = vadd.f32 %v2287_v45, %v2074_v60  ;;  %v8924_v20 = vadd.f32 %v2330_v14, %v2082_v61 }
 0x886   :  { %v2341_v21 = vmul.f32 %v2333_v10, %v8902_v1  ;;  %v2343_v22 = vmul.f32 %v2335_v11, %v8904_v3  ;;  %v2337_v23 = vmul.f32 %v8914_v12, %v8914_v12  ;;  %v2339_v24 = vmul.f32 %v8916_v13, %v8916_v13 }
 0x887   :  { %v2342_v25 = vmul.f32 %v2334_v17, %v8906_v6  ;;  %v2344_v41 = vmul.f32 %v2336_v18, %v8908_v7  ;;  %v2338_v42 = vmul.f32 %v8922_v19, %v8922_v19  ;;  %v2340_v26 = vmul.f32 %v8924_v20, %v8924_v20 }
 0x888   :  { %v2349_v27 = vmul.f32 0.044715, %v2341_v21  ;;  %v2351_v28 = vmul.f32 0.044715, %v2343_v22  ;;  %v2345_v29 = vmul.f32 %v2337_v23, %v8914_v12  ;;  %v2347_v30 = vmul.f32 %v2339_v24, %v8916_v13 }
 0x889   :  { %v2350_v31 = vmul.f32 0.044715, %v2342_v25  ;;  %v2352_v32 = vmul.f32 0.044715, %v2344_v41  ;;  %v2346_v33 = vmul.f32 %v2338_v42, %v8922_v19  ;;  %v2348_v34 = vmul.f32 %v2340_v26, %v8924_v20 }
 0x88a   :  { %v2357_v35 = vadd.f32 %v2349_v27, %v8902_v1  ;;  %v2359_v36 = vadd.f32 %v2351_v28, %v8904_v3  ;;  %v2353_v37 = vmul.f32 0.044715, %v2345_v29  ;;  %v2355_v38 = vmul.f32 0.044715, %v2347_v30 }
 0x88b   :  { %v2358_v39 = vadd.f32 %v2350_v31, %v8906_v6  ;;  %v2360_v40 = vadd.f32 %v2352_v32, %v8908_v7  ;;  %v2354_v43 = vmul.f32 0.044715, %v2346_v33  ;;  %v2356_v44 = vmul.f32 0.044715, %v2348_v34 }
 0x88c   :  { %v2365_v46 = vmul.f32 0.7978846, %v2357_v35  ;;  %v2367_v47 = vmul.f32 0.7978846, %v2359_v36  ;;  %v2361_v48 = vadd.f32 %v2353_v37, %v8914_v12  ;;  %v2363_v49 = vadd.f32 %v2355_v38, %v8916_v13 }
 0x88d   :  { %v2366_v50 = vmul.f32 0.7978846, %v2358_v39  ;;  %v2368_v51 = vmul.f32 0.7978846, %v2360_v40  ;;  %v2362_v55 = vadd.f32 %v2354_v43, %v8922_v19  ;;  %v2364_v58 = vadd.f32 %v2356_v44, %v8924_v20 }
 0x88e   :  { %7933 = vtanh.f32 %v2365_v46  ;;  %v2369_v59 = vmul.f32 0.7978846, %v2361_v48  ;;  %v2371_v60 = vmul.f32 0.7978846, %v2363_v49 }
 0x88f   :  { %7935 = vtanh.f32 %v2367_v47  ;;  %v2370_v61 = vmul.f32 0.7978846, %v2362_v55  ;;  %v2372_v62 = vmul.f32 0.7978846, %v2364_v58 }
 0x890   :  { %7937 = vtanh.f32 %v2366_v50 }
 0x891   :  { %7939 = vtanh.f32 %v2368_v51 }
 0x892   :  { %7941 = vtanh.f32 %v2369_v59 }
 0x893   :  { %7943 = vtanh.f32 %v2371_v60 }
 0x894   :  { %7945 = vtanh.f32 %v2370_v61 }
 0x895   :  { %7947 = vtanh.f32 %v2372_v62 }
 0x898   :  { %v7934_v63 = vpop.eup %7933 }
 0x899   :  { %v7936_v4 = vpop.eup %7935  ;;  %v2381_v5 = vadd.f32 1.0, %v7934_v63  ;;  %v7701_v63 = vld [vmem:[%s9886_s2 + $0x300] sm:$0xff]  }
 0x89a   :  { %v7938_v8 = vpop.eup %7937  ;;  %v2383_v9 = vadd.f32 1.0, %v7936_v4  ;;  %v7702_v4 = vld [vmem:[%s9886_s2 + $0x340] sm:$0xff]  }
 0x89b   :  { %v7940_v10 = vpop.eup %7939  ;;  %v2382_v11 = vadd.f32 1.0, %v7938_v8  ;;  %v2389_v18 = vmul.f32 0.5, %v2381_v5  ;;  %v7703_v5 = vld [vmem:[%s9886_s2 + $0x308] sm:$0xff]  }
 0x89c   :  { %v7942_v45 = vpop.eup %7941  ;;  %v2384_v14 = vadd.f32 1.0, %v7940_v10  ;;  %v2391_v23 = vmul.f32 0.5, %v2383_v9 }
 0x89d   :  { %v7944_v17 = vpop.eup %7943  ;;  %v2385_v21 = vadd.f32 1.0, %v7942_v45  ;;  %v2390_v26 = vmul.f32 0.5, %v2382_v11  ;;  %v2397_v30 = vmul.f32 %v2389_v18, %v8902_v1  ;;  %v7705_v18 = vld [vmem:[%s9886_s2 + $0x310] sm:$0xff]  }
 0x89e   :  { %v7946_v22 = vpop.eup %7945  ;;  %v2387_v24 = vadd.f32 1.0, %v7944_v17  ;;  %v2392_v29 = vmul.f32 0.5, %v2384_v14  ;;  %v2399_v33 = vmul.f32 %v2391_v23, %v8904_v3  ;;  %v7708_v23 = vld [vmem:[%s9886_s2 + $0x358] sm:$0xff]  }
 0x89f   :  { %v7948_v25 = vpop.eup %7947  ;;  %v2393_v41 = vmul.f32 0.5, %v2385_v21  ;;  %v2386_v42 = vadd.f32 1.0, %v7946_v22  ;;  %v2398_v36 = vmul.f32 %v2390_v26, %v8906_v6  ;;  %v7706_v21 = vld [vmem:[%s9886_s2 + $0x350] sm:$0xff]   ;;  %v7707_v22 = vld [vmem:[%s9886_s2 + $0x318] sm:$0xff]  }
 0x8a0   :  { %v2395_v27 = vmul.f32 0.5, %v2387_v24  ;;  %v2388_v28 = vadd.f32 1.0, %v7948_v25  ;;  %v2400_v39 = vmul.f32 %v2392_v29, %v8908_v7  ;;  %v2473_v7 = vld [vmem:[%s9887_s8 + $0x6] ss:$0 sm:$0xff]  ;;  %v7713_v26 = vld [vmem:[%s9886_s2 + $0x330] sm:$0xff]   ;;  %v7716_v29 = vld [vmem:[%s9886_s2 + $0x378] sm:$0xff]  }
 0x8a1   :  { %v2401_v31 = vmul.f32 %v2393_v41, %v8914_v12  ;;  %v2394_v32 = vmul.f32 0.5, %v2386_v42  ;;  %v7709_v24 = vld [vmem:[%s9886_s2 + $0x320] sm:$0xff]   ;;  %v7711_v41 = vld [vmem:[%s9886_s2 + $0x328] sm:$0xff]  }
 0x8a2   :  { %v2403_v34 = vmul.f32 %v2395_v27, %v8916_v13  ;;  %v2396_v35 = vmul.f32 0.5, %v2388_v28  ;;  %v7710_v25 = vld [vmem:[%s9886_s2 + $0x360] sm:$0xff]   ;;  %v7712_v42 = vld [vmem:[%s9886_s2 + $0x368] sm:$0xff]   ;;  %v7714_v27 = vld [vmem:[%s9886_s2 + $0x370] sm:$0xff]  }
 0x8a3   :  { %v2402_v37 = vmul.f32 %v2394_v32, %v8922_v19  ;;  %v2405_v38 = vpack.c.bf16 %v2401_v31, %v2397_v30  ;;  %v7715_v28 = vld [vmem:[%s9886_s2 + $0x338] sm:$0xff]  }
 0x8a4   :  { %v2404_v40 = vmul.f32 %v2396_v35, %v8924_v20  ;;  %v2407_v43 = vpack.c.bf16 %v2403_v34, %v2399_v33 }
 0x8a5   :  { %v2406_v44 = vpack.c.bf16 %v2402_v37, %v2398_v36  ;;  %v2750_v37 = vld [vmem:[%s9887_s8 + $0x7] ss:$0 sm:$0xff] }
 0x8a6   :  { %v2408_v1 = vpack.c.bf16 %v2404_v40, %v2400_v39 }
 0x8a7   :  { %2698 = vmatprep.mubr.bf16.mxu0 %v2406_v44  ;;  %v2751_v44 = vld [vmem:[%s9887_s8 + $0x20] ss:$0 sm:$0xff] }
 0x8a8   :  { %2739 = vmatprep.mubr.bf16.mxu1 %v2408_v1  ;;  %2699 = vmatmul.mubr.bf16.vlgmr.msra.gmra.mrb[36].mxu0 %v2405_v38 }
 0x8a9   :  { %2740 = vmatmul.mubr.bf16.vlgmr.msra.gmra.mrb[52].mxu1 %v2407_v43  ;;  %7198 = vmatprep.mubr.msk.bf16.mxu0 %vm8022_vm0, %v8021_v2 }
 0x8aa   :  { %7218 = vmatprep.mubr.msk.bf16.mxu1 %vm8022_vm0, %v8021_v2  ;;  %7183 = vmatpush3.bf16.msra.mxu0 %v7701_v63  ;;  %v7733_v63 = vld [vmem:[%s9886_s2 + $0x400] sm:$0xff]  }
 0x8ab   :  { %7203 = vmatpush3.bf16.msra.mxu1 %v7702_v4  ;;  %7184 = vmatprep.subr.bf16.mxu0 %v8021_v2  ;;  %v7734_v4 = vld [vmem:[%s9886_s2 + $0x440] sm:$0xff]  }
 0x8ac   :  { %7204 = vmatprep.subr.bf16.mxu1 %v8021_v2 }
 0x8ae   :  { %7185 = vmatpush3.bf16.msra.mxu0 %v7703_v5  ;;  %v7735_v5 = vld [vmem:[%s9886_s2 + $0x408] sm:$0xff]  }
 0x8af   :  { %7186 = vmatprep.subr.bf16.mxu0 %v8021_v2 }
 0x8b2   :  { %7187 = vmatpush3.bf16.msra.mxu0 %v7705_v18  ;;  %v7745_v18 = vld [vmem:[%s9886_s2 + $0x430] sm:$0xff]  }
 0x8b3   :  { %7188 = vmatprep.subr.bf16.mxu0 %v8021_v2 }
 0x8b6   :  { %7189 = vmatpush3.bf16.msra.mxu0 %v7707_v22  ;;  %v7747_v22 = vld [vmem:[%s9886_s2 + $0x438] sm:$0xff]  }
 0x8b7   :  { %7190 = vmatprep.subr.bf16.mxu0 %v8021_v2 }
 0x8ba   :  { %7191 = vmatpush3.bf16.msra.mxu0 %v7709_v24  ;;  %v7749_v24 = vld [vmem:[%s9886_s2 + $0x480] sm:$0xff]  }
 0x8bb   :  { %7192 = vmatprep.subr.bf16.mxu0 %v8021_v2 }
 0x8be   :  { %7193 = vmatpush3.bf16.msra.mxu0 %v7711_v41  ;;  %v7751_v41 = vld [vmem:[%s9886_s2 + $0x488] sm:$0xff]  }
 0x8bf   :  { %7194 = vmatprep.subr.bf16.mxu0 %v8021_v2 }
 0x8c2   :  { %7195 = vmatpush3.bf16.msra.mxu0 %v7713_v26  ;;  %v7753_v26 = vld [vmem:[%s9886_s2 + $0x490] sm:$0xff]  }
 0x8c3   :  { %7196 = vmatprep.subr.bf16.mxu0 %v8021_v2 }
 0x8c6   :  { %7197 = vmatpush3.bf16.msra.mxu0 %v7715_v28  ;;  %v7755_v28 = vld [vmem:[%s9886_s2 + $0x498] sm:$0xff]  }
 0x8c7   :  { %7222 = vmatprep.subr.bf16.mxu0 %v8021_v2 }
 0x97b   :  { %v6661_v3 = vpop.f32.mrb[36].mxu0 }
 0x97c   :  { %v6683_v6 = vpop.f32.mrb[52].mxu1  ;;  %v6662_v12 = vpop.f32.mrb[37].mxu0 }
 0x97d   :  { %v6663_v13 = vadd.f32 %v6662_v12, %v6661_v3  ;;  %v6684_v19 = vpop.f32.mrb[53].mxu1  ;;  %v6664_v20 = vpop.f32.mrb[38].mxu0  ;;  %v7718_v12 = vld [vmem:[%s9886_s2 + $0x3c0] sm:$0xff]  }
 0x97e   :  { %v6685_v46 = vadd.f32 %v6684_v19, %v6683_v6  ;;  %v6686_v47 = vpop.f32.mrb[54].mxu1  ;;  %v6665_v48 = vpop.f32.mrb[39].mxu0  ;;  %v7719_v19 = vld [vmem:[%s9886_s2 + $0x388] sm:$0xff]  }
 0x97f   :  { %v2701_v49 = vadd.f32 %v6663_v13, %v2473_v7  ;;  %v6666_v50 = vadd.f32 %v6665_v48, %v6664_v20  ;;  %v6687_v51 = vpop.f32.mrb[55].mxu1  ;;  %v7720_v20 = vld [vmem:[%s9886_s2 + $0x3c8] sm:$0xff]   ;;  %v7723_v48 = vld [vmem:[%s9886_s2 + $0x398] sm:$0xff]  }
 0x980   :  { %v6688_v55 = vadd.f32 %v6687_v51, %v6686_v47  ;;  %v7722_v47 = vld [vmem:[%s9886_s2 + $0x3d0] sm:$0xff]   ;;  %v7726_v51 = vld [vmem:[%s9886_s2 + $0x3e0] sm:$0xff]  }
 0x981   :  { %v2742_v58 = vadd.f32 %v6685_v46, %v2701_v49  ;;  %v2704_v59 = vadd.f32 %v6666_v50, %v2473_v7  ;;  %v7717_v7 = vld [vmem:[%s9886_s2 + $0x380] sm:$0xff]   ;;  %v7721_v46 = vld [vmem:[%s9886_s2 + $0x390] sm:$0xff]   ;;  %v7724_v49 = vld [vmem:[%s9886_s2 + $0x3d8] sm:$0xff]  }
 0x982   :  { %v7725_v50 = vld [vmem:[%s9886_s2 + $0x3a0] sm:$0xff]  }
 0x983   :  { %v2745_v60 = vadd.f32 %v6688_v55, %v2704_v59  ;;  %v2748_v61 = vadd.f32 %v2742_v58, %v8781_v15  ;;  %v7704_v15 = vld [vmem:[%s9886_s2 + $0x348] sm:$0xff]   ;;  %v7729_v59 = vld [vmem:[%s9886_s2 + $0x3b0] sm:$0xff]  }
 0x984   :  { %7205 = vmatpush3.bf16.msra.mxu1 %v7704_v15  ;;  %v7727_v55 = vld [vmem:[%s9886_s2 + $0x3a8] sm:$0xff]  }
 0x985   :  { %2752 = vadd.xlane.f32.xlu0 %v2748_v61  ;;  %v2749_v62 = vadd.f32 %v2745_v60, %v8783_v16  ;;  %7206 = vmatprep.subr.bf16.mxu1 %v8021_v2  ;;  %v7728_v58 = vld [vmem:[%s9886_s2 + $0x3e8] sm:$0xff]   ;;  %v7730_v60 = vld [vmem:[%s9886_s2 + $0x3f0] sm:$0xff]  }
 0x986   :  { %v7736_v15 = vld [vmem:[%s9886_s2 + $0x448] sm:$0xff]  }
 0x987   :  { %2754 = vadd.xlane.f32.xlu1 %v2749_v62 }
 0x988   :  { %7207 = vmatpush3.bf16.msra.mxu1 %v7706_v21  ;;  %v7746_v21 = vld [vmem:[%s9886_s2 + $0x470] sm:$0xff]  }
 0x989   :  { %7208 = vmatprep.subr.bf16.mxu1 %v8021_v2 }
 0x98c   :  { %7209 = vmatpush3.bf16.msra.mxu1 %v7708_v23  ;;  %v7748_v23 = vld [vmem:[%s9886_s2 + $0x478] sm:$0xff]  }
 0x98d   :  { %7210 = vmatprep.subr.bf16.mxu1 %v8021_v2 }
 0x990   :  { %7211 = vmatpush3.bf16.msra.mxu1 %v7710_v25  ;;  %v7750_v25 = vld [vmem:[%s9886_s2 + $0x4c0] sm:$0xff]  }
 0x991   :  { %7212 = vmatprep.subr.bf16.mxu1 %v8021_v2 }
 0x994   :  { %7213 = vmatpush3.bf16.msra.mxu1 %v7712_v42  ;;  %v7752_v42 = vld [vmem:[%s9886_s2 + $0x4c8] sm:$0xff]  }
 0x995   :  { %7214 = vmatprep.subr.bf16.mxu1 %v8021_v2 }
 0x998   :  { %7215 = vmatpush3.bf16.msra.mxu1 %v7714_v27  ;;  %v7754_v27 = vld [vmem:[%s9886_s2 + $0x4d0] sm:$0xff]  }
 0x999   :  { %7216 = vmatprep.subr.bf16.mxu1 %v8021_v2 }
 0x99c   :  { %7217 = vmatpush3.bf16.msra.mxu1 %v7716_v29  ;;  %v7756_v29 = vld [vmem:[%s9886_s2 + $0x4d8] sm:$0xff]  }
 0x99d   :  { %7242 = vmatprep.subr.bf16.mxu1 %v8021_v2 }
 0xa12   :  { %v2753_v16 = vpop.xlane.xlu0 %2752 }
 0xa13   :  { %v2756_v8 = vmul.f32 0.0078125, %v2753_v16  ;;  %v7737_v16 = vld [vmem:[%s9886_s2 + $0x410] sm:$0xff]  }
 0xa14   :  { %v2755_v9 = vpop.xlane.xlu1 %2754 }
 0xa15   :  { %v2758_v10 = vsub.f32 %v2748_v61, %v2756_v8  ;;  %v2757_v11 = vmul.f32 0.0078125, %v2755_v9  ;;  %v7731_v61 = vld [vmem:[%s9886_s2 + $0x3b8] sm:$0xff]   ;;  %v7738_v8 = vld [vmem:[%s9886_s2 + $0x450] sm:$0xff]  }
 0xa16   :  { %v7739_v9 = vld [vmem:[%s9886_s2 + $0x418] sm:$0xff]  }
 0xa17   :  { %v2759_v45 = vsub.f32 %v2749_v62, %v2757_v11  ;;  %v2760_v14 = vmul.f32 %v2758_v10, %v2758_v10  ;;  %v7732_v62 = vld [vmem:[%s9886_s2 + $0x3f8] sm:$0xff]   ;;  %v7741_v11 = vld [vmem:[%s9886_s2 + $0x420] sm:$0xff]  }
 0xa19   :  { %2762 = vadd.xlane.f32.xlu0 %v2760_v14  ;;  %v2761_v17 = vmul.f32 %v2759_v45, %v2759_v45  ;;  %v7743_v14 = vld [vmem:[%s9886_s2 + $0x428] sm:$0xff]  }
 0xa1b   :  { %2764 = vadd.xlane.f32.xlu1 %v2761_v17  ;;  %v7744_v17 = vld [vmem:[%s9886_s2 + $0x468] sm:$0xff]  }
 0xaa6   :  { %v2763_v30 = vpop.xlane.xlu0 %2762 }
 0xaa7   :  { %v2766_v31 = vmul.f32 0.0078125, %v2763_v30  ;;  %v7757_v30 = vld [vmem:[%s9886_s2 + $0x4a0] sm:$0xff]  }
 0xaa8   :  { %v2765_v32 = vpop.xlane.xlu1 %2764 }
 0xaa9   :  { %v2768_v33 = vadd.f32 1e-05, %v2766_v31  ;;  %v2767_v34 = vmul.f32 0.0078125, %v2765_v32  ;;  %v7758_v31 = vld [vmem:[%s9886_s2 + $0x4e0] sm:$0xff]   ;;  %v7759_v32 = vld [vmem:[%s9886_s2 + $0x4a8] sm:$0xff]  }
 0xaab   :  { %7949 = vrsqrt.f32 %v2768_v33  ;;  %v2769_v35 = vadd.f32 1e-05, %v2767_v34  ;;  %v7760_v33 = vld [vmem:[%s9886_s2 + $0x4e8] sm:$0xff]   ;;  %v7761_v34 = vld [vmem:[%s9886_s2 + $0x4b0] sm:$0xff]  }
 0xaad   :  { %7951 = vrsqrt.f32 %v2769_v35  ;;  %v7762_v35 = vld [vmem:[%s9886_s2 + $0x4f0] sm:$0xff]  }
 0xab5   :  { %v7950_v36 = vpop.eup %7949 }
 0xab6   :  { %v2772_v38 = vmul.f32 %v7950_v36, %v2758_v10  ;;  %v7740_v10 = vld [vmem:[%s9886_s2 + $0x458] sm:$0xff]  }
 0xab7   :  { %v7952_v39 = vpop.eup %7951  ;;  %v7763_v36 = vld [vmem:[%s9886_s2 + $0x4b8] sm:$0xff]  }
 0xab8   :  { %v2774_v40 = vmul.f32 %v2772_v38, %v2750_v37  ;;  %v2773_v43 = vmul.f32 %v7952_v39, %v2759_v45  ;;  %v7742_v45 = vld [vmem:[%s9886_s2 + $0x460] sm:$0xff]  }
 0xab9   :  { %v7765_v38 = vld [vmem:[%s9886_s2 + $0x500] sm:$0xff]  }
 0xaba   :  { %v2775_v1 = vmul.f32 %v2773_v43, %v2750_v37  ;;  %v9037_v3 = vadd.f32 %v2774_v40, %v2751_v44  ;;  %v7764_v37 = vld [vmem:[%s9886_s2 + $0x4f8] sm:$0xff]   ;;  %v7766_v39 = vld [vmem:[%s9886_s2 + $0x540] sm:$0xff]   ;;  %v7767_v40 = vld [vmem:[%s9886_s2 + $0x508] sm:$0xff]  }
 0xabb   :  { %v7768_v43 = vld [vmem:[%s9886_s2 + $0x548] sm:$0xff]  }
 0xabc   :  { %v9039_v6 = vadd.f32 %v2775_v1, %v2751_v44  ;;  %v7769_v44 = vld [vmem:[%s9886_s2 + $0x510] sm:$0xff]  }
 0xabd   :  { %v7770_v1 = vld [vmem:[%s9886_s2 + $0x550] sm:$0xff]  }
 0xabe   :  { %v9049_v13 = vpack.c.bf16 %v9039_v6, %v9037_v3 }
 0xac0   :  { %7199 = vmatmul.mubr.bf16.vlgmr.msra.gmra.mrb[40].mxu0 %v9049_v13  ;;  %7219 = vmatmul.mubr.bf16.vlgmr.msra.gmra.mrb[56].mxu1 %v9049_v13 }
 0xac1   :  { %7223 = vmatpush3.bf16.msra.mxu0 %v7717_v7  ;;  %7243 = vmatpush3.bf16.msra.mxu1 %v7718_v12  ;;  %v7771_v7 = vld [vmem:[%s9886_s2 + $0x518] sm:$0xff]  }
 0xac2   :  { %7224 = vmatprep.subr.bf16.mxu0 %v8021_v2  ;;  %7244 = vmatprep.subr.bf16.mxu1 %v8021_v2  ;;  %v7772_v12 = vld [vmem:[%s9886_s2 + $0x558] sm:$0xff]  }
 0xac3   :  { %7238 = vmatprep.mubr.msk.bf16.mxu0 %vm8022_vm0, %v8021_v2  ;;  %7258 = vmatprep.mubr.msk.bf16.mxu1 %vm8022_vm0, %v8021_v2 }
 0xac5   :  { %7225 = vmatpush3.bf16.msra.mxu0 %v7719_v19  ;;  %7245 = vmatpush3.bf16.msra.mxu1 %v7720_v20  ;;  %v7773_v19 = vld [vmem:[%s9886_s2 + $0x520] sm:$0xff]  }
 0xac6   :  { %7226 = vmatprep.subr.bf16.mxu0 %v8021_v2  ;;  %7246 = vmatprep.subr.bf16.mxu1 %v8021_v2  ;;  %v7774_v20 = vld [vmem:[%s9886_s2 + $0x560] sm:$0xff]  }
 0xac9   :  { %7227 = vmatpush3.bf16.msra.mxu0 %v7721_v46  ;;  %7247 = vmatpush3.bf16.msra.mxu1 %v7722_v47  ;;  %v7775_v46 = vld [vmem:[%s9886_s2 + $0x528] sm:$0xff]  }
 0xaca   :  { %7228 = vmatprep.subr.bf16.mxu0 %v8021_v2  ;;  %7248 = vmatprep.subr.bf16.mxu1 %v8021_v2  ;;  %v7776_v47 = vld [vmem:[%s9886_s2 + $0x568] sm:$0xff]  }
 0xacd   :  { %7229 = vmatpush3.bf16.msra.mxu0 %v7723_v48  ;;  %7249 = vmatpush3.bf16.msra.mxu1 %v7724_v49  ;;  %v7777_v48 = vld [vmem:[%s9886_s2 + $0x530] sm:$0xff]  }
 0xace   :  { %7230 = vmatprep.subr.bf16.mxu0 %v8021_v2  ;;  %7250 = vmatprep.subr.bf16.mxu1 %v8021_v2  ;;  %v7778_v49 = vld [vmem:[%s9886_s2 + $0x570] sm:$0xff]  }
 0xad1   :  { %7231 = vmatpush3.bf16.msra.mxu0 %v7725_v50  ;;  %7251 = vmatpush3.bf16.msra.mxu1 %v7726_v51  ;;  %v7779_v50 = vld [vmem:[%s9886_s2 + $0x538] sm:$0xff]  }
 0xad2   :  { %7232 = vmatprep.subr.bf16.mxu0 %v8021_v2  ;;  %7252 = vmatprep.subr.bf16.mxu1 %v8021_v2  ;;  %v7780_v51 = vld [vmem:[%s9886_s2 + $0x578] sm:$0xff]  }
 0xad5   :  { %7233 = vmatpush3.bf16.msra.mxu0 %v7727_v55  ;;  %7253 = vmatpush3.bf16.msra.mxu1 %v7728_v58  ;;  %v7781_v55 = vld [vmem:[%s9886_s2 + $0x580] sm:$0xff]  }
 0xad6   :  { %7234 = vmatprep.subr.bf16.mxu0 %v8021_v2  ;;  %7254 = vmatprep.subr.bf16.mxu1 %v8021_v2  ;;  %v7782_v58 = vld [vmem:[%s9886_s2 + $0x5c0] sm:$0xff]  }
 0xad9   :  { %7235 = vmatpush3.bf16.msra.mxu0 %v7729_v59  ;;  %7255 = vmatpush3.bf16.msra.mxu1 %v7730_v60  ;;  %v7783_v59 = vld [vmem:[%s9886_s2 + $0x588] sm:$0xff]  }
 0xada   :  { %7236 = vmatprep.subr.bf16.mxu0 %v8021_v2  ;;  %7256 = vmatprep.subr.bf16.mxu1 %v8021_v2  ;;  %v7784_v60 = vld [vmem:[%s9886_s2 + $0x5c8] sm:$0xff]  }
 0xadd   :  { %7237 = vmatpush3.bf16.msra.mxu0 %v7731_v61  ;;  %7257 = vmatpush3.bf16.msra.mxu1 %v7732_v62  ;;  %v7785_v61 = vld [vmem:[%s9886_s2 + $0x590] sm:$0xff]  }
 0xade   :  { %7262 = vmatprep.subr.bf16.mxu0 %v8021_v2  ;;  %7282 = vmatprep.subr.bf16.mxu1 %v8021_v2  ;;  %v7786_v62 = vld [vmem:[%s9886_s2 + $0x5d0] sm:$0xff]  }
 0xae0   :  { %7239 = vmatmul.mubr.bf16.vlgmr.msra.gmra.mrb[44].mxu0 %v9049_v13  ;;  %7259 = vmatmul.mubr.bf16.vlgmr.msra.gmra.mrb[60].mxu1 %v9049_v13 }
 0xae1   :  { %7263 = vmatpush3.bf16.msra.mxu0 %v7733_v63  ;;  %7283 = vmatpush3.bf16.msra.mxu1 %v7734_v4  ;;  %v7787_v63 = vld [vmem:[%s9886_s2 + $0x598] sm:$0xff]  }
 0xae2   :  { %7264 = vmatprep.subr.bf16.mxu0 %v8021_v2  ;;  %7284 = vmatprep.subr.bf16.mxu1 %v8021_v2  ;;  %v7788_v4 = vld [vmem:[%s9886_s2 + $0x5d8] sm:$0xff]  }
 0xae3   :  { %7278 = vmatprep.mubr.msk.bf16.mxu0 %vm8022_vm0, %v8021_v2  ;;  %7298 = vmatprep.mubr.msk.bf16.mxu1 %vm8022_vm0, %v8021_v2 }
 0xae5   :  { %7265 = vmatpush3.bf16.msra.mxu0 %v7735_v5  ;;  %7285 = vmatpush3.bf16.msra.mxu1 %v7736_v15  ;;  %v7789_v5 = vld [vmem:[%s9886_s2 + $0x5a0] sm:$0xff]  }
 0xae6   :  { %7266 = vmatprep.subr.bf16.mxu0 %v8021_v2  ;;  %7286 = vmatprep.subr.bf16.mxu1 %v8021_v2  ;;  %v7790_v15 = vld [vmem:[%s9886_s2 + $0x5e0] sm:$0xff]  }
 0xae9   :  { %7267 = vmatpush3.bf16.msra.mxu0 %v7737_v16  ;;  %7287 = vmatpush3.bf16.msra.mxu1 %v7738_v8  ;;  %v7791_v16 = vld [vmem:[%s9886_s2 + $0x5a8] sm:$0xff]  }
 0xaea   :  { %7268 = vmatprep.subr.bf16.mxu0 %v8021_v2  ;;  %7288 = vmatprep.subr.bf16.mxu1 %v8021_v2  ;;  %v7792_v8 = vld [vmem:[%s9886_s2 + $0x5e8] sm:$0xff]  }
 0xaed   :  { %7269 = vmatpush3.bf16.msra.mxu0 %v7739_v9  ;;  %7289 = vmatpush3.bf16.msra.mxu1 %v7740_v10  ;;  %v7793_v9 = vld [vmem:[%s9886_s2 + $0x5b0] sm:$0xff]  }
 0xaee   :  { %7270 = vmatprep.subr.bf16.mxu0 %v8021_v2  ;;  %7290 = vmatprep.subr.bf16.mxu1 %v8021_v2  ;;  %v7794_v10 = vld [vmem:[%s9886_s2 + $0x5f0] sm:$0xff]  }
 0xaf1   :  { %7271 = vmatpush3.bf16.msra.mxu0 %v7741_v11  ;;  %7291 = vmatpush3.bf16.msra.mxu1 %v7742_v45  ;;  %v7795_v11 = vld [vmem:[%s9886_s2 + $0x5b8] sm:$0xff]  }
 0xaf2   :  { %7272 = vmatprep.subr.bf16.mxu0 %v8021_v2  ;;  %7292 = vmatprep.subr.bf16.mxu1 %v8021_v2  ;;  %v7796_v45 = vld [vmem:[%s9886_s2 + $0x5f8] sm:$0xff]  }
 0xaf5   :  { %7273 = vmatpush3.bf16.msra.mxu0 %v7743_v14  ;;  %7293 = vmatpush3.bf16.msra.mxu1 %v7744_v17  ;;  %v6009_v14 = vld [vmem:[%s9888_s3 + $0xc] ss:$0 sm:$0xff]  ;;  %v6035_v17 = vld [vmem:[%s9888_s3 + $0xd] ss:$0 sm:$0xff] }
 0xaf6   :  { %7274 = vmatprep.subr.bf16.mxu0 %v8021_v2  ;;  %7294 = vmatprep.subr.bf16.mxu1 %v8021_v2 }
 0xaf9   :  { %7275 = vmatpush3.bf16.msra.mxu0 %v7745_v18  ;;  %7295 = vmatpush3.bf16.msra.mxu1 %v7746_v21 }
 0xafa   :  { %7276 = vmatprep.subr.bf16.mxu0 %v8021_v2  ;;  %7296 = vmatprep.subr.bf16.mxu1 %v8021_v2 }
 0xafd   :  { %7277 = vmatpush3.bf16.msra.mxu0 %v7747_v22  ;;  %7297 = vmatpush3.bf16.msra.mxu1 %v7748_v23 }
 0xafe   :  { %7302 = vmatprep.subr.bf16.mxu0 %v8021_v2  ;;  %7322 = vmatprep.subr.bf16.mxu1 %v8021_v2 }
 0xb00   :  { %7279 = vmatmul.mubr.bf16.vlgmr.msra.gmra.mrb[48].mxu0 %v9049_v13  ;;  %7299 = vmatmul.mubr.bf16.vlgmr.msra.gmra.mrb[64].mxu1 %v9049_v13 }
 0xb01   :  { %7303 = vmatpush3.bf16.msra.mxu0 %v7749_v24  ;;  %7323 = vmatpush3.bf16.msra.mxu1 %v7750_v25 }
 0xb02   :  { %7304 = vmatprep.subr.bf16.mxu0 %v8021_v2  ;;  %7324 = vmatprep.subr.bf16.mxu1 %v8021_v2 }
 0xb03   :  { %7318 = vmatprep.mubr.msk.bf16.mxu0 %vm8022_vm0, %v8021_v2  ;;  %7338 = vmatprep.mubr.msk.bf16.mxu1 %vm8022_vm0, %v8021_v2 }
 0xb05   :  { %7305 = vmatpush3.bf16.msra.mxu0 %v7751_v41  ;;  %7325 = vmatpush3.bf16.msra.mxu1 %v7752_v42 }
 0xb06   :  { %7306 = vmatprep.subr.bf16.mxu0 %v8021_v2  ;;  %7326 = vmatprep.subr.bf16.mxu1 %v8021_v2 }
 0xb09   :  { %7307 = vmatpush3.bf16.msra.mxu0 %v7753_v26  ;;  %7327 = vmatpush3.bf16.msra.mxu1 %v7754_v27 }
 0xb0a   :  { %7308 = vmatprep.subr.bf16.mxu0 %v8021_v2  ;;  %7328 = vmatprep.subr.bf16.mxu1 %v8021_v2 }
 0xb0d   :  { %7309 = vmatpush3.bf16.msra.mxu0 %v7755_v28  ;;  %7329 = vmatpush3.bf16.msra.mxu1 %v7756_v29 }
 0xb0e   :  { %7310 = vmatprep.subr.bf16.mxu0 %v8021_v2  ;;  %7330 = vmatprep.subr.bf16.mxu1 %v8021_v2 }
 0xb11   :  { %7311 = vmatpush3.bf16.msra.mxu0 %v7757_v30  ;;  %7331 = vmatpush3.bf16.msra.mxu1 %v7758_v31 }
 0xb12   :  { %7312 = vmatprep.subr.bf16.mxu0 %v8021_v2  ;;  %7332 = vmatprep.subr.bf16.mxu1 %v8021_v2 }
 0xb15   :  { %7313 = vmatpush3.bf16.msra.mxu0 %v7759_v32  ;;  %7333 = vmatpush3.bf16.msra.mxu1 %v7760_v33 }
 0xb16   :  { %7314 = vmatprep.subr.bf16.mxu0 %v8021_v2  ;;  %7334 = vmatprep.subr.bf16.mxu1 %v8021_v2 }
 0xb19   :  { %7315 = vmatpush3.bf16.msra.mxu0 %v7761_v34  ;;  %7335 = vmatpush3.bf16.msra.mxu1 %v7762_v35 }
 0xb1a   :  { %7316 = vmatprep.subr.bf16.mxu0 %v8021_v2  ;;  %7336 = vmatprep.subr.bf16.mxu1 %v8021_v2 }
 0xb1d   :  { %7317 = vmatpush3.bf16.msra.mxu0 %v7763_v36  ;;  %7337 = vmatpush3.bf16.msra.mxu1 %v7764_v37  ;;  %v6061_v36 = vld [vmem:[%s9888_s3 + $0xe] ss:$0 sm:$0xff]  ;;  %v6087_v37 = vld [vmem:[%s9888_s3 + $0xf] ss:$0 sm:$0xff] }
 0xb1e   :  { %7342 = vmatprep.subr.bf16.mxu0 %v8021_v2  ;;  %7362 = vmatprep.subr.bf16.mxu1 %v8021_v2 }
 0xb20   :  { %7319 = vmatmul.mubr.bf16.vlgmr.msra.gmra.mrb[52].mxu0 %v9049_v13  ;;  %7339 = vmatmul.mubr.bf16.vlgmr.msra.gmra.mrb[68].mxu1 %v9049_v13 }
 0xb21   :  { %7343 = vmatpush3.bf16.msra.mxu0 %v7765_v38  ;;  %7363 = vmatpush3.bf16.msra.mxu1 %v7766_v39 }
 0xb22   :  { %7344 = vmatprep.subr.bf16.mxu0 %v8021_v2  ;;  %7364 = vmatprep.subr.bf16.mxu1 %v8021_v2 }
 0xb23   :  { %7358 = vmatprep.mubr.msk.bf16.mxu0 %vm8022_vm0, %v8021_v2  ;;  %7378 = vmatprep.mubr.msk.bf16.mxu1 %vm8022_vm0, %v8021_v2 }
 0xb25   :  { %7345 = vmatpush3.bf16.msra.mxu0 %v7767_v40  ;;  %7365 = vmatpush3.bf16.msra.mxu1 %v7768_v43 }
 0xb26   :  { %7346 = vmatprep.subr.bf16.mxu0 %v8021_v2  ;;  %7366 = vmatprep.subr.bf16.mxu1 %v8021_v2 }
 0xb29   :  { %7347 = vmatpush3.bf16.msra.mxu0 %v7769_v44  ;;  %7367 = vmatpush3.bf16.msra.mxu1 %v7770_v1 }
 0xb2a   :  { %7348 = vmatprep.subr.bf16.mxu0 %v8021_v2  ;;  %7368 = vmatprep.subr.bf16.mxu1 %v8021_v2 }
 0xb2d   :  { %7349 = vmatpush3.bf16.msra.mxu0 %v7771_v7  ;;  %7369 = vmatpush3.bf16.msra.mxu1 %v7772_v12 }
 0xb2e   :  { %7350 = vmatprep.subr.bf16.mxu0 %v8021_v2  ;;  %7370 = vmatprep.subr.bf16.mxu1 %v8021_v2 }
 0xb31   :  { %7351 = vmatpush3.bf16.msra.mxu0 %v7773_v19  ;;  %7371 = vmatpush3.bf16.msra.mxu1 %v7774_v20 }
 0xb32   :  { %7352 = vmatprep.subr.bf16.mxu0 %v8021_v2  ;;  %7372 = vmatprep.subr.bf16.mxu1 %v8021_v2 }
 0xb35   :  { %7353 = vmatpush3.bf16.msra.mxu0 %v7775_v46  ;;  %7373 = vmatpush3.bf16.msra.mxu1 %v7776_v47 }
 0xb36   :  { %7354 = vmatprep.subr.bf16.mxu0 %v8021_v2  ;;  %7374 = vmatprep.subr.bf16.mxu1 %v8021_v2 }
 0xb39   :  { %7355 = vmatpush3.bf16.msra.mxu0 %v7777_v48  ;;  %7375 = vmatpush3.bf16.msra.mxu1 %v7778_v49 }
 0xb3a   :  { %7356 = vmatprep.subr.bf16.mxu0 %v8021_v2  ;;  %7376 = vmatprep.subr.bf16.mxu1 %v8021_v2 }
 0xb3d   :  { %7357 = vmatpush3.bf16.msra.mxu0 %v7779_v50  ;;  %7377 = vmatpush3.bf16.msra.mxu1 %v7780_v51 }
 0xb3e   :  { %7382 = vmatprep.subr.bf16.mxu0 %v8021_v2  ;;  %7402 = vmatprep.subr.bf16.mxu1 %v8021_v2 }
 0xb40   :  { %7359 = vmatmul.mubr.bf16.vlgmr.msra.gmra.mrb[56].mxu0 %v9049_v13  ;;  %7379 = vmatmul.mubr.bf16.vlgmr.msra.gmra.mrb[72].mxu1 %v9049_v13 }
 0xb41   :  { %7383 = vmatpush3.bf16.msra.mxu0 %v7781_v55  ;;  %7403 = vmatpush3.bf16.msra.mxu1 %v7782_v58 }
 0xb42   :  { %7384 = vmatprep.subr.bf16.mxu0 %v8021_v2  ;;  %7404 = vmatprep.subr.bf16.mxu1 %v8021_v2 }
 0xb43   :  { %7398 = vmatprep.mubr.msk.bf16.mxu0 %vm8022_vm0, %v8021_v2  ;;  %7418 = vmatprep.mubr.msk.bf16.mxu1 %vm8022_vm0, %v8021_v2 }
 0xb45   :  { %7385 = vmatpush3.bf16.msra.mxu0 %v7783_v59  ;;  %7405 = vmatpush3.bf16.msra.mxu1 %v7784_v60  ;;  %v6113_v59 = vld [vmem:[%s9888_s3 + $0x10] ss:$0 sm:$0xff] }
 0xb46   :  { %7386 = vmatprep.subr.bf16.mxu0 %v8021_v2  ;;  %7406 = vmatprep.subr.bf16.mxu1 %v8021_v2 }
 0xb49   :  { %7387 = vmatpush3.bf16.msra.mxu0 %v7785_v61  ;;  %7407 = vmatpush3.bf16.msra.mxu1 %v7786_v62  ;;  %v6139_v61 = vld [vmem:[%s9888_s3 + $0x11] ss:$0 sm:$0xff] }
 0xb4a   :  { %7388 = vmatprep.subr.bf16.mxu0 %v8021_v2  ;;  %7408 = vmatprep.subr.bf16.mxu1 %v8021_v2 }
 0xb4d   :  { %7389 = vmatpush3.bf16.msra.mxu0 %v7787_v63  ;;  %7409 = vmatpush3.bf16.msra.mxu1 %v7788_v4 }
 0xb4e   :  { %7390 = vmatprep.subr.bf16.mxu0 %v8021_v2  ;;  %7410 = vmatprep.subr.bf16.mxu1 %v8021_v2 }
 0xb51   :  { %7391 = vmatpush3.bf16.msra.mxu0 %v7789_v5  ;;  %7411 = vmatpush3.bf16.msra.mxu1 %v7790_v15 }
 0xb52   :  { %7392 = vmatprep.subr.bf16.mxu0 %v8021_v2  ;;  %7412 = vmatprep.subr.bf16.mxu1 %v8021_v2 }
 0xb55   :  { %7393 = vmatpush3.bf16.msra.mxu0 %v7791_v16  ;;  %7413 = vmatpush3.bf16.msra.mxu1 %v7792_v8 }
 0xb56   :  { %7394 = vmatprep.subr.bf16.mxu0 %v8021_v2  ;;  %7414 = vmatprep.subr.bf16.mxu1 %v8021_v2 }
 0xb59   :  { %7395 = vmatpush3.bf16.msra.mxu0 %v7793_v9  ;;  %7415 = vmatpush3.bf16.msra.mxu1 %v7794_v10 }
 0xb5a   :  { %7396 = vmatprep.subr.bf16.mxu0 %v8021_v2  ;;  %7416 = vmatprep.subr.bf16.mxu1 %v8021_v2 }
 0xb5d   :  { %7397 = vmatpush3.bf16.msra.mxu0 %v7795_v11  ;;  %7417 = vmatpush3.bf16.msra.mxu1 %v7796_v45 }
 0xb60   :  { %7399 = vmatmul.mubr.bf16.vlgmr.msra.gmra.mrb[60].mxu0 %v9049_v13  ;;  %7419 = vmatmul.mubr.bf16.vlgmr.msra.gmra.mrb[76].mxu1 %v9049_v13 }
 0xb93   :  { %v2886_v18 = vpop.f32.mrb[40].mxu0  ;;  %v3004_v21 = vpop.f32.mrb[56].mxu1 }
 0xb94   :  { %v2887_v22 = vadd.f32 %v6009_v14, %v2886_v18  ;;  %v3005_v23 = vadd.f32 %v6035_v17, %v3004_v21  ;;  %v7200_v24 = vpop.f32.mrb[41].mxu0  ;;  %v7220_v25 = vpop.f32.mrb[57].mxu1 }
 0xb95   :  { %v2889_v41 = vpop.f32.mrb[42].mxu0  ;;  %v3007_v42 = vpop.f32.mrb[58].mxu1  ;;  %v6165_v24 = vld [vmem:[%s9888_s3 + $0x12] ss:$0 sm:$0xff] }
 0xb96   :  { %v2890_v26 = vadd.f32 %v6009_v14, %v2889_v41  ;;  %v3008_v27 = vadd.f32 %v6035_v17, %v3007_v42  ;;  %v7201_v28 = vpop.f32.mrb[43].mxu0  ;;  %v7221_v13 = vpop.f32.mrb[59].mxu1  ;;  %v2893_v29 = vmul.f32 0.17677669, %v2887_v22  ;;  %v3011_v30 = vmul.f32 0.17677669, %v3005_v23 }
 0xb97   :  { %v6191_v41 = vld [vmem:[%s9888_s3 + $0x13] ss:$0 sm:$0xff] }
 0xb98   :  { %v2894_v31 = vmul.f32 0.17677669, %v2890_v26  ;;  %v3012_v32 = vmul.f32 0.17677669, %v3008_v27 }
 0xb9a   :  { %v2895_v33 = vpack.c.bf16 %v2894_v31, %v2893_v29  ;;  %v3013_v34 = vpack.c.bf16 %v3012_v32, %v3011_v30 }
 0xb9c   :  { %2896 = vst.msk [vmem:[#allocation2] sm:$0xff] %vm188_vm1, %v2895_v33  ;;  %3014 = vst.msk [vmem:[#allocation2 + $0x8] sm:$0xff] %vm188_vm1, %v3013_v34 }
 0xba3   :  { %v4179_v35 = vld [vmem:[#allocation2] sm:$0xff] }
 0xba4   :  { %7430 = vmatprep.mubr.msk.bf16.mxu0 %vm188_vm1, %v4179_v35 }
 0xbb3   :  { %v3122_v38 = vpop.f32.mrb[44].mxu0  ;;  %v3240_v39 = vpop.f32.mrb[60].mxu1 }
 0xbb4   :  { %v3123_v40 = vadd.f32 %v6061_v36, %v3122_v38  ;;  %v3241_v43 = vadd.f32 %v6087_v37, %v3240_v39  ;;  %v7240_v44 = vpop.f32.mrb[45].mxu0  ;;  %v7260_v1 = vpop.f32.mrb[61].mxu1 }
 0xbb5   :  { %v3125_v7 = vpop.f32.mrb[46].mxu0  ;;  %v3243_v12 = vpop.f32.mrb[62].mxu1  ;;  %v6217_v1 = vld [vmem:[%s9888_s3 + $0x14] ss:$0 sm:$0xff] }
 0xbb6   :  { %v3126_v19 = vadd.f32 %v6061_v36, %v3125_v7  ;;  %v3244_v20 = vadd.f32 %v6087_v37, %v3243_v12  ;;  %v7241_v46 = vpop.f32.mrb[47].mxu0  ;;  %v7261_v47 = vpop.f32.mrb[63].mxu1  ;;  %v3129_v48 = vmul.f32 0.17677669, %v3123_v40  ;;  %v3247_v49 = vmul.f32 0.17677669, %v3241_v43 }
 0xbb7   :  { %v4180_v43 = vld [vmem:[#allocation2 + $0x8] sm:$0xff]  ;;  %v6243_v12 = vld [vmem:[%s9888_s3 + $0x15] ss:$0 sm:$0xff] }
 0xbb8   :  { %v3130_v50 = vmul.f32 0.17677669, %v3126_v19  ;;  %v3248_v51 = vmul.f32 0.17677669, %v3244_v20 }
 0xbba   :  { %v3131_v55 = vpack.c.bf16 %v3130_v50, %v3129_v48  ;;  %v3249_v58 = vpack.c.bf16 %v3248_v51, %v3247_v49 }
 0xbbc   :  { %3132 = vst.msk [vmem:[#allocation2 + $0x10] sm:$0xff] %vm188_vm1, %v3131_v55  ;;  %3250 = vst.msk [vmem:[#allocation2 + $0x18] sm:$0xff] %vm188_vm1, %v3249_v58 }
 0xbc3   :  { %v4181_v44 = vld [vmem:[#allocation2 + $0x10] sm:$0xff] }
 0xbd3   :  { %v3358_v60 = vpop.f32.mrb[48].mxu0  ;;  %v3474_v62 = vpop.f32.mrb[64].mxu1 }
 0xbd4   :  { %v7280_v63 = vpop.f32.mrb[49].mxu0  ;;  %v7300_v4 = vpop.f32.mrb[65].mxu1  ;;  %v3359_v16 = vadd.f32 %v6113_v59, %v3358_v60  ;;  %v3475_v8 = vadd.f32 %v6139_v61, %v3474_v62  ;;  %v4182_v62 = vld [vmem:[#allocation2 + $0x18] sm:$0xff] }
 0xbd5   :  { %v3361_v5 = vpop.f32.mrb[50].mxu0  ;;  %v3477_v15 = vpop.f32.mrb[66].mxu1 }
 0xbd6   :  { %v3362_v9 = vadd.f32 %v6113_v59, %v3361_v5  ;;  %v3478_v10 = vadd.f32 %v6139_v61, %v3477_v15  ;;  %v7281_v11 = vpop.f32.mrb[51].mxu0  ;;  %v7301_v45 = vpop.f32.mrb[67].mxu1  ;;  %v6269_v5 = vld [vmem:[%s9888_s3 + $0x16] ss:$0 sm:$0xff] }
 0xbd8   :  { %v3365_v14 = vpack.c.bf16 %v3362_v9, %v3359_v16  ;;  %v3481_v17 = vpack.c.bf16 %v3478_v10, %v3475_v8  ;;  %v6295_v16 = vld [vmem:[%s9888_s3 + $0x17] ss:$0 sm:$0xff] }
 0xbda   :  { %3366 = vst.msk [vmem:[#allocation2 + $0x20] sm:$0xff] %vm188_vm1, %v3365_v14  ;;  %3482 = vst.msk [vmem:[#allocation2 + $0x28] sm:$0xff] %vm188_vm1, %v3481_v17 }
 0xbe1   :  { %v4183_v18 = vld [vmem:[#allocation2 + $0x20] sm:$0xff]  ;;  %v4184_v22 = vld [vmem:[#allocation2 + $0x28] sm:$0xff] }
 0xbe2   :  { %7510 = vmatprep.subr.msk.bf16.mxu0 %vm188_vm1, %v4183_v18  ;;  %v4204_v21 = vsel %vm188_vm1, %v4183_v18, 0  ;;  %v4207_v23 = vsel %vm188_vm1, %v4184_v22, 0 }
 0xbe3   :  { %7423 = vmatpush3.bf16.xpose.msra.mxu0 %v4204_v21 }
 0xbe4   :  { %7511 = vmatprep.subr.msk.bf16.mxu0 %vm188_vm1, %v4184_v22 }
 0xbeb   :  { %7425 = vmatpush3.bf16.xpose.msra.mxu0 %v4207_v23 }
 0xbf3   :  { %v3590_v25 = vpop.f32.mrb[52].mxu0  ;;  %v3706_v42 = vpop.f32.mrb[68].mxu1 }
 0xbf4   :  { %v7320_v26 = vpop.f32.mrb[53].mxu0  ;;  %v7340_v27 = vpop.f32.mrb[69].mxu1  ;;  %v3591_v29 = vadd.f32 %v6165_v24, %v3590_v25  ;;  %v3707_v30 = vadd.f32 %v6191_v41, %v3706_v42 }
 0xbf5   :  { %v3593_v28 = vpop.f32.mrb[54].mxu0  ;;  %v3709_v13 = vpop.f32.mrb[70].mxu1 }
 0xbf6   :  { %v3594_v31 = vadd.f32 %v6165_v24, %v3593_v28  ;;  %v3710_v32 = vadd.f32 %v6191_v41, %v3709_v13  ;;  %v7321_v33 = vpop.f32.mrb[55].mxu0  ;;  %v7341_v34 = vpop.f32.mrb[71].mxu1  ;;  %v8013_v28 = vld [vmem:[%s9889_s1] sm:$0xff] }
 0xbf7   :  { %v8015_v33 = vld [vmem:[%s9889_s1 + $0x8] sm:$0xff] }
 0xbf8   :  { %v3597_v35 = vpack.c.bf16 %v3594_v31, %v3591_v29  ;;  %v3713_v36 = vpack.c.bf16 %v3710_v32, %v3707_v30  ;;  %v8014_v31 = vld [vmem:[%s9889_s1 + $0x10] sm:$0xff] }
 0xbfa   :  { %3598 = vst.msk [vmem:[#allocation2 + $0x30] sm:$0xff] %vm188_vm1, %v3597_v35  ;;  %3714 = vst.msk [vmem:[#allocation2 + $0x38] sm:$0xff] %vm188_vm1, %v3713_v36  ;;  %v8016_v36 = vld [vmem:[%s9889_s1 + $0x18] sm:$0xff] }
 0xc01   :  { %v4185_v37 = vld [vmem:[#allocation2 + $0x30] sm:$0xff]  ;;  %v4186_v39 = vld [vmem:[#allocation2 + $0x38] sm:$0xff] }
 0xc02   :  { %7512 = vmatprep.subr.msk.bf16.mxu0 %vm188_vm1, %v4185_v37  ;;  %v4210_v38 = vsel %vm188_vm1, %v4185_v37, 0  ;;  %v4213_v40 = vsel %vm188_vm1, %v4186_v39, 0 }
 0xc03   :  { %7427 = vmatpush3.bf16.xpose.msra.mxu0 %v4210_v38 }
 0xc04   :  { %7513 = vmatprep.subr.msk.bf16.mxu0 %vm188_vm1, %v4186_v39 }
 0xc0b   :  { %7429 = vmatpush3.bf16.xpose.msra.mxu0 %v4213_v40 }
 0xc0c   :  { %7470 = vmatprep.subr.bf16.mxu0 %v8021_v2 }
 0xc12   :  { %7431 = vmatmul.mubr.msk.bf16.vlgmr.msra.gmra.mrb[64].mxu0 %vm188_vm1, %v4180_v43 }
 0xc13   :  { %v3822_v7 = vpop.f32.mrb[56].mxu0  ;;  %v3938_v19 = vpop.f32.mrb[72].mxu1  ;;  %7434 = vmatprep.mubr.msk.bf16.mxu0 %vm188_vm1, %v4181_v44  ;;  %v8017_v44 = vld [vmem:[%s9889_s1 + $0x20] sm:$0xff] }
 0xc14   :  { %v7360_v20 = vpop.f32.mrb[57].mxu0  ;;  %v7380_v46 = vpop.f32.mrb[73].mxu1  ;;  %v3823_v49 = vadd.f32 %v6217_v1, %v3822_v7  ;;  %v3939_v50 = vadd.f32 %v6243_v12, %v3938_v19 }
 0xc15   :  { %v3825_v47 = vpop.f32.mrb[58].mxu0  ;;  %v3941_v48 = vpop.f32.mrb[74].mxu1  ;;  %v8018_v20 = vld [vmem:[%s9889_s1 + $0x30] sm:$0xff] }
 0xc16   :  { %v3826_v51 = vadd.f32 %v6217_v1, %v3825_v47  ;;  %v3942_v55 = vadd.f32 %v6243_v12, %v3941_v48  ;;  %v7361_v58 = vpop.f32.mrb[59].mxu0  ;;  %v7381_v59 = vpop.f32.mrb[75].mxu1  ;;  %v8019_v47 = vld [vmem:[%s9889_s1 + $0x28] sm:$0xff] }
 0xc18   :  { %v3829_v60 = vpack.c.bf16 %v3826_v51, %v3823_v49  ;;  %v3945_v61 = vpack.c.bf16 %v3942_v55, %v3939_v50  ;;  %v8020_v50 = vld [vmem:[%s9889_s1 + $0x38] sm:$0xff] }
 0xc1a   :  { %3830 = vst.msk [vmem:[#allocation2 + $0x40] sm:$0xff] %vm188_vm1, %v3829_v60  ;;  %3946 = vst.msk [vmem:[#allocation2 + $0x48] sm:$0xff] %vm188_vm1, %v3945_v61  ;;  %7435 = vmatmul.mubr.msk.bf16.gmra.mrb[68].mxu0 %vm188_vm1, %v4182_v62 }
 0xc1b   :  { %7474 = vmatprep.mubr.msk.bf16.mxu0 %vm8022_vm0, %v8021_v2 }
 0xc21   :  { %v4187_v63 = vld [vmem:[#allocation2 + $0x40] sm:$0xff]  ;;  %v4188_v4 = vld [vmem:[#allocation2 + $0x48] sm:$0xff] }
 0xc22   :  { %7438 = vmatprep.subr.bf16.mxu1 %v4187_v63 }
 0xc23   :  { %7439 = vmatpush3.bf16.msra.mxu1 %v4187_v63 }
 0xc24   :  { %7440 = vmatprep.subr.bf16.mxu1 %v4188_v4 }
 0xc27   :  { %7441 = vmatpush3.bf16.msra.mxu1 %v4188_v4 }
 0xc33   :  { %v4054_v15 = vpop.f32.mrb[60].mxu0  ;;  %v4170_v8 = vpop.f32.mrb[76].mxu1 }
 0xc34   :  { %v7400_v9 = vpop.f32.mrb[61].mxu0  ;;  %v7420_v10 = vpop.f32.mrb[77].mxu1  ;;  %v4055_v14 = vadd.f32 %v6269_v5, %v4054_v15  ;;  %v4171_v17 = vadd.f32 %v6295_v16, %v4170_v8 }
 0xc35   :  { %v4057_v11 = vpop.f32.mrb[62].mxu0  ;;  %v4173_v45 = vpop.f32.mrb[78].mxu1 }
 0xc36   :  { %v4058_v18 = vadd.f32 %v6269_v5, %v4057_v11  ;;  %v4174_v21 = vadd.f32 %v6295_v16, %v4173_v45  ;;  %v7401_v22 = vpop.f32.mrb[63].mxu0  ;;  %v7421_v23 = vpop.f32.mrb[79].mxu1 }
 0xc38   :  { %v4061_v24 = vpack.c.bf16 %v4058_v18, %v4055_v14  ;;  %v4177_v25 = vpack.c.bf16 %v4174_v21, %v4171_v17 }
 0xc3a   :  { %4062 = vst.msk [vmem:[#allocation2 + $0x50] sm:$0xff] %vm188_vm1, %v4061_v24  ;;  %4178 = vst.msk [vmem:[#allocation2 + $0x58] sm:$0xff] %vm188_vm1, %v4177_v25 }
 0xc41   :  { %v4189_v41 = vld [vmem:[#allocation2 + $0x50] sm:$0xff]  ;;  %v4190_v42 = vld [vmem:[#allocation2 + $0x58] sm:$0xff] }
 0xc42   :  { %7442 = vmatprep.subr.bf16.mxu1 %v4189_v41 }
 0xc43   :  { %7443 = vmatpush3.bf16.msra.mxu1 %v4189_v41 }
 0xc44   :  { %7444 = vmatprep.subr.bf16.mxu1 %v4190_v42 }
 0xc47   :  { %7445 = vmatpush3.bf16.msra.mxu1 %v4190_v42 }
 0xc48   :  { %7454 = vmatprep.subr.bf16.mxu1 %v8021_v2 }
 0xce5   :  { %v7432_v26 = vpop.f32.mrb[64].mxu0 }
 0xce6   :  { %v4249_v27 = vpop.f32.mrb[65].mxu0  ;;  %v4258_v32 = vadd.f32 %v8014_v31, %v7432_v26 }
 0xce7   :  { %v4250_v13 = vadd.f32 %v8013_v28, %v4249_v27  ;;  %v7433_v29 = vpop.f32.mrb[66].mxu0 }
 0xce8   :  { %v4252_v30 = vpop.f32.mrb[67].mxu0  ;;  %v4261_v37 = vadd.f32 %v8016_v36, %v7433_v29  ;;  %v4286_v40 = vsel %vm1575_vm2, %v4258_v32, -inf }
 0xce9   :  { %v4253_v34 = vadd.f32 %v8015_v33, %v4252_v30  ;;  %v4280_v35 = vsel %vm1575_vm2, %v4250_v13, -inf }
 0xcea   :  { %4281 = vmax.xlane.f32.xlu0 %v4280_v35  ;;  %v4289_v12 = vsel %vm1575_vm2, %v4261_v37, -inf }
 0xceb   :  { %v4283_v38 = vsel %vm1575_vm2, %v4253_v34, -inf }
 0xcec   :  { %4284 = vmax.xlane.f32.xlu1 %v4283_v38 }
 0xced   :  { %v7436_v39 = vpop.f32.mrb[68].mxu0 }
 0xcee   :  { %v4265_v43 = vpop.f32.mrb[69].mxu0  ;;  %4287 = vmax.xlane.f32.xlu0 %v4286_v40  ;;  %v4274_v46 = vadd.f32 %v8018_v20, %v7436_v39 }
 0xcef   :  { %v4266_v1 = vadd.f32 %v8017_v44, %v4265_v43  ;;  %v7437_v7 = vpop.f32.mrb[70].mxu0 }
 0xcf0   :  { %v4268_v19 = vpop.f32.mrb[71].mxu0  ;;  %4290 = vmax.xlane.f32.xlu1 %v4289_v12  ;;  %v4277_v51 = vadd.f32 %v8020_v50, %v7437_v7  ;;  %v4298_v58 = vsel %vm1575_vm2, %v4274_v46, -inf }
 0xcf1   :  { %v4269_v48 = vadd.f32 %v8019_v47, %v4268_v19  ;;  %v4292_v49 = vsel %vm1575_vm2, %v4266_v1, -inf }
 0xcf2   :  { %4293 = vmax.xlane.f32.xlu0 %v4292_v49  ;;  %v4301_v59 = vsel %vm1575_vm2, %v4277_v51, -inf }
 0xcf3   :  { %v4295_v55 = vsel %vm1575_vm2, %v4269_v48, -inf }
 0xcf4   :  { %4296 = vmax.xlane.f32.xlu1 %v4295_v55 }
 0xcf6   :  { %4299 = vmax.xlane.f32.xlu0 %v4298_v58 }
 0xcf8   :  { %4302 = vmax.xlane.f32.xlu1 %v4301_v59 }
 0xd77   :  { %v4282_v60 = vpop.xlane.xlu0 %4281 }
 0xd78   :  { %v4304_v61 = vsub.f32 %v4250_v13, %v4282_v60 }
 0xd79   :  { %v4285_v62 = vpop.xlane.xlu1 %4284 }
 0xd7a   :  { %v4312_v63 = vmul.f32 1.442695, %v4304_v61  ;;  %v4305_v4 = vsub.f32 %v4253_v34, %v4285_v62 }
 0xd7b   :  { %v4288_v5 = vpop.xlane.xlu0 %4287 }
 0xd7c   :  { %7953 = vpow2.f32 %v4312_v63  ;;  %v4314_v15 = vmul.f32 1.442695, %v4305_v4  ;;  %v4306_v16 = vsub.f32 %v4258_v32, %v4288_v5  ;;  %v7797_v63 = vld [vmem:[%s9890_s4 + $0x40] sm:$0xff]  }
 0xd7d   :  { %v4291_v8 = vpop.xlane.xlu1 %4290 }
 0xd7e   :  { %7955 = vpow2.f32 %v4314_v15  ;;  %v4316_v9 = vmul.f32 1.442695, %v4306_v16  ;;  %v4307_v10 = vsub.f32 %v4261_v37, %v4291_v8 }
 0xd7f   :  { %v4294_v11 = vpop.xlane.xlu0 %4293 }
 0xd80   :  { %7957 = vpow2.f32 %v4316_v9  ;;  %v4318_v45 = vmul.f32 1.442695, %v4307_v10  ;;  %v4308_v14 = vsub.f32 %v4266_v1, %v4294_v11  ;;  %v7798_v9 = vld [vmem:[%s9890_s4 + $0x48] sm:$0xff]  }
 0xd81   :  { %v4297_v17 = vpop.xlane.xlu1 %4296 }
 0xd82   :  { %7959 = vpow2.f32 %v4318_v45  ;;  %v4320_v18 = vmul.f32 1.442695, %v4308_v14  ;;  %v4309_v21 = vsub.f32 %v4269_v48, %v4297_v17 }
 0xd83   :  { %v4300_v22 = vpop.xlane.xlu0 %4299 }
 0xd84   :  { %7961 = vpow2.f32 %v4320_v18  ;;  %v4322_v23 = vmul.f32 1.442695, %v4309_v21  ;;  %v4310_v24 = vsub.f32 %v4274_v46, %v4300_v22  ;;  %v7799_v18 = vld [vmem:[%s9890_s4 + $0x60] sm:$0xff]   ;;  %v7802_v21 = vld [vmem:[%s9890_s4 + $0x68] sm:$0xff]  }
 0xd85   :  { %v4303_v25 = vpop.xlane.xlu1 %4302  ;;  %7471 = vmatpush3.bf16.msra.mxu0 %v7799_v18 }
 0xd86   :  { %v7954_v41 = vpop.eup %7953  ;;  %7963 = vpow2.f32 %v4322_v23  ;;  %v4324_v42 = vmul.f32 1.442695, %v4310_v24  ;;  %v4311_v26 = vsub.f32 %v4277_v51, %v4303_v25  ;;  %7472 = vmatprep.subr.bf16.mxu0 %v8021_v2 }
 0xd87   :  { %v4328_v27 = vsel %vm1575_vm2, %v7954_v41, 0.0 }
 0xd88   :  { %v7956_v28 = vpop.eup %7955  ;;  %7965 = vpow2.f32 %v4324_v42  ;;  %v4326_v13 = vmul.f32 1.442695, %v4311_v26  ;;  %4329 = vadd.xlane.f32.xlu0 %v4328_v27  ;;  %v7800_v42 = vld [vmem:[%s9890_s4 + $0x50] sm:$0xff]   ;;  %v7801_v27 = vld [vmem:[%s9890_s4 + $0x58] sm:$0xff]  }
 0xd89   :  { %v4331_v29 = vsel %vm1575_vm2, %v7956_v28, 0.0  ;;  %7473 = vmatpush3.bf16.msra.mxu0 %v7802_v21 }
 0xd8a   :  { %v7958_v30 = vpop.eup %7957  ;;  %7967 = vpow2.f32 %v4326_v13  ;;  %4332 = vadd.xlane.f32.xlu1 %v4331_v29 }
 0xd8b   :  { %v4334_v31 = vsel %vm1575_vm2, %v7958_v30, 0.0 }
 0xd8c   :  { %v7960_v32 = vpop.eup %7959  ;;  %4335 = vadd.xlane.f32.xlu0 %v4334_v31 }
 0xd8d   :  { %v4337_v33 = vsel %vm1575_vm2, %v7960_v32, 0.0 }
 0xd8e   :  { %v7962_v34 = vpop.eup %7961  ;;  %4338 = vadd.xlane.f32.xlu1 %v4337_v33 }
 0xd8f   :  { %v4340_v35 = vsel %vm1575_vm2, %v7962_v34, 0.0 }
 0xd90   :  { %v7964_v36 = vpop.eup %7963  ;;  %4341 = vadd.xlane.f32.xlu0 %v4340_v35 }
 0xd91   :  { %v4343_v37 = vsel %vm1575_vm2, %v7964_v36, 0.0 }
 0xd92   :  { %v7966_v38 = vpop.eup %7965  ;;  %4344 = vadd.xlane.f32.xlu1 %v4343_v37 }
 0xd93   :  { %v4346_v39 = vsel %vm1575_vm2, %v7966_v38, 0.0 }
 0xd94   :  { %v7968_v40 = vpop.eup %7967  ;;  %4347 = vadd.xlane.f32.xlu0 %v4346_v39  ;;  %v4453_v39 = vld [vmem:[%s9887_s8 + $0x21] ss:$0 sm:$0xff] }
 0xd95   :  { %v4349_v43 = vsel %vm1575_vm2, %v7968_v40, 0.0 }
 0xd96   :  { %4350 = vadd.xlane.f32.xlu1 %v4349_v43 }
 0xe15   :  { %v4330_v44 = vpop.xlane.xlu0 %4329 }
 0xe16   :  { %7969 = vrcp.f32 %v4330_v44 }
 0xe17   :  { %v4333_v1 = vpop.xlane.xlu1 %4332 }
 0xe18   :  { %7971 = vrcp.f32 %v4333_v1 }
 0xe19   :  { %v4336_v7 = vpop.xlane.xlu0 %4335 }
 0xe1a   :  { %7973 = vrcp.f32 %v4336_v7 }
 0xe1b   :  { %v4339_v12 = vpop.xlane.xlu1 %4338 }
 0xe1c   :  { %7975 = vrcp.f32 %v4339_v12 }
 0xe1d   :  { %v4342_v19 = vpop.xlane.xlu0 %4341 }
 0xe1e   :  { %7977 = vrcp.f32 %v4342_v19 }
 0xe1f   :  { %v4345_v20 = vpop.xlane.xlu1 %4344 }
 0xe20   :  { %v7970_v46 = vpop.eup %7969  ;;  %7979 = vrcp.f32 %v4345_v20 }
 0xe21   :  { %v4348_v47 = vpop.xlane.xlu0 %4347  ;;  %v4360_v50 = vmul.f32 %v7970_v46, %v7954_v41 }
 0xe22   :  { %v7972_v48 = vpop.eup %7971  ;;  %7981 = vrcp.f32 %v4348_v47 }
 0xe23   :  { %v4351_v49 = vpop.xlane.xlu1 %4350  ;;  %v4361_v51 = vmul.f32 %v7972_v48, %v7956_v28 }
 0xe24   :  { %v7974_v55 = vpop.eup %7973  ;;  %7983 = vrcp.f32 %v4351_v49 }
 0xe25   :  { %v4368_v58 = vpack.c.bf16 %v4361_v51, %v4360_v50  ;;  %v4362_v60 = vmul.f32 %v7974_v55, %v7958_v30 }
 0xe26   :  { %v7976_v59 = vpop.eup %7975 }
 0xe27   :  { %v4363_v61 = vmul.f32 %v7976_v59, %v7960_v32  ;;  %7446 = vmatprep.mubr.msk.bf16.mxu1 %vm1575_vm2, %v4368_v58  ;;  %v7803_v32 = vld [vmem:[%s9890_s4 + $0x70] sm:$0xff]  }
 0xe28   :  { %v7978_v62 = vpop.eup %7977 }
 0xe29   :  { %v4369_v4 = vpack.c.bf16 %v4363_v61, %v4362_v60  ;;  %v4364_v15 = vmul.f32 %v7978_v62, %v7962_v34  ;;  %v7804_v34 = vld [vmem:[%s9890_s4 + $0x78] sm:$0xff]  }
 0xe2a   :  { %v7980_v5 = vpop.eup %7979 }
 0xe2b   :  { %7447 = vmatmul.mubr.msk.bf16.vlgmr.msra.gmra.mrb[80].mxu1 %vm1575_vm2, %v4369_v4  ;;  %v4365_v16 = vmul.f32 %v7980_v5, %v7964_v36  ;;  %v7805_v4 = vld [vmem:[%s9891_s5 + $0x100] ss:$16 sps:$4 sm:$0xff]   ;;  %v7807_v5 = vld [vmem:[%s9891_s5 + $0x104] ss:$16 sps:$4 sm:$0xff]  }
 0xe2c   :  { %v7982_v8 = vpop.eup %7981  ;;  %7455 = vmatpush3.bf16.msra.mxu1 %v7797_v63  ;;  %4953 = vmatprep.subr.bf16.mxu0 %v7807_v5  ;;  %v7855_v5 = vld [vmem:[%s9892_s6 + $0x100] sm:$0xff]  }
 0xe2d   :  { %v4370_v10 = vpack.c.bf16 %v4365_v16, %v4364_v15  ;;  %7456 = vmatprep.subr.bf16.mxu1 %v8021_v2  ;;  %v4366_v45 = vmul.f32 %v7982_v8, %v7966_v38  ;;  %v7808_v15 = vld [vmem:[%s9891_s5 + $0x108] ss:$16 sps:$4 sm:$0xff]   ;;  %v7816_v16 = vld [vmem:[%s9891_s5 + $0x12c] ss:$16 sps:$4 sm:$0xff]   ;;  %v7811_v8 = vld [vmem:[%s9891_s5 + $0x120] ss:$16 sps:$4 sm:$0xff]  }
 0xe2e   :  { %v7984_v11 = vpop.eup %7983 }
 0xe2f   :  { %7450 = vmatprep.mubr.msk.bf16.mxu1 %vm1575_vm2, %v4370_v10  ;;  %v4367_v14 = vmul.f32 %v7984_v11, %v7968_v40 }
 0xe30   :  { %7457 = vmatpush3.bf16.msra.mxu1 %v7798_v9  ;;  %v7814_v9 = vld [vmem:[%s9891_s5 + $0x128] ss:$16 sps:$4 sm:$0xff]  }
 0xe31   :  { %v4371_v17 = vpack.c.bf16 %v4367_v14, %v4366_v45  ;;  %7462 = vmatprep.subr.bf16.mxu1 %v8021_v2 }
 0xe33   :  { %7451 = vmatmul.mubr.msk.bf16.gmra.mrb[84].mxu1 %vm1575_vm2, %v4371_v17 }
 0xe34   :  { %7458 = vmatprep.mubr.msk.bf16.mxu1 %vm8022_vm0, %v8021_v2 }
 0xefe   :  { %v7448_v22 = vpop.f32.mrb[80].mxu1 }
 0xeff   :  { %v4418_v23 = vpop.f32.mrb[81].mxu1 }
 0xf00   :  { %v7449_v24 = vpop.f32.mrb[82].mxu1 }
 0xf01   :  { %v4450_v25 = vpack.c.bf16 %v7449_v24, %v7448_v22  ;;  %v4421_v41 = vpop.f32.mrb[83].mxu1  ;;  %v7822_v24 = vld [vmem:[%s9891_s5 + $0x14c] ss:$16 sps:$4 sm:$0xff]  }
 0xf02   :  { %v4449_v26 = vpack.c.bf16 %v4421_v41, %v4418_v23  ;;  %v7819_v23 = vld [vmem:[%s9891_s5 + $0x144] ss:$16 sps:$4 sm:$0xff]   ;;  %v7820_v41 = vld [vmem:[%s9891_s5 + $0x148] ss:$16 sps:$4 sm:$0xff]  }
 0xf04   :  { %7459 = vmatmul.mubr.msk.bf16.vlgmr.msra.gmra.mrb[88].mxu1 %vm188_vm1, %v4449_v26  ;;  %v7828_v26 = vld [vmem:[%s9891_s5 + $0x16c] ss:$16 sps:$4 sm:$0xff]  }
 0xf05   :  { %7463 = vmatpush3.bf16.msra.mxu1 %v7800_v42  ;;  %7466 = vmatprep.mubr.msk.bf16.mxu1 %vm8022_vm0, %v8021_v2  ;;  %v7825_v42 = vld [vmem:[%s9891_s5 + $0x164] ss:$16 sps:$4 sm:$0xff]  }
 0xf06   :  { %v7452_v28 = vpop.f32.mrb[84].mxu1  ;;  %7464 = vmatprep.subr.bf16.mxu1 %v8021_v2 }
 0xf07   :  { %v4434_v13 = vpop.f32.mrb[85].mxu1 }
 0xf08   :  { %v7453_v29 = vpop.f32.mrb[86].mxu1 }
 0xf09   :  { %v4452_v30 = vpack.c.bf16 %v7453_v29, %v7452_v28  ;;  %7465 = vmatpush3.bf16.msra.mxu1 %v7801_v27  ;;  %v4437_v31 = vpop.f32.mrb[87].mxu1  ;;  %v7823_v27 = vld [vmem:[%s9891_s5 + $0x160] ss:$16 sps:$4 sm:$0xff]   ;;  %v7826_v28 = vld [vmem:[%s9891_s5 + $0x168] ss:$16 sps:$4 sm:$0xff]  }
 0xf0a   :  { %v4451_v33 = vpack.c.bf16 %v4437_v31, %v4434_v13  ;;  %7478 = vmatprep.subr.bf16.mxu1 %v8021_v2  ;;  %v7831_v13 = vld [vmem:[%s9891_s5 + $0x184] ss:$16 sps:$4 sm:$0xff]   ;;  %v7834_v29 = vld [vmem:[%s9891_s5 + $0x18c] ss:$16 sps:$4 sm:$0xff]   ;;  %v7832_v31 = vld [vmem:[%s9891_s5 + $0x188] ss:$16 sps:$4 sm:$0xff]  }
 0xf0c   :  { %7467 = vmatmul.mubr.msk.bf16.vlgmr.msra.gmra.mrb[92].mxu1 %vm188_vm1, %v4450_v25  ;;  %7475 = vmatmul.mubr.msk.bf16.vlgmr.msra.gmra.mrb[72].mxu0 %vm188_vm1, %v4451_v33  ;;  %v7817_v25 = vld [vmem:[%s9891_s5 + $0x140] ss:$16 sps:$4 sm:$0xff]   ;;  %v7840_v33 = vld [vmem:[%s9891_s5 + $0x1ac] ss:$16 sps:$4 sm:$0xff]  }
 0xf0d   :  { %7479 = vmatpush3.bf16.msra.mxu1 %v7803_v32  ;;  %7482 = vmatprep.mubr.msk.bf16.mxu1 %vm8022_vm0, %v8021_v2  ;;  %v7837_v32 = vld [vmem:[%s9891_s5 + $0x1a4] ss:$16 sps:$4 sm:$0xff]  }
 0xf0e   :  { %7480 = vmatprep.subr.bf16.mxu1 %v8021_v2  ;;  %4985 = vmatprep.mubr.bf16.mxu0 %v8023_v0 }
 0xf0f   :  { %4954 = vmatpush1.bf16.msra.mxu0 %v7805_v4  ;;  %v7854_v4 = vld [vmem:[%s9892_s6 + $0x1c0] sm:$0xff]  }
 0xf11   :  { %7481 = vmatpush3.bf16.msra.mxu1 %v7804_v34  ;;  %v7835_v34 = vld [vmem:[%s9891_s5 + $0x1a0] ss:$16 sps:$4 sm:$0xff]  }
 0xf14   :  { %7483 = vmatmul.mubr.msk.bf16.vlgmr.msra.gmra.mrb[96].mxu1 %vm188_vm1, %v4452_v30  ;;  %v7829_v30 = vld [vmem:[%s9891_s5 + $0x180] ss:$16 sps:$4 sm:$0xff]  }
 0xf15   :  { %5028 = vmatprep.mubr.bf16.mxu1 %v8023_v0 }
 0xfd7   :  { %v4508_v35 = vpop.f32.mrb[88].mxu1 }
 0xfd8   :  { %v7460_v36 = vpop.f32.mrb[89].mxu1  ;;  %v4515_v40 = vadd.f32 %v4508_v35, %v4453_v39  ;;  %v7838_v35 = vld [vmem:[%s9891_s5 + $0x1a8] ss:$16 sps:$4 sm:$0xff]  }
 0xfd9   :  { %v4511_v37 = vpop.f32.mrb[90].mxu1  ;;  %v7843_v36 = vld [vmem:[%s9891_s5 + $0x1c4] ss:$16 sps:$4 sm:$0xff]  }
 0xfda   :  { %v7461_v38 = vpop.f32.mrb[91].mxu1  ;;  %v4516_v1 = vadd.f32 %v4511_v37, %v4453_v39  ;;  %v7846_v37 = vld [vmem:[%s9891_s5 + $0x1cc] ss:$16 sps:$4 sm:$0xff]   ;;  %v7844_v39 = vld [vmem:[%s9891_s5 + $0x1c8] ss:$16 sps:$4 sm:$0xff]  }
 0xfdb   :  { %v7841_v38 = vld [vmem:[%s9891_s5 + $0x1c0] ss:$16 sps:$4 sm:$0xff]  }
 0xfdf   :  { %v4571_v43 = vpop.f32.mrb[92].mxu1  ;;  %v4634_v44 = vpop.f32.mrb[72].mxu0 }
 0xfe0   :  { %v4578_v7 = vadd.f32 %v4571_v43, %v4515_v40  ;;  %v7468_v12 = vpop.f32.mrb[93].mxu1  ;;  %v7476_v19 = vpop.f32.mrb[73].mxu0  ;;  %v7849_v40 = vld [vmem:[%s9891_s5 + $0x1e4] ss:$16 sps:$4 sm:$0xff]   ;;  %v7847_v43 = vld [vmem:[%s9891_s5 + $0x1e0] ss:$16 sps:$4 sm:$0xff]  }
 0xfe1   :  { %v4574_v20 = vpop.f32.mrb[94].mxu1  ;;  %v4637_v46 = vpop.f32.mrb[74].mxu0 }
 0xfe2   :  { %v4641_v47 = vadd.f32 %v4634_v44, %v4578_v7  ;;  %v4579_v48 = vadd.f32 %v4574_v20, %v4516_v1  ;;  %v7469_v0 = vpop.f32.mrb[95].mxu1  ;;  %v7477_v49 = vpop.f32.mrb[75].mxu0  ;;  %v7850_v44 = vld [vmem:[%s9891_s5 + $0x1e8] ss:$16 sps:$4 sm:$0xff]   ;;  %v7852_v1 = vld [vmem:[%s9891_s5 + $0x1ec] ss:$16 sps:$4 sm:$0xff]  }
 0xfe3   :  { %v4708_v0 = vld [vmem:[%s9887_s8 + $0x22] ss:$0 sm:$0xff] }
 0xfe4   :  { %v4642_v50 = vadd.f32 %v4637_v46, %v4579_v48 }
 0xfe7   :  { %v4697_v51 = vpop.f32.mrb[96].mxu1 }
 0xfe8   :  { %v4704_v55 = vadd.f32 %v4697_v51, %v4641_v47  ;;  %v7484_v58 = vpop.f32.mrb[97].mxu1 }
 0xfe9   :  { %v4700_v59 = vpop.f32.mrb[98].mxu1  ;;  %v4709_v58 = vld [vmem:[%s9887_s8 + $0x23] ss:$0 sm:$0xff] }
 0xfea   :  { %v4705_v60 = vadd.f32 %v4700_v59, %v4642_v50  ;;  %v7485_v61 = vpop.f32.mrb[99].mxu1  ;;  %v4706_v62 = vadd.f32 %v4704_v55, %v9037_v3  ;;  %v7810_v3 = vld [vmem:[%s9891_s5 + $0x10c] ss:$16 sps:$4 sm:$0xff]  }
 0xfeb   :  { %4996 = vmatprep.subr.bf16.mxu1 %v7810_v3  ;;  %v7857_v3 = vld [vmem:[%s9892_s6 + $0x148] sm:$0xff]  }
 0xfec   :  { %4710 = vadd.xlane.f32.xlu0 %v4706_v62  ;;  %v4707_v63 = vadd.f32 %v4705_v60, %v9039_v6  ;;  %v7813_v6 = vld [vmem:[%s9891_s5 + $0x124] ss:$16 sps:$4 sm:$0xff]   ;;  %4997 = vmatpush1.bf16.msra.mxu1 %v7808_v15 }
 0xfed   :  { %4955 = vmatprep.subr.bf16.mxu0 %v7813_v6  ;;  %4998 = vmatprep.subr.bf16.mxu1 %v7816_v16  ;;  %v7856_v15 = vld [vmem:[%s9892_s6 + $0x180] sm:$0xff]   ;;  %v7858_v6 = vld [vmem:[%s9892_s6 + $0x1c8] sm:$0xff]  }
 0xfee   :  { %4712 = vadd.xlane.f32.xlu1 %v4707_v63  ;;  %4956 = vmatpush1.bf16.msra.mxu0 %v7811_v8  ;;  %v7859_v16 = vld [vmem:[%s9892_s6 + $0x108] sm:$0xff]  }
 0xfef   :  { %4957 = vmatprep.subr.bf16.mxu0 %v7819_v23  ;;  %v7860_v8 = vld [vmem:[%s9892_s6 + $0x188] sm:$0xff]   ;;  %v7870_v23 = vld [vmem:[%s9892_s6 + $0x1e0] sm:$0xff]  }
 0xff0   :  { %4999 = vmatpush1.bf16.msra.mxu1 %v7814_v9  ;;  %v7861_v9 = vld [vmem:[%s9892_s6 + $0x150] sm:$0xff]  }
 0xff1   :  { %5000 = vmatprep.subr.bf16.mxu1 %v7822_v24  ;;  %v7871_v24 = vld [vmem:[%s9892_s6 + $0x120] sm:$0xff]  }
 0xff2   :  { %4958 = vmatpush1.bf16.msra.mxu0 %v7817_v25  ;;  %v7872_v25 = vld [vmem:[%s9892_s6 + $0x1a0] sm:$0xff]  }
 0xff3   :  { %4959 = vmatprep.subr.bf16.mxu0 %v7825_v42  ;;  %v7874_v42 = vld [vmem:[%s9892_s6 + $0x1e8] sm:$0xff]  }
 0xff4   :  { %5001 = vmatpush1.bf16.msra.mxu1 %v7820_v41  ;;  %v7873_v41 = vld [vmem:[%s9892_s6 + $0x168] sm:$0xff]  }
 0xff5   :  { %5002 = vmatprep.subr.bf16.mxu1 %v7828_v26  ;;  %v7875_v26 = vld [vmem:[%s9892_s6 + $0x128] sm:$0xff]  }
 0xff6   :  { %4960 = vmatpush1.bf16.msra.mxu0 %v7823_v27  ;;  %v7876_v27 = vld [vmem:[%s9892_s6 + $0x1a8] sm:$0xff]  }
 0xff7   :  { %4961 = vmatprep.subr.bf16.mxu0 %v7831_v13  ;;  %v7878_v13 = vld [vmem:[%s9892_s6 + $0x1f0] sm:$0xff]  }
 0xff8   :  { %5003 = vmatpush1.bf16.msra.mxu1 %v7826_v28  ;;  %v7877_v28 = vld [vmem:[%s9892_s6 + $0x170] sm:$0xff]  }
 0xff9   :  { %5004 = vmatprep.subr.bf16.mxu1 %v7834_v29  ;;  %v7879_v29 = vld [vmem:[%s9892_s6 + $0x130] sm:$0xff]  }
 0xffa   :  { %4962 = vmatpush1.bf16.msra.mxu0 %v7829_v30  ;;  %v7880_v30 = vld [vmem:[%s9892_s6 + $0x1b0] sm:$0xff]  }
 0xffb   :  { %4963 = vmatprep.subr.bf16.mxu0 %v7837_v32  ;;  %v7882_v32 = vld [vmem:[%s9892_s6 + $0x1f8] sm:$0xff]  }
 0xffc   :  { %5005 = vmatpush1.bf16.msra.mxu1 %v7832_v31  ;;  %v7881_v31 = vld [vmem:[%s9892_s6 + $0x178] sm:$0xff]  }
 0xffd   :  { %5006 = vmatprep.subr.bf16.mxu1 %v7840_v33  ;;  %v7883_v33 = vld [vmem:[%s9892_s6 + $0x138] sm:$0xff]  }
 0xffe   :  { %4964 = vmatpush1.bf16.msra.mxu0 %v7835_v34  ;;  %v7884_v34 = vld [vmem:[%s9892_s6 + $0x1b8] sm:$0xff]  }
 0xfff   :  { %4965 = vmatprep.subr.bf16.mxu0 %v7843_v36 }
0x1000   :  { %5007 = vmatpush1.bf16.msra.mxu1 %v7838_v35  ;;  %v6372_v35 = vld [vmem:[%s9887_s8 + $0x24] ss:$8 sm:$0xf] }
0x1001   :  { %5008 = vmatprep.subr.bf16.mxu1 %v7846_v37  ;;  %v4776_v36 = vrot.slane %v6372_v35, %v2069_v53  ;;  %v4784_v37 = vrot.slane %v6372_v35, %v2077_v54 }
0x1002   :  { %4966 = vmatpush1.bf16.msra.mxu0 %v7841_v38  ;;  %v4780_v38 = vrot.slane %v6372_v35, %v2073_v56 }
0x1003   :  { %4967 = vmatprep.subr.bf16.mxu0 %v7849_v40 }
0x1004   :  { %5009 = vmatpush1.bf16.msra.mxu1 %v7844_v39  ;;  %v4788_v39 = vrot.slane %v6372_v35, %v2081_v57 }
0x1005   :  { %5010 = vmatprep.subr.bf16.mxu1 %v7852_v1 }
0x1006   :  { %4968 = vmatpush1.bf16.msra.mxu0 %v7847_v43 }
0x1008   :  { %5011 = vmatpush1.bf16.msra.mxu1 %v7850_v44 }
0x1009   :  { %6847 = vmatprep.subr.bf16.mxu1 %v7854_v4 }
0x1079   :  { %v4711_v10 = vpop.xlane.xlu0 %4710 }
0x107a   :  { %v4714_v11 = vmul.f32 0.0078125, %v4711_v10  ;;  %v7862_v10 = vld [vmem:[%s9892_s6 + $0x1d0] sm:$0xff]  }
0x107b   :  { %v4713_v45 = vpop.xlane.xlu1 %4712 }
0x107c   :  { %v9574_v14 = vsub.f32 %v4706_v62, %v4714_v11  ;;  %v4715_v17 = vmul.f32 0.0078125, %v4713_v45  ;;  %v7863_v11 = vld [vmem:[%s9892_s6 + $0x110] sm:$0xff]  }
0x107d   :  { %v7864_v45 = vld [vmem:[%s9892_s6 + $0x190] sm:$0xff]  }
0x107e   :  { %v9576_v18 = vsub.f32 %v4707_v63, %v4715_v17  ;;  %v4718_v21 = vmul.f32 %v9574_v14, %v9574_v14  ;;  %v7853_v63 = vld [vmem:[%s9892_s6 + $0x140] sm:$0xff]   ;;  %v7866_v17 = vld [vmem:[%s9892_s6 + $0x1d8] sm:$0xff]  }
0x107f   :  { %6825 = vmatprep.subr.bf16.mxu0 %v7853_v63 }
0x1080   :  { %4720 = vadd.xlane.f32.xlu0 %v4718_v21  ;;  %v4719_v22 = vmul.f32 %v9576_v18, %v9576_v18  ;;  %v7868_v21 = vld [vmem:[%s9892_s6 + $0x198] sm:$0xff]  }
0x1082   :  { %4722 = vadd.xlane.f32.xlu1 %v4719_v22  ;;  %v7869_v22 = vld [vmem:[%s9892_s6 + $0x160] sm:$0xff]  }
0x110d   :  { %v4721_v7 = vpop.xlane.xlu0 %4720 }
0x110e   :  { %v4724_v12 = vmul.f32 0.0078125, %v4721_v7 }
0x110f   :  { %v4723_v19 = vpop.xlane.xlu1 %4722 }
0x1110   :  { %v4726_v20 = vadd.f32 1e-05, %v4724_v12  ;;  %v4725_v46 = vmul.f32 0.0078125, %v4723_v19 }
0x1112   :  { %7985 = vrsqrt.f32 %v4726_v20  ;;  %v4727_v47 = vadd.f32 1e-05, %v4725_v46 }
0x1114   :  { %7987 = vrsqrt.f32 %v4727_v47 }
0x111c   :  { %v7986_v48 = vpop.eup %7985 }
0x111d   :  { %v4730_v49 = vmul.f32 %v7986_v48, %v9574_v14  ;;  %v7865_v14 = vld [vmem:[%s9892_s6 + $0x158] sm:$0xff]  }
0x111e   :  { %v7988_v50 = vpop.eup %7987 }
0x111f   :  { %v4731_v51 = vmul.f32 %v7988_v50, %v9576_v18  ;;  %v4732_v55 = vmul.f32 %v4730_v49, %v4708_v0  ;;  %v7867_v18 = vld [vmem:[%s9892_s6 + $0x118] sm:$0xff]  }
0x1121   :  { %v4733_v59 = vmul.f32 %v4731_v51, %v4708_v0  ;;  %v9662_v60 = vadd.f32 %v4732_v55, %v4709_v58 }
0x1123   :  { %v9664_v61 = vadd.f32 %v4733_v59, %v4709_v58 }
0x1125   :  { %v4736_v62 = vpack.c.bf16 %v9664_v61, %v9662_v60 }
0x1127   :  { %4986 = vmatmul.mubr.bf16.vlgmr.msra.gmra.mrb[76].mxu0 %v4736_v62  ;;  %5029 = vmatmul.mubr.bf16.vlgmr.msra.gmra.mrb[100].mxu1 %v4736_v62 }
0x1128   :  { %6826 = vmatpush3.bf16.msra.mxu0 %v7855_v5  ;;  %6848 = vmatpush3.bf16.msra.mxu1 %v7856_v15 }
0x1129   :  { %6827 = vmatprep.subr.bf16.mxu0 %v7857_v3  ;;  %6849 = vmatprep.subr.bf16.mxu1 %v7858_v6 }
0x112c   :  { %6828 = vmatpush3.bf16.msra.mxu0 %v7859_v16  ;;  %6850 = vmatpush3.bf16.msra.mxu1 %v7860_v8 }
0x112d   :  { %6829 = vmatprep.subr.bf16.mxu0 %v7861_v9  ;;  %6851 = vmatprep.subr.bf16.mxu1 %v7862_v10 }
0x1130   :  { %6830 = vmatpush3.bf16.msra.mxu0 %v7863_v11  ;;  %6852 = vmatpush3.bf16.msra.mxu1 %v7864_v45 }
0x1131   :  { %6831 = vmatprep.subr.bf16.mxu0 %v7865_v14  ;;  %6853 = vmatprep.subr.bf16.mxu1 %v7866_v17 }
0x1134   :  { %6832 = vmatpush3.bf16.msra.mxu0 %v7867_v18  ;;  %6854 = vmatpush3.bf16.msra.mxu1 %v7868_v21 }
0x1135   :  { %6833 = vmatprep.subr.bf16.mxu0 %v7869_v22  ;;  %6855 = vmatprep.subr.bf16.mxu1 %v7870_v23 }
0x1138   :  { %6834 = vmatpush3.bf16.msra.mxu0 %v7871_v24  ;;  %6856 = vmatpush3.bf16.msra.mxu1 %v7872_v25 }
0x1139   :  { %6835 = vmatprep.subr.bf16.mxu0 %v7873_v41  ;;  %6857 = vmatprep.subr.bf16.mxu1 %v7874_v42 }
0x113c   :  { %6836 = vmatpush3.bf16.msra.mxu0 %v7875_v26  ;;  %6858 = vmatpush3.bf16.msra.mxu1 %v7876_v27 }
0x113d   :  { %6837 = vmatprep.subr.bf16.mxu0 %v7877_v28  ;;  %6859 = vmatprep.subr.bf16.mxu1 %v7878_v13 }
0x1140   :  { %6838 = vmatpush3.bf16.msra.mxu0 %v7879_v29  ;;  %6860 = vmatpush3.bf16.msra.mxu1 %v7880_v30 }
0x1141   :  { %6839 = vmatprep.subr.bf16.mxu0 %v7881_v31  ;;  %6861 = vmatprep.subr.bf16.mxu1 %v7882_v32 }
0x1144   :  { %6840 = vmatpush3.bf16.msra.mxu0 %v7883_v33  ;;  %6862 = vmatpush3.bf16.msra.mxu1 %v7884_v34 }
0x1145   :  { %7486 = vmatprep.subr.bf16.mxu0 %v8021_v2 }
0x11fa   :  { %v4987_v40 = vpop.f32.mrb[76].mxu0  ;;  %v5030_v43 = vpop.f32.mrb[100].mxu1 }
0x11fb   :  { %v9776_v44 = vadd.f32 %v4987_v40, %v4776_v36  ;;  %v9778_v1 = vadd.f32 %v5030_v43, %v4784_v37  ;;  %v4989_v7 = vpop.f32.mrb[77].mxu0  ;;  %v5032_v12 = vpop.f32.mrb[101].mxu1 }
0x11fc   :  { %v9780_v19 = vadd.f32 %v4989_v7, %v4780_v38  ;;  %v9782_v53 = vadd.f32 %v5032_v12, %v4788_v39  ;;  %v4991_v20 = vpop.f32.mrb[78].mxu0  ;;  %v5034_v54 = vpop.f32.mrb[102].mxu1 }
0x11fd   :  { %v5039_v56 = vmul.f32 %v9776_v44, %v9776_v44  ;;  %v5041_v52 = vmul.f32 %v9778_v1, %v9778_v1  ;;  %v9788_v57 = vadd.f32 %v4991_v20, %v4776_v36  ;;  %v9790_v46 = vadd.f32 %v5034_v54, %v4784_v37  ;;  %v4993_v47 = vpop.f32.mrb[79].mxu0  ;;  %v5036_v48 = vpop.f32.mrb[103].mxu1 }
0x11fe   :  { %v5040_v0 = vmul.f32 %v9780_v19, %v9780_v19  ;;  %v5042_v49 = vmul.f32 %v9782_v53, %v9782_v53  ;;  %v9796_v50 = vadd.f32 %v4993_v47, %v4780_v38  ;;  %v9798_v51 = vadd.f32 %v5036_v48, %v4788_v39 }
0x11ff   :  { %v5047_v55 = vmul.f32 %v5039_v56, %v9776_v44  ;;  %v5049_v58 = vmul.f32 %v5041_v52, %v9778_v1  ;;  %v5043_v59 = vmul.f32 %v9788_v57, %v9788_v57  ;;  %v5045_v62 = vmul.f32 %v9790_v46, %v9790_v46 }
0x1200   :  { %v5048_v63 = vmul.f32 %v5040_v0, %v9780_v19  ;;  %v5050_v4 = vmul.f32 %v5042_v49, %v9782_v53  ;;  %v5044_v5 = vmul.f32 %v9796_v50, %v9796_v50  ;;  %v5046_v15 = vmul.f32 %v9798_v51, %v9798_v51 }
0x1201   :  { %v5055_v3 = vmul.f32 0.044715, %v5047_v55  ;;  %v5057_v6 = vmul.f32 0.044715, %v5049_v58  ;;  %v5051_v16 = vmul.f32 %v5043_v59, %v9788_v57  ;;  %v5053_v8 = vmul.f32 %v5045_v62, %v9790_v46 }
0x1202   :  { %v5056_v9 = vmul.f32 0.044715, %v5048_v63  ;;  %v5058_v10 = vmul.f32 0.044715, %v5050_v4  ;;  %v5052_v11 = vmul.f32 %v5044_v5, %v9796_v50  ;;  %v5054_v45 = vmul.f32 %v5046_v15, %v9798_v51 }
0x1203   :  { %v5063_v14 = vadd.f32 %v5055_v3, %v9776_v44  ;;  %v5065_v17 = vadd.f32 %v5057_v6, %v9778_v1  ;;  %v5059_v18 = vmul.f32 0.044715, %v5051_v16  ;;  %v5061_v21 = vmul.f32 0.044715, %v5053_v8 }
0x1204   :  { %v5064_v22 = vadd.f32 %v5056_v9, %v9780_v19  ;;  %v5066_v23 = vadd.f32 %v5058_v10, %v9782_v53  ;;  %v5060_v24 = vmul.f32 0.044715, %v5052_v11  ;;  %v5062_v25 = vmul.f32 0.044715, %v5054_v45 }
0x1205   :  { %v5071_v41 = vmul.f32 0.7978846, %v5063_v14  ;;  %v5073_v42 = vmul.f32 0.7978846, %v5065_v17  ;;  %v5067_v26 = vadd.f32 %v5059_v18, %v9788_v57  ;;  %v5069_v27 = vadd.f32 %v5061_v21, %v9790_v46 }
0x1206   :  { %v5072_v28 = vmul.f32 0.7978846, %v5064_v22  ;;  %v5074_v13 = vmul.f32 0.7978846, %v5066_v23  ;;  %v5068_v29 = vadd.f32 %v5060_v24, %v9796_v50  ;;  %v5070_v30 = vadd.f32 %v5062_v25, %v9798_v51 }
0x1207   :  { %7989 = vtanh.f32 %v5071_v41  ;;  %v5075_v31 = vmul.f32 0.7978846, %v5067_v26  ;;  %v5077_v32 = vmul.f32 0.7978846, %v5069_v27 }
0x1208   :  { %7991 = vtanh.f32 %v5073_v42  ;;  %v5076_v33 = vmul.f32 0.7978846, %v5068_v29  ;;  %v5078_v34 = vmul.f32 0.7978846, %v5070_v30  ;;  %v7885_v29 = vld [vmem:[%s9893_s7] sm:$0xff]   ;;  %v7886_v30 = vld [vmem:[%s9893_s7 + $0x8] sm:$0xff]  }
0x1209   :  { %7993 = vtanh.f32 %v5072_v28 }
0x120a   :  { %7995 = vtanh.f32 %v5074_v13 }
0x120b   :  { %7997 = vtanh.f32 %v5075_v31 }
0x120c   :  { %7999 = vtanh.f32 %v5077_v32 }
0x120d   :  { %8001 = vtanh.f32 %v5076_v33 }
0x120e   :  { %8003 = vtanh.f32 %v5078_v34 }
0x1211   :  { %v7990_v35 = vpop.eup %7989 }
0x1212   :  { %v7992_v36 = vpop.eup %7991  ;;  %v5087_v37 = vadd.f32 1.0, %v7990_v35 }
0x1213   :  { %v7994_v38 = vpop.eup %7993  ;;  %v5089_v39 = vadd.f32 1.0, %v7992_v36 }
0x1214   :  { %v7996_v40 = vpop.eup %7995  ;;  %v5088_v43 = vadd.f32 1.0, %v7994_v38  ;;  %v5095_v54 = vmul.f32 0.5, %v5087_v37  ;;  %v7887_v37 = vld [vmem:[%s9893_s7 + $0x10] sm:$0xff]   ;;  %v7888_v38 = vld [vmem:[%s9893_s7 + $0x18] sm:$0xff]  }
0x1215   :  { %v7998_v7 = vpop.eup %7997  ;;  %v5090_v12 = vadd.f32 1.0, %v7996_v40  ;;  %v5097_v47 = vmul.f32 0.5, %v5089_v39  ;;  %v7889_v39 = vld [vmem:[%s9893_s7 + $0x20] sm:$0xff]   ;;  %v7890_v40 = vld [vmem:[%s9893_s7 + $0x28] sm:$0xff]  }
0x1216   :  { %v8000_v20 = vpop.eup %7999  ;;  %v5091_v56 = vadd.f32 1.0, %v7998_v7  ;;  %v5096_v58 = vmul.f32 0.5, %v5088_v43  ;;  %v5103_v4 = vmul.f32 %v5095_v54, %v9776_v44  ;;  %v7891_v43 = vld [vmem:[%s9893_s7 + $0x30] sm:$0xff]   ;;  %v7892_v7 = vld [vmem:[%s9893_s7 + $0x38] sm:$0xff]  }
0x1217   :  { %v8002_v52 = vpop.eup %8001  ;;  %v5093_v48 = vadd.f32 1.0, %v8000_v20  ;;  %v5098_v63 = vmul.f32 0.5, %v5090_v12  ;;  %v5105_v3 = vmul.f32 %v5097_v47, %v9778_v1 }
0x1218   :  { %v8004_v0 = vpop.eup %8003  ;;  %v5099_v49 = vmul.f32 0.5, %v5091_v56  ;;  %v5092_v55 = vadd.f32 1.0, %v8002_v52  ;;  %v5104_v8 = vmul.f32 %v5096_v58, %v9780_v19  ;;  %v5180_v19 = vld [vmem:[%s9887_s8 + $0x25] ss:$0 sm:$0xff] }
0x1219   :  { %v5101_v59 = vmul.f32 0.5, %v5093_v48  ;;  %v5094_v62 = vadd.f32 1.0, %v8004_v0  ;;  %v5106_v11 = vmul.f32 %v5098_v63, %v9782_v53  ;;  %v5457_v0 = vld [vmem:[%s9887_s8 + $0x26] ss:$0 sm:$0xff] }
0x121a   :  { %v5107_v5 = vmul.f32 %v5099_v49, %v9788_v57  ;;  %v5100_v15 = vmul.f32 0.5, %v5092_v55 }
0x121b   :  { %v5109_v6 = vmul.f32 %v5101_v59, %v9790_v46  ;;  %v5102_v16 = vmul.f32 0.5, %v5094_v62 }
0x121c   :  { %v5108_v9 = vmul.f32 %v5100_v15, %v9796_v50  ;;  %v5111_v10 = vpack.c.bf16 %v5107_v5, %v5103_v4  ;;  %v5502_v15 = vld [vmem:[%s9887_s8 + $0x40] ss:$0 sm:$0xff] }
0x121d   :  { %v5110_v45 = vmul.f32 %v5102_v16, %v9798_v51  ;;  %v5113_v14 = vpack.c.bf16 %v5109_v6, %v5105_v3 }
0x121e   :  { %v5112_v17 = vpack.c.bf16 %v5108_v9, %v5104_v8 }
0x121f   :  { %v5114_v44 = vpack.c.bf16 %v5110_v45, %v5106_v11 }
0x1220   :  { %5405 = vmatprep.mubr.bf16.mxu0 %v5112_v17 }
0x1221   :  { %5446 = vmatprep.mubr.bf16.mxu1 %v5114_v44  ;;  %5406 = vmatmul.mubr.bf16.vlgmr.msra.gmra.mrb[80].mxu0 %v5111_v10 }
0x1222   :  { %5447 = vmatmul.mubr.bf16.vlgmr.msra.gmra.mrb[104].mxu1 %v5113_v14  ;;  %7502 = vmatprep.mubr.msk.bf16.mxu0 %vm8022_vm0, %v8021_v2 }
0x1223   :  { %7487 = vmatpush3.bf16.msra.mxu0 %v7885_v29 }
0x1224   :  { %7488 = vmatprep.subr.bf16.mxu0 %v8021_v2 }
0x1227   :  { %7489 = vmatpush3.bf16.msra.mxu0 %v7886_v30 }
0x1228   :  { %7490 = vmatprep.subr.bf16.mxu0 %v8021_v2 }
0x122b   :  { %7491 = vmatpush3.bf16.msra.mxu0 %v7887_v37 }
0x122c   :  { %7492 = vmatprep.subr.bf16.mxu0 %v8021_v2 }
0x122f   :  { %7493 = vmatpush3.bf16.msra.mxu0 %v7888_v38 }
0x1230   :  { %7494 = vmatprep.subr.bf16.mxu0 %v8021_v2 }
0x1233   :  { %7495 = vmatpush3.bf16.msra.mxu0 %v7889_v39 }
0x1234   :  { %7496 = vmatprep.subr.bf16.mxu0 %v8021_v2 }
0x1237   :  { %7497 = vmatpush3.bf16.msra.mxu0 %v7890_v40 }
0x1238   :  { %7498 = vmatprep.subr.bf16.mxu0 %v8021_v2 }
0x123b   :  { %7499 = vmatpush3.bf16.msra.mxu0 %v7891_v43 }
0x123c   :  { %7500 = vmatprep.subr.bf16.mxu0 %v8021_v2  ;;  %v5458_v2 = vld [vmem:[%s9887_s8 + $0x27] ss:$0 sm:$0xff] }
0x123f   :  { %7501 = vmatpush3.bf16.msra.mxu0 %v7892_v7 }
0x12f4   :  { %v6841_v1 = vpop.f32.mrb[80].mxu0 }
0x12f5   :  { %v6863_v57 = vpop.f32.mrb[104].mxu1  ;;  %v6842_v46 = vpop.f32.mrb[81].mxu0 }
0x12f6   :  { %v6843_v53 = vadd.f32 %v6842_v46, %v6841_v1  ;;  %v6864_v50 = vpop.f32.mrb[105].mxu1  ;;  %v6844_v51 = vpop.f32.mrb[82].mxu0 }
0x12f7   :  { %v6865_v18 = vadd.f32 %v6864_v50, %v6863_v57  ;;  %v6866_v21 = vpop.f32.mrb[106].mxu1  ;;  %v6845_v22 = vpop.f32.mrb[83].mxu0 }
0x12f8   :  { %v5408_v23 = vadd.f32 %v6843_v53, %v5180_v19  ;;  %v6846_v24 = vadd.f32 %v6845_v22, %v6844_v51  ;;  %v6867_v25 = vpop.f32.mrb[107].mxu1 }
0x12f9   :  { %v6868_v41 = vadd.f32 %v6867_v25, %v6866_v21 }
0x12fa   :  { %v5449_v42 = vadd.f32 %v6865_v18, %v5408_v23  ;;  %v5411_v26 = vadd.f32 %v6846_v24, %v5180_v19 }
0x12fc   :  { %v5452_v27 = vadd.f32 %v6868_v41, %v5411_v26  ;;  %v5455_v28 = vadd.f32 %v5449_v42, %v9662_v60 }
0x12fe   :  { %5459 = vadd.xlane.f32.xlu0 %v5455_v28  ;;  %v5456_v13 = vadd.f32 %v5452_v27, %v9664_v61 }
0x1300   :  { %5461 = vadd.xlane.f32.xlu1 %v5456_v13 }
0x138b   :  { %v5460_v31 = vpop.xlane.xlu0 %5459 }
0x138c   :  { %v5463_v60 = vmul.f32 0.0078125, %v5460_v31 }
0x138d   :  { %v5462_v32 = vpop.xlane.xlu1 %5461 }
0x138e   :  { %v5465_v33 = vsub.f32 %v5455_v28, %v5463_v60  ;;  %v5464_v61 = vmul.f32 0.0078125, %v5462_v32 }
0x1390   :  { %v5466_v34 = vsub.f32 %v5456_v13, %v5464_v61  ;;  %v5467_v35 = vmul.f32 %v5465_v33, %v5465_v33 }
0x1392   :  { %5469 = vadd.xlane.f32.xlu0 %v5467_v35  ;;  %v5468_v36 = vmul.f32 %v5466_v34, %v5466_v34 }
0x1394   :  { %5471 = vadd.xlane.f32.xlu1 %v5468_v36 }
0x141f   :  { %v5470_v12 = vpop.xlane.xlu0 %5469 }
0x1420   :  { %v5473_v20 = vmul.f32 0.0078125, %v5470_v12 }
0x1421   :  { %v5472_v54 = vpop.xlane.xlu1 %5471 }
0x1422   :  { %v5475_v56 = vadd.f32 1e-05, %v5473_v20  ;;  %v5474_v52 = vmul.f32 0.0078125, %v5472_v54 }
0x1424   :  { %8005 = vrsqrt.f32 %v5475_v56  ;;  %v5476_v47 = vadd.f32 1e-05, %v5474_v52 }
0x1426   :  { %8007 = vrsqrt.f32 %v5476_v47 }
0x142e   :  { %v8006_v48 = vpop.eup %8005 }
0x142f   :  { %v5479_v49 = vmul.f32 %v8006_v48, %v5465_v33 }
0x1430   :  { %v8008_v55 = vpop.eup %8007 }
0x1431   :  { %v5480_v58 = vmul.f32 %v8008_v55, %v5466_v34  ;;  %v5481_v59 = vmul.f32 %v5479_v49, %v5457_v0 }
0x1433   :  { %v5482_v62 = vmul.f32 %v5480_v58, %v5457_v0  ;;  %v5483_v63 = vadd.f32 %v5481_v59, %v5458_v2 }
0x1435   :  { %v5484_v4 = vadd.f32 %v5482_v62, %v5458_v2 }
0x1437   :  { %v5485_v5 = vpack.c.bf16 %v5484_v4, %v5483_v63 }
0x1439   :  { %7503 = vmatmul.mubr.bf16.vlgmr.msra.gmra.mrb[84].mxu0 %v5485_v5 }
0x150c   :  { %v5585_v3 = vpop.f32.mrb[84].mxu0 }
0x150d   :  { %v5586_v6 = vadd.f32 %v5585_v3, %v5502_v15  ;;  %v7504_v16 = vpop.f32.mrb[85].mxu0 }
0x150e   :  { %v5588_v8 = vpop.f32.mrb[86].mxu0 }
0x150f   :  { %8009 = vtanh.f32 %v5586_v6  ;;  %v5589_v9 = vadd.f32 %v5588_v8, %v5502_v15  ;;  %v7505_v10 = vpop.f32.mrb[87].mxu0 }
0x1511   :  { %8011 = vtanh.f32 %v5589_v9 }
0x1519   :  { %v8010_v11 = vpop.eup %8009 }
0x151a   :  { %5594 = vst [vmem:[%s9894_s9] sm:$0xff] %v8010_v11 }
0x151b   :  { %v8012_v45 = vpop.eup %8011 }
0x151c   :  { %5595 = vst [vmem:[%s9894_s9 + $0x8] sm:$0xff] %v8012_v45 }

</bundles_post_ra>
